<compile_context>
chip_gen: v7x
topology: tpu7x:2x2x1
jax: 0.10.0
libtpu: 0.0.40
codegen_flags: <defaults>
</compile_context>

<pallas_src>
import functools
import math

import jax
import jax.numpy as jnp
from jax.experimental import pallas as pl
from jax.experimental.pallas import tpu as pltpu

_INV_SQRT2 = 1.0 / math.sqrt(2.0)


def _gelu_exact(h):
    # Exact erf formulation (PyTorch nn.GELU default), evaluated in f32.
    return 0.5 * h * (1.0 + jax.lax.erf(h * _INV_SQRT2))


# ---------------------------------------------------------------------------
# Kernel A: hidden dim fully VMEM-resident (h_steps == 1).  Grid = (m_steps,).
# W1/W2/biases have grid-invariant index_maps -> DMA'd once for the whole grid.
# ---------------------------------------------------------------------------
def _ffn_fused_kernel(x_ref, w1_ref, b1_ref, w2_ref, b2_ref, o_ref, *, precision):
    # Note: when M % tile_m != 0 the padded tail rows of the x block hold
    # unspecified data; they flow through erf but are masked on store, so the
    # visible output is correct.
    x = x_ref[...].astype(w1_ref.dtype)          # cast in-kernel: x read once/step
    h = jnp.dot(x, w1_ref[...], preferred_element_type=jnp.float32,
                precision=precision)
    h = _gelu_exact(h + b1_ref[...])
    # Dropout(p=0.0) is identity.
    y = jnp.dot(h.astype(w2_ref.dtype), w2_ref[...],
                preferred_element_type=jnp.float32, precision=precision)
    o_ref[...] = (y + b2_ref[...]).astype(o_ref.dtype)


# ---------------------------------------------------------------------------
# Kernel B: hidden dim tiled (reduction axis last in the grid).  Accumulates
# the second matmul in f32.  If the output dtype is f32 the output block
# (resident across k) is the accumulator; otherwise a VMEM f32 scratch is used.
# ---------------------------------------------------------------------------
def _ffn_tiled_kernel(x_ref, w1_ref, b1_ref, w2_ref, b2_ref, o_ref, *scratch,
                      precision):
    acc_ref = scratch[0] if scratch else o_ref
    k = pl.program_id(1)

    @pl.when(k == 0)
    def _():
        acc_ref[...] = jnp.zeros_like(acc_ref)

    x = x_ref[...].astype(w1_ref.dtype)
    h = jnp.dot(x, w1_ref[...], preferred_element_type=jnp.float32,
                precision=precision)
    h = _gelu_exact(h + b1_ref[...])
    # Dropout(p=0.0) is identity.
    acc_ref[...] += jnp.dot(h.astype(w2_ref.dtype), w2_ref[...],
                            preferred_element_type=jnp.float32,
                            precision=precision)

    @pl.when(k == pl.num_programs(1) - 1)
    def _():
        o_ref[...] = (acc_ref[...] + b2_ref[...]).astype(o_ref.dtype)


# ---------------------------------------------------------------------------
# Tile selection / VMEM budgeting
# ---------------------------------------------------------------------------
def _round_up(x, m):
    return ((x + m - 1) // m) * m


def _vmem_budget_bytes():
    """~80% of this generation's VMEM (102 MiB on 128-MiB chips, 51 MiB on v7x's
    64-MiB per-TC).  Falls back to the conservative v7x figure."""
    cap = None
    try:
        cap = getattr(pltpu.get_tpu_info(), "vmem_capacity_bytes", None)
    except Exception:
        cap = None
    if not cap or cap <= 0:
        cap = 64 << 20
    return max(int(cap * 0.80), 24 << 20)


def _vmem_needed(tile_m, tile_h, dim, dim_out, x_isz, w_isz, out_isz, use_scratch):
    lane = lambda n: _round_up(n, 128)
    d, th, do = lane(dim), lane(tile_h), lane(dim_out)
    b = 2 * tile_m * d * x_isz            # x tile, double-buffered
    b += 2 * d * th * w_isz               # W1 block, double-buffered (conservative)
    b += 2 * th * do * w_isz              # W2 block, double-buffered (conservative)
    b += 2 * 8 * th * 4                   # b1 chunk (f32, sublane-padded)
    b += 2 * 8 * do * 4                   # b2 (f32)
    b += 2 * tile_m * do * out_isz        # out tile, double-buffered
    if use_scratch:
        b += tile_m * do * 4              # f32 accumulator scratch
    b += 2 * tile_m * th * 4              # f32 GELU / first-matmul intermediates
    return b


def _select_tiles(M, dim, H, dim_out, x_isz, w_isz, out_isz, out_is_f32, budget):
    rup_m = max(_round_up(M, 8), 8)
    cands_m = [t for t in (1024, 512, 256, 128) if t <= rup_m] or [rup_m]

    # 1) Prefer fully VMEM-resident weights (tile_h = H): weights stream from
    #    HBM once for the entire grid (biggest HBM saving).
    for tm in cands_m:
        if _vmem_needed(tm, H, dim, dim_out, x_isz, w_isz, out_isz, False) <= budget:
            return tm, H

    # 2) Otherwise tile H.  Maximize tile_m first (weight-streaming arithmetic
    #    intensity), then tile_h (fewer f32 accumulator RMW passes per m-tile).
    cands_h = [t for t in (2048, 1024, 512, 384, 256, 128) if t < H and H % t == 0]
    for tm in cands_m:
        for th in cands_h:
            if _vmem_needed(tm, th, dim, dim_out, x_isz, w_isz, out_isz,
                            not out_is_f32) <= budget:
                return tm, th

    raise ValueError(
        f"Cannot fit FeedForward tiles in the VMEM budget ({budget} bytes) for "
        f"dim={dim}, H={H}, dim_out={dim_out}; when H is not VMEM-resident it "
        f"must be divisible by a multiple of 128.")


# ---------------------------------------------------------------------------
# Wrapper
# ---------------------------------------------------------------------------
def feed_forward_pallas(x, w1, b1, w2, b2, *, tile_m=None, tile_h=None):
    """x: [..., dim] -> [..., dim_out].

    Weights are in [in, out] layout (transpose of nn.Linear.weight) and are fed
    to the MXU in their stored dtype (store bf16 for the fast path); no
    wrapper-side casts.  x is streamed in its own dtype and cast to the weight
    dtype per tile inside the kernel.  f32 weights use precision=HIGHEST.
    """
    orig_shape = x.shape
    out_dtype = x.dtype
    dim = orig_shape[-1]
    H = w1.shape[1]
    dim_out = w2.shape[1]
    assert w1.shape == (dim, H) and w2.shape == (H, dim_out)
    assert b1.shape[-1] == H and b2.shape[-1] == dim_out

    x2d = x.reshape(-1, dim)
    M = x2d.shape[0]

    x_isz = jnp.dtype(x.dtype).itemsize
    w_isz = jnp.dtype(w1.dtype).itemsize
    out_isz = jnp.dtype(out_dtype).itemsize
    out_is_f32 = jnp.dtype(out_dtype) == jnp.float32

    budget = _vmem_budget_bytes()
    auto_tm, auto_th = _select_tiles(M, dim, H, dim_out, x_isz, w_isz, out_isz,
                                     out_is_f32, budget)
    user_tm = tile_m is not None
    tile_m = auto_tm if tile_m is None else tile_m
    tile_h = auto_th if tile_h is None else tile_h
    if H % tile_h != 0:
        raise ValueError(f"tile_h={tile_h} must divide H={H}")

    m_steps = (M + tile_m - 1) // tile_m
    # Guarantee >= 2 token tiles for larger problems so the 'parallel' M axis
    # can shard across v7x's two TensorCores (harmless on 1-TC chips).
    if (not user_tm) and m_steps == 1 and M > 256:
        tile_m = _round_up((M + 1) // 2, 128)
        m_steps = (M + tile_m - 1) // tile_m
    h_steps = H // tile_h

    b1_2d = b1.reshape(1, H).astype(jnp.float32)
    b2_2d = b2.reshape(1, dim_out).astype(jnp.float32)

    precision = (jax.lax.Precision.HIGHEST
                 if jnp.dtype(w1.dtype) == jnp.float32 else None)

    flops = 2 * M * (dim * H + H * dim_out)
    weight_bytes = (w1.size + w2.size) * w_isz
    bytes_accessed = (x2d.size * x_isz + M * dim_out * out_isz
                      + (H + dim_out) * 4
                      + (weight_bytes if h_steps == 1 else m_steps * weight_bytes))
    cost = pl.CostEstimate(flops=int(flops), transcendentals=int(M * H),
                           bytes_accessed=int(bytes_accessed))

    if h_steps == 1:
        # --- weight-resident fused path: 1-D grid over token tiles ---
        grid_spec = pltpu.PrefetchScalarGridSpec(
            num_scalar_prefetch=0,
            grid=(m_steps,),
            in_specs=[
                pl.BlockSpec((tile_m, dim), lambda i: (i, 0)),      # x tile
                pl.BlockSpec((dim, H), lambda i: (0, 0)),           # W1 (resident)
                pl.BlockSpec((1, H), lambda i: (0, 0)),             # b1 (resident)
                pl.BlockSpec((H, dim_out), lambda i: (0, 0)),       # W2 (resident)
                pl.BlockSpec((1, dim_out), lambda i: (0, 0)),       # b2 (resident)
            ],
            out_specs=pl.BlockSpec((tile_m, dim_out), lambda i: (i, 0)),
        )
        kernel = functools.partial(_ffn_fused_kernel, precision=precision)
        dim_sem = ("parallel",)
    else:
        # --- hidden-tiled path: reduction axis last; scratch only if out != f32 ---
        scratch = [] if out_is_f32 else [pltpu.VMEM((tile_m, dim_out), jnp.float32)]
        grid_spec = pltpu.PrefetchScalarGridSpec(
            num_scalar_prefetch=0,
            grid=(m_steps, h_steps),
            in_specs=[
                pl.BlockSpec((tile_m, dim), lambda i, k: (i, 0)),      # x tile
                pl.BlockSpec((dim, tile_h), lambda i, k: (0, k)),      # W1 chunk
                pl.BlockSpec((1, tile_h), lambda i, k: (0, k)),        # b1 chunk
                pl.BlockSpec((tile_h, dim_out), lambda i, k: (k, 0)),  # W2 chunk
                pl.BlockSpec((1, dim_out), lambda i, k: (0, 0)),       # b2
            ],
            out_specs=pl.BlockSpec((tile_m, dim_out), lambda i, k: (i, 0)),
            scratch_shapes=scratch,
        )
        kernel = functools.partial(_ffn_tiled_kernel, precision=precision)
        dim_sem = ("parallel", "arbitrary")

    out = pl.pallas_call(
        kernel,
        out_shape=jax.ShapeDtypeStruct((M, dim_out), out_dtype),
        grid_spec=grid_spec,
        compiler_params=pltpu.CompilerParams(
            dimension_semantics=dim_sem,
            vmem_limit_bytes=int(budget)),
        cost_estimate=cost,
    )(x2d, w1, b1_2d, w2, b2_2d)

    return out.reshape(*orig_shape[:-1], dim_out)


# ---------------------------------------------------------------------------
# Init + reference
# ---------------------------------------------------------------------------
def init_feed_forward_params(key, dim, dim_out=None, mult=4, dtype=jnp.float32):
    """Deterministic init mirroring nn.Linear's default uniform init."""
    inner_dim = int(dim * mult)
    dim_out = dim if dim_out is None else dim_out
    k1, k2, k3, k4 = jax.random.split(key, 4)

    lim1 = 1.0 / math.sqrt(dim)
    w1 = jax.random.uniform(k1, (dim, inner_dim), dtype, -lim1, lim1)
    b1 = jax.random.uniform(k2, (inner_dim,), dtype, -lim1, lim1)

    lim2 = 1.0 / math.sqrt(inner_dim)
    w2 = jax.random.uniform(k3, (inner_dim, dim_out), dtype, -lim2, lim2)
    b2 = jax.random.uniform(k4, (dim_out,), dtype, -lim2, lim2)
    return w1, b1, w2, b2


def feed_forward_ref(x, w1, b1, w2, b2):
    """Pure-JAX reference (f32) for correctness checking."""
    h = x @ w1 + b1
    h = jax.nn.gelu(h, approximate=False)
    return h @ w2 + b2


if __name__ == "__main__":
    key = jax.random.PRNGKey(0)
    kx, kp = jax.random.split(key)

    # Small, lane-aligned shapes: tokens [batch, seq, dim], inner_dim = 512.
    batch, seq, dim, mult = 2, 8, 128, 4
    x = jax.random.normal(kx, (batch, seq, dim), jnp.float32)
    w1, b1, w2, b2 = init_feed_forward_params(kp, dim, mult=mult)

    ref = feed_forward_ref(x, w1, b1, w2, b2)

    # 1) f32 weights -> precision=HIGHEST, weight-resident fused path.
    out_f32 = jax.block_until_ready(feed_forward_pallas(x, w1, b1, w2, b2))
    assert out_f32.shape == (batch, seq, dim)
    assert jnp.allclose(out_f32, ref, atol=1e-5, rtol=1e-5), \
        "f32 fused path mismatch vs reference"

    # 2) f32 weights, forced hidden tiling -> exercises k-accumulation with the
    #    f32 output block itself as the accumulator (no scratch).
    out_tiled = jax.block_until_ready(
        feed_forward_pallas(x, w1, b1, w2, b2, tile_h=256))
    assert jnp.allclose(out_tiled, ref, atol=1e-5, rtol=1e-5), \
        "f32 tiled path mismatch vs reference"

    # 3) bf16-stored weights (MXU fast path, f32 accumulation), f32 activations.
    w1b, w2b = w1.astype(jnp.bfloat16), w2.astype(jnp.bfloat16)
    out_bf16 = jax.block_until_ready(feed_forward_pallas(x, w1b, b1, w2b, b2))
    tol = 5e-2 * float(jnp.max(jnp.abs(ref))) + 1e-3
    err = float(jnp.max(jnp.abs(out_bf16 - ref)))
    assert err < tol, f"bf16-weight path mismatch: max abs err {err} > {tol}"

    # 4) bf16 activations + bf16 weights, forced hidden tiling -> exercises the
    #    f32 VMEM scratch accumulator path (non-f32 output dtype).
    xb = x.astype(jnp.bfloat16)
    refb = feed_forward_ref(xb.astype(jnp.float32), w1, b1, w2, b2)
    out_bt = jax.block_until_ready(
        feed_forward_pallas(xb, w1b, b1, w2b, b2, tile_h=256))
    err = float(jnp.max(jnp.abs(out_bt.astype(jnp.float32) - refb)))
    assert err < tol, f"bf16 tiled path mismatch: max abs err {err} > {tol}"

    print("KERNEL_OK")
</pallas_src>

<mosaic_0001>
module attributes {stable_mosaic.version = 11 : i64} {
  func.func @_ffn_fused_kernel(%arg0: i32, %arg1: memref<16x128xf32, #tpu.memory_space<vmem>>, %arg2: memref<128x512xf32, #tpu.memory_space<vmem>>, %arg3: memref<1x512xf32, #tpu.memory_space<vmem>>, %arg4: memref<512x128xf32, #tpu.memory_space<vmem>>, %arg5: memref<1x128xf32, #tpu.memory_space<vmem>>, %arg6: memref<16x128xf32, #tpu.memory_space<vmem>>) attributes {dimension_semantics = [#tpu.dimension_semantics<parallel>], iteration_bounds = array<i64: 1>, scalar_prefetch = 0 : i64, scratch_operands = 0 : i64, tpu.core_type = #tpu.core_type<tc>, window_params = [{transform_indices = @transform_0, window_bounds = array<i64: 16, 128>}, {pipeline_mode = #tpu.pipeline_mode<synchronous>, transform_indices = @transform_1, window_bounds = array<i64: 128, 512>}, {pipeline_mode = #tpu.pipeline_mode<synchronous>, transform_indices = @transform_2, window_bounds = array<i64: 1, 512>}, {pipeline_mode = #tpu.pipeline_mode<synchronous>, transform_indices = @transform_3, window_bounds = array<i64: 512, 128>}, {pipeline_mode = #tpu.pipeline_mode<synchronous>, transform_indices = @transform_4, window_bounds = array<i64: 1, 128>}, {transform_indices = @transform_5, window_bounds = array<i64: 16, 128>}]} {
    %c0 = arith.constant 0 : index
    %c0_0 = arith.constant 0 : index
    %0 = vector.load %arg1[%c0, %c0_0] : memref<16x128xf32, #tpu.memory_space<vmem>>, vector<16x128xf32>
    %c0_1 = arith.constant 0 : index
    %c0_2 = arith.constant 0 : index
    %1 = vector.load %arg2[%c0_1, %c0_2] : memref<128x512xf32, #tpu.memory_space<vmem>>, vector<128x512xf32>
    %cst = arith.constant dense<0.000000e+00> : vector<16x512xf32>
    %2 = tpu.matmul %0, %1, %cst {dimension_numbers = #tpu.dot_dimension_numbers<[1], [0], [0], [1], [0, 0, 1, 1], [], []>, precision = #tpu.contract_precision<fp32>} : vector<16x128xf32>, vector<128x512xf32>, vector<16x512xf32> -> vector<16x512xf32>
    %c0_3 = arith.constant 0 : index
    %c0_4 = arith.constant 0 : index
    %3 = vector.load %arg3[%c0_3, %c0_4] : memref<1x512xf32, #tpu.memory_space<vmem>>, vector<1x512xf32>
    %4 = vector.broadcast %3 : vector<1x512xf32> to vector<16x512xf32>
    %5 = arith.addf %2, %4 : vector<16x512xf32>
    %cst_5 = arith.constant 5.000000e-01 : f32
    %6 = vector.broadcast %cst_5 : f32 to vector<16x512xf32>
    %7 = arith.mulf %6, %5 : vector<16x512xf32>
    %cst_6 = arith.constant 0.707106769 : f32
    %8 = vector.broadcast %cst_6 : f32 to vector<16x512xf32>
    %9 = arith.mulf %5, %8 : vector<16x512xf32>
    %10 = math.erf %9 : vector<16x512xf32>
    %cst_7 = arith.constant 1.000000e+00 : f32
    %11 = vector.broadcast %cst_7 : f32 to vector<16x512xf32>
    %12 = arith.addf %11, %10 : vector<16x512xf32>
    %13 = arith.mulf %7, %12 : vector<16x512xf32>
    %c0_8 = arith.constant 0 : index
    %c0_9 = arith.constant 0 : index
    %14 = vector.load %arg4[%c0_8, %c0_9] : memref<512x128xf32, #tpu.memory_space<vmem>>, vector<512x128xf32>
    %cst_10 = arith.constant dense<0.000000e+00> : vector<16x128xf32>
    %15 = tpu.matmul %13, %14, %cst_10 {dimension_numbers = #tpu.dot_dimension_numbers<[1], [0], [0], [1], [0, 0, 1, 1], [], []>, precision = #tpu.contract_precision<fp32>} : vector<16x512xf32>, vector<512x128xf32>, vector<16x128xf32> -> vector<16x128xf32>
    %c0_11 = arith.constant 0 : index
    %c0_12 = arith.constant 0 : index
    %16 = vector.load %arg5[%c0_11, %c0_12] : memref<1x128xf32, #tpu.memory_space<vmem>>, vector<1x128xf32>
    %17 = vector.broadcast %16 : vector<1x128xf32> to vector<16x128xf32>
    %18 = arith.addf %15, %17 : vector<16x128xf32>
    %c0_13 = arith.constant 0 : index
    %c0_14 = arith.constant 0 : index
    %19 = vector.load %arg6[%c0_13, %c0_14] : memref<16x128xf32, #tpu.memory_space<vmem>>, vector<16x128xf32>
    tpu.vector_store %arg6[%c0_13, %c0_14], %18 {strides = array<i32>} : memref<16x128xf32, #tpu.memory_space<vmem>>, vector<16x128xf32>,
    return
  }
  func.func @transform_0(%arg0: i32) -> (i32, i32) {
    %c0_i32 = arith.constant 0 : i32
    %c0_i32_0 = arith.constant 0 : i32
    return %arg0, %c0_i32 : i32, i32
  }
  func.func @transform_1(%arg0: i32) -> (i32, i32) {
    %c0_i32 = arith.constant 0 : i32
    %c0_i32_0 = arith.constant 0 : i32
    %c0_i32_1 = arith.constant 0 : i32
    return %c0_i32, %c0_i32_0 : i32, i32
  }
  func.func @transform_2(%arg0: i32) -> (i32, i32) {
    %c0_i32 = arith.constant 0 : i32
    %c0_i32_0 = arith.constant 0 : i32
    %c0_i32_1 = arith.constant 0 : i32
    return %c0_i32, %c0_i32_0 : i32, i32
  }
  func.func @transform_3(%arg0: i32) -> (i32, i32) {
    %c0_i32 = arith.constant 0 : i32
    %c0_i32_0 = arith.constant 0 : i32
    %c0_i32_1 = arith.constant 0 : i32
    return %c0_i32, %c0_i32_0 : i32, i32
  }
  func.func @transform_4(%arg0: i32) -> (i32, i32) {
    %c0_i32 = arith.constant 0 : i32
    %c0_i32_0 = arith.constant 0 : i32
    %c0_i32_1 = arith.constant 0 : i32
    return %c0_i32, %c0_i32_0 : i32, i32
  }
  func.func @transform_5(%arg0: i32) -> (i32, i32) {
    %c0_i32 = arith.constant 0 : i32
    %c0_i32_0 = arith.constant 0 : i32
    return %arg0, %c0_i32 : i32, i32
  }
}

</mosaic_0001>

<bundles_post_ra>
// kernel: tpu_custom_call.1
= control target key start
LH: loop header
LB: loop body
LE: loop exit
PB: predicated region body
PF: predicated region fallthrough
CT: control target
= control target key end

     0   :  { %10 = vsyncpa [#allocation3], 0  ;;  %s7753_s0 = inlined_call_operand.hbm [shape: f32[16,128], index: 0, kind: input, shape index: {}]   ;;  %s7754_s1 = inlined_call_operand.hbm [shape: f32[128,512], index: 1, kind: input, shape index: {}]   ;;  %s7755_s2 = inlined_call_operand.vmem [shape: f32[1,512], index: 2, kind: input, shape index: {}]   ;;  %s7756_s3 = inlined_call_operand.hbm [shape: f32[512,128], index: 3, kind: input, shape index: {}]   ;;  %s7757_s4 = inlined_call_operand.vmem [shape: f32[1,128], index: 4, kind: input, shape index: {}]   ;;  %s7758_s5 = inlined_call_operand.hbm [shape: f32[16,128], index: 5, kind: output, shape index: {}]  }
   0x1   :  { %11 = vsyncpa [#allocation6], 0 }
   0x2   :  { %12 = vsyncpa [#allocation4], 0  ;;  %s5317_s18 = smov [#allocation5]   ;;  %s5223_s22 = scalar_lea.hbm %s7754_s1, 8192 }
   0x3   :  { %s30_s19 = sshll.u32 %s5317_s18, 4  ;;  %p5224_p0 = scmp.ne.s32.totalorder %s7754_s1, %s5223_s22  ;;  %s31_s19 = int_to_ptr.vmem [resolvable:$true] %s30_s19 }
   0x4   :  { %p5227_p1 = scmp.lt.u32.totalorder %s5223_s22, %s7754_s1 }
   0x6   :  { %p5229_p2 = pnand %p5227_p1, %p5224_p0 }
   0x8   :  { %5232 = shalt.err (!%p5229_p2)
}
   0x9   :  { %s5233_s27 = scalar_lea.vmem %s31_s19, 8192  ;;  %p5238_p4 = scmp.lt.s32.totalorder %s31_s19, %s31_s19 }
   0xa   :  { %p5234_p3 = scmp.ne.s32.totalorder %s31_s19, %s5233_s27  ;;  %p5239_p5 = scmp.lt.s32.totalorder %s5233_s27, %s5233_s27 }
   0xc   :  { %p5240_p6 = por %p5239_p5, %p5238_p4 }
   0xe   :  { %p5241_p7 = pnand %p5240_p6, %p5234_p3 }
  0x10   :  { %5244 = shalt.err (!%p5241_p7)
}
  0x11   :  { %s5318_s28 = smov 512   ;;  %s5319_s29 = smov 32  }
  0x12   :  { %36 = dma.hbm_to_vmem [thread:$0]  %s7754_s1, 8192, %s31_s19, [#allocation6], %s5318_s28, %s5318_s28, %s5319_s29  }
  0x13   :  { %s5320_s7 = smov [#allocation2]   ;;  %s5245_s11 = scalar_lea.hbm %s7753_s0, 256 }
  0x14   :  { %s18_s8 = sshll.u32 %s5320_s7, 4  ;;  %p5246_p8 = scmp.ne.s32.totalorder %s7753_s0, %s5245_s11  ;;  %s19_s8 = int_to_ptr.vmem [resolvable:$true] %s18_s8 }
  0x15   :  { %p5249_p9 = scmp.lt.u32.totalorder %s5245_s11, %s7753_s0 }
  0x17   :  { %p5251_p10 = pnand %p5249_p9, %p5246_p8 }
  0x19   :  { %5254 = shalt.err (!%p5251_p10)
}
  0x1a   :  { %s5255_s16 = scalar_lea.vmem %s19_s8, 256  ;;  %p5260_p12 = scmp.lt.s32.totalorder %s19_s8, %s19_s8 }
  0x1b   :  { %p5256_p11 = scmp.ne.s32.totalorder %s19_s8, %s5255_s16  ;;  %p5261_p13 = scmp.lt.s32.totalorder %s5255_s16, %s5255_s16 }
  0x1d   :  { %p5262_p0 = por %p5261_p13, %p5260_p12 }
  0x1f   :  { %p5263_p1 = pnand %p5262_p0, %p5256_p11 }
  0x21   :  { %5266 = shalt.err (!%p5263_p1)
}
  0x22   :  { %s5321_s1 = smov 128   ;;  %s5322_s17 = smov 8  }
  0x23   :  { %24 = dma.hbm_to_vmem [thread:$0]  %s7753_s0, 256, %s19_s8, [#allocation3], %s5321_s1, %s5321_s1, %s5322_s17  }
  0x24   :  { %s5323_s20 = smov [#allocation7]   ;;  %s5267_s24 = scalar_lea.hbm %s7756_s3, 8192 }
  0x25   :  { %s44_s21 = sshll.u32 %s5323_s20, 4  ;;  %p5268_p2 = scmp.ne.s32.totalorder %s7756_s3, %s5267_s24  ;;  %s45_s21 = int_to_ptr.vmem [resolvable:$true] %s44_s21 }
  0x26   :  { %p5271_p3 = scmp.lt.u32.totalorder %s5267_s24, %s7756_s3 }
  0x28   :  { %p5273_p4 = pnand %p5271_p3, %p5268_p2 }
  0x2a   :  { %5276 = shalt.err (!%p5273_p4)
}
  0x2b   :  { %s5277_s29 = scalar_lea.vmem %s45_s21, 8192  ;;  %p5282_p6 = scmp.lt.s32.totalorder %s45_s21, %s45_s21 }
  0x2c   :  { %p5278_p5 = scmp.ne.s32.totalorder %s45_s21, %s5277_s29  ;;  %p5283_p7 = scmp.lt.s32.totalorder %s5277_s29, %s5277_s29 }
  0x2e   :  { %p5284_p8 = por %p5283_p7, %p5282_p6 }
  0x30   :  { %p5285_p9 = pnand %p5284_p8, %p5278_p5 }
  0x32   :  { %5288 = shalt.err (!%p5285_p9)
}
  0x33   :  { %50 = dma.hbm_to_vmem [thread:$0]  %s7756_s3, 8192, %s45_s21, [#allocation6], %s5321_s1, %s5321_s1, %s5322_s17  }
  0x34   :  { %5311 = dma.done.wait [#allocation3], 256  }
  0x35   :  { %5312 = vsyncadd [#allocation3], 4294967040 }
  0x36   :  { %5313 = dma.done.wait [#allocation6], 16384  }
  0x37   :  { %5314 = vsyncadd [#allocation6], 4294950912  ;;  %v7759_v0 = vmov 0.0   ;;  %v65_v1 = vld [vmem:[#allocation5 + $0x8] sm:$0xff]  ;;  %v67_v3 = vld [vmem:[#allocation5 + $0x18] sm:$0xff] }
  0x38   :  { %246 = vmatprep.mubr.f32.mxu0 %v7759_v0  ;;  %1150 = vmatprep.mubr.f32.mxu1 %v7759_v0  ;;  %v69_v2 = vld [vmem:[#allocation5 + $0x28] sm:$0xff]  ;;  %v150_v4 = vand.u32 4294901760, %v65_v1  ;;  %v71_v6 = vld [vmem:[#allocation5 + $0x38] sm:$0xff]  ;;  %v1054_v7 = vand.u32 4294901760, %v67_v3  ;;  %v64_v8 = vld [vmem:[#allocation5] sm:$0xff] }
  0x39   :  { %v154_v5 = vand.u32 4294901760, %v69_v2  ;;  %v68_v9 = vld [vmem:[#allocation5 + $0x20] sm:$0xff]  ;;  %v1058_v10 = vand.u32 4294901760, %v71_v6  ;;  %v152_v11 = vand.u32 4294901760, %v64_v8  ;;  %v66_v13 = vld [vmem:[#allocation5 + $0x10] sm:$0xff]  ;;  %v73_v15 = vld [vmem:[#allocation5 + $0x48] sm:$0xff] }
  0x3a   :  { %v156_v12 = vand.u32 4294901760, %v68_v9  ;;  %v70_v14 = vld [vmem:[#allocation5 + $0x30] sm:$0xff]  ;;  %v5402_v17 = vsub.f32 %v65_v1, %v150_v4  ;;  %v5406_v19 = vsub.f32 %v67_v3, %v1054_v7  ;;  %v77_v20 = vld [vmem:[#allocation5 + $0x68] sm:$0xff]  ;;  %v75_v21 = vld [vmem:[#allocation5 + $0x58] sm:$0xff]  ;;  %v1056_v29 = vand.u32 4294901760, %v66_v13 }
  0x3b   :  { %v5400_v16 = vpack.c.bf16 %v154_v5, %v150_v4  ;;  %v5404_v18 = vsub.f32 %v69_v2, %v154_v5  ;;  %v79_v22 = vld [vmem:[#allocation5 + $0x78] sm:$0xff]  ;;  %v5408_v23 = vpack.c.bf16 %v1058_v10, %v1054_v7  ;;  %v5410_v24 = vsub.f32 %v71_v6, %v1058_v10  ;;  %v72_v27 = vld [vmem:[#allocation5 + $0x40] sm:$0xff]  ;;  %v74_v37 = vld [vmem:[#allocation5 + $0x50] sm:$0xff] }
  0x3c   :  { %8106 = vst [vmem:[#allocation13_spill] sm:$0xff] %v5402_v17  ;;  %8108 = vst [vmem:[#allocation15_spill] sm:$0xff] %v5406_v19  ;;  %v5412_v25 = vpack.c.bf16 %v156_v12, %v152_v11  ;;  %v5414_v26 = vsub.f32 %v64_v8, %v152_v11  ;;  %v5417_v28 = vsub.f32 %v68_v9, %v156_v12  ;;  %v1060_v30 = vand.u32 4294901760, %v70_v14  ;;  %v76_v32 = vld [vmem:[#allocation5 + $0x60] sm:$0xff]  ;;  %v78_v38 = vld [vmem:[#allocation5 + $0x70] sm:$0xff] }
  0x3d   :  { %8105 = vst [vmem:[#allocation12_spill] sm:$0xff] %v5400_v16  ;;  %8107 = vst [vmem:[#allocation14_spill] sm:$0xff] %v5404_v18  ;;  %4383 = vmatprep.subr.bf16.mxu0 %v5400_v16  ;;  %v158_v31 = vand.u32 4294901760, %v73_v15  ;;  %4575 = vmatprep.subr.bf16.mxu1 %v5408_v23  ;;  %v162_v33 = vand.u32 4294901760, %v77_v20  ;;  %v1062_v34 = vand.u32 4294901760, %v75_v21  ;;  %v1066_v35 = vand.u32 4294901760, %v79_v22 }
  0x3e   :  { %8109 = vst [vmem:[#allocation16_spill] sm:$0xff] %v5408_v23  ;;  %8110 = vst [vmem:[#allocation17_spill] sm:$0xff] %v5410_v24  ;;  %4385 = vmatpush1.bf16.msra.mxu0 %v5412_v25  ;;  %v160_v36 = vand.u32 4294901760, %v72_v27  ;;  %v5421_v39 = vpack.c.bf16 %v1060_v30, %v1056_v29  ;;  %v5423_v40 = vsub.f32 %v66_v13, %v1056_v29  ;;  %v81_v43 = vld [vmem:[#allocation5 + $0x88] sm:$0xff]  ;;  %v83_v45 = vld [vmem:[#allocation5 + $0x98] sm:$0xff]  ;;  %v164_v52 = vand.u32 4294901760, %v76_v32 }
  0x3f   :  { %8111 = vst [vmem:[#allocation18_spill] sm:$0xff] %v5412_v25  ;;  %8112 = vst [vmem:[#allocation19_spill] sm:$0xff] %v5414_v26  ;;  %v5425_v41 = vsub.f32 %v70_v14, %v1060_v30  ;;  %v5427_v42 = vsub.f32 %v73_v15, %v158_v31  ;;  %v85_v44 = vld [vmem:[#allocation5 + $0xa8] sm:$0xff]  ;;  %v5429_v46 = vpack.c.bf16 %v162_v33, %v158_v31  ;;  %v87_v50 = vld [vmem:[#allocation5 + $0xb8] sm:$0xff]  ;;  %v1064_v54 = vand.u32 4294901760, %v74_v37 }
  0x40   :  { %8113 = vst [vmem:[#allocation20_spill] sm:$0xff] %v5417_v28  ;;  %8114 = vst [vmem:[#allocation21_spill] sm:$0xff] %v5421_v39  ;;  %v5431_v47 = vsub.f32 %v77_v20, %v162_v33  ;;  %v5433_v48 = vpack.c.bf16 %v1066_v35, %v1062_v34  ;;  %v5435_v49 = vsub.f32 %v75_v21, %v1062_v34  ;;  %4577 = vmatpush1.bf16.msra.mxu1 %v5421_v39  ;;  %v80_v59 = vld [vmem:[#allocation5 + $0x80] sm:$0xff]  ;;  %v82_v2 = vld [vmem:[#allocation5 + $0x90] sm:$0xff] }
  0x41   :  { %8115 = vst [vmem:[#allocation22_spill] sm:$0xff] %v5423_v40  ;;  %8116 = vst [vmem:[#allocation23_spill] sm:$0xff] %v5425_v41  ;;  %v5438_v51 = vsub.f32 %v79_v22, %v1066_v35  ;;  %v5440_v53 = vsub.f32 %v72_v27, %v160_v36  ;;  %4387 = vmatprep.subr.bf16.mxu0 %v5429_v46  ;;  %v1068_v55 = vand.u32 4294901760, %v78_v38  ;;  %v166_v56 = vand.u32 4294901760, %v81_v43  ;;  %v84_v60 = vld [vmem:[#allocation5 + $0xa0] sm:$0xff]  ;;  %v86_v3 = vld [vmem:[#allocation5 + $0xb0] sm:$0xff] }
  0x42   :  { %8117 = vst [vmem:[#allocation24_spill] sm:$0xff] %v5429_v46  ;;  %8118 = vst [vmem:[#allocation25_spill] sm:$0xff] %v5433_v48  ;;  %4579 = vmatprep.subr.bf16.mxu1 %v5433_v48  ;;  %v170_v57 = vand.u32 4294901760, %v85_v44  ;;  %v1070_v58 = vand.u32 4294901760, %v83_v45  ;;  %v5444_v61 = vpack.c.bf16 %v164_v52, %v160_v36  ;;  %v5446_v62 = vsub.f32 %v76_v32, %v164_v52  ;;  %v89_v4 = vld [vmem:[#allocation5 + $0xc8] sm:$0xff]  ;;  %v91_v10 = vld [vmem:[#allocation5 + $0xd8] sm:$0xff] }
  0x43   :  { %v5448_v63 = vsub.f32 %v74_v37, %v1064_v54  ;;  %v1074_v1 = vand.u32 4294901760, %v87_v50  ;;  %v5450_v5 = vpack.c.bf16 %v1068_v55, %v1064_v54  ;;  %v5452_v6 = vsub.f32 %v78_v38, %v1068_v55  ;;  %v93_v9 = vld [vmem:[#allocation5 + $0xe8] sm:$0xff]  ;;  %v95_v11 = vld [vmem:[#allocation5 + $0xf8] sm:$0xff]  ;;  %v88_v33 = vld [vmem:[#allocation5 + $0xc0] sm:$0xff] }
  0x44   :  { %8119 = vst [vmem:[#allocation26_spill] sm:$0xff] %v5444_v61  ;;  %v5454_v7 = vpack.c.bf16 %v170_v57, %v166_v56  ;;  %v5456_v8 = vsub.f32 %v81_v43, %v166_v56  ;;  %4389 = vmatpush1.bf16.msra.mxu0 %v5444_v61  ;;  %v5459_v12 = vsub.f32 %v85_v44, %v170_v57  ;;  %v168_v20 = vand.u32 4294901760, %v80_v59  ;;  %v92_v38 = vld [vmem:[#allocation5 + $0xe0] sm:$0xff]  ;;  %v90_v43 = vld [vmem:[#allocation5 + $0xd0] sm:$0xff]  ;;  %v97_v55 = vld [vmem:[#allocation5 + $0x108] sm:$0xff] }
  0x45   :  { %8120 = vst [vmem:[#allocation27_spill] sm:$0xff] %v5450_v5  ;;  %v5461_v13 = vpack.c.bf16 %v1074_v1, %v1070_v58  ;;  %v5463_v14 = vsub.f32 %v83_v45, %v1070_v58  ;;  %v5465_v15 = vsub.f32 %v87_v50, %v1074_v1  ;;  %4581 = vmatpush1.bf16.msra.mxu1 %v5450_v5  ;;  %v172_v21 = vand.u32 4294901760, %v84_v60  ;;  %v94_v44 = vld [vmem:[#allocation5 + $0xf0] sm:$0xff]  ;;  %v101_v56 = vld [vmem:[#allocation5 + $0x128] sm:$0xff]  ;;  %v99_v57 = vld [vmem:[#allocation5 + $0x118] sm:$0xff] }
  0x46   :  { %8121 = vst [vmem:[#allocation28_spill] sm:$0xff] %v5454_v7  ;;  %4391 = vmatprep.subr.bf16.mxu0 %v5454_v7  ;;  %v1072_v22 = vand.u32 4294901760, %v82_v2  ;;  %v1076_v27 = vand.u32 4294901760, %v86_v3  ;;  %v174_v29 = vand.u32 4294901760, %v89_v4  ;;  %v178_v30 = vand.u32 4294901760, %v93_v9  ;;  %v100_v0 = vld [vmem:[#allocation5 + $0x120] sm:$0xff] }
  0x47   :  { %8122 = vst [vmem:[#allocation29_spill] sm:$0xff] %v5461_v13  ;;  %4583 = vmatprep.subr.bf16.mxu1 %v5461_v13  ;;  %v1078_v31 = vand.u32 4294901760, %v91_v10  ;;  %v1082_v32 = vand.u32 4294901760, %v95_v11  ;;  %v5470_v34 = vpack.c.bf16 %v172_v21, %v168_v20  ;;  %v5472_v35 = vsub.f32 %v80_v59, %v168_v20  ;;  %v109_v13 = vld [vmem:[#allocation5 + $0x168] sm:$0xff]  ;;  %v107_v48 = vld [vmem:[#allocation5 + $0x158] sm:$0xff]  ;;  %v106_v46 = vld [vmem:[#allocation5 + $0x150] sm:$0xff] }
  0x48   :  { %v5474_v36 = vsub.f32 %v84_v60, %v172_v21  ;;  %v5476_v37 = vpack.c.bf16 %v1076_v27, %v1072_v22  ;;  %v5478_v45 = vsub.f32 %v82_v2, %v1072_v22  ;;  %v5480_v50 = vsub.f32 %v86_v3, %v1076_v27  ;;  %v103_v21 = vld [vmem:[#allocation5 + $0x138] sm:$0xff]  ;;  %v110_v16 = vld [vmem:[#allocation5 + $0x170] sm:$0xff] }
  0x49   :  { %8123 = vst [vmem:[#allocation30_spill] sm:$0xff] %v5470_v34  ;;  %v5482_v52 = vpack.c.bf16 %v178_v30, %v174_v29  ;;  %v5484_v54 = vsub.f32 %v89_v4, %v174_v29  ;;  %4393 = vmatpush1.bf16.msra.mxu0 %v5470_v34  ;;  %v5488_v58 = vsub.f32 %v93_v9, %v178_v30  ;;  %v176_v1 = vand.u32 4294901760, %v88_v33  ;;  %v96_v30 = vld [vmem:[#allocation5 + $0x100] sm:$0xff]  ;;  %v105_v34 = vld [vmem:[#allocation5 + $0x148] sm:$0xff] }
  0x4a   :  { %8124 = vst [vmem:[#allocation31_spill] sm:$0xff] %v5476_v37  ;;  %4585 = vmatpush1.bf16.msra.mxu1 %v5476_v37  ;;  %v5490_v59 = vpack.c.bf16 %v1082_v32, %v1078_v31  ;;  %v5492_v60 = vsub.f32 %v91_v10, %v1078_v31  ;;  %v5495_v2 = vsub.f32 %v95_v11, %v1082_v32  ;;  %v180_v3 = vand.u32 4294901760, %v92_v38  ;;  %v98_v10 = vld [vmem:[#allocation5 + $0x110] sm:$0xff] }
  0x4b   :  { %8125 = vst [vmem:[#allocation32_spill] sm:$0xff] %v5482_v52  ;;  %4395 = vmatprep.subr.bf16.mxu0 %v5482_v52  ;;  %v1080_v4 = vand.u32 4294901760, %v90_v43  ;;  %v1084_v20 = vand.u32 4294901760, %v94_v44  ;;  %v5498_v22 = vsub.f32 %v88_v33, %v176_v1  ;;  %v182_v27 = vand.u32 4294901760, %v97_v55  ;;  %v102_v52 = vld [vmem:[#allocation5 + $0x130] sm:$0xff] }
  0x4c   :  { %8126 = vst [vmem:[#allocation33_spill] sm:$0xff] %v5490_v59  ;;  %4587 = vmatprep.subr.bf16.mxu1 %v5490_v59  ;;  %v186_v9 = vand.u32 4294901760, %v101_v56  ;;  %v1086_v29 = vand.u32 4294901760, %v99_v57  ;;  %v5500_v31 = vpack.c.bf16 %v180_v3, %v176_v1  ;;  %v5502_v37 = vsub.f32 %v92_v38, %v180_v3 }
  0x4d   :  { %v5504_v11 = vpack.c.bf16 %v1084_v20, %v1080_v4  ;;  %v5506_v32 = vsub.f32 %v90_v43, %v1080_v4  ;;  %v5508_v59 = vsub.f32 %v94_v44, %v1084_v20  ;;  %v5512_v7 = vsub.f32 %v97_v55, %v182_v27  ;;  %v111_v55 = vld [vmem:[#allocation5 + $0x178] sm:$0xff] }
  0x4e   :  { %8127 = vst [vmem:[#allocation34_spill] sm:$0xff] %v5500_v31  ;;  %8128 = vst [vmem:[#allocation35_spill] sm:$0xff] %v5502_v37  ;;  %v5510_v33 = vpack.c.bf16 %v186_v9, %v182_v27  ;;  %v5514_v5 = vsub.f32 %v101_v56, %v186_v9  ;;  %4397 = vmatpush1.bf16.msra.mxu0 %v5500_v31  ;;  %v1090_v38 = vand.u32 4294901760, %v103_v21  ;;  %v184_v43 = vand.u32 4294901760, %v96_v30  ;;  %v108_v31 = vld [vmem:[#allocation5 + $0x160] sm:$0xff] }
  0x4f   :  { %8129 = vst [vmem:[#allocation36_spill] sm:$0xff] %v5504_v11  ;;  %8130 = vst [vmem:[#allocation37_spill] sm:$0xff] %v5506_v32  ;;  %4589 = vmatpush1.bf16.msra.mxu1 %v5504_v11  ;;  %v5518_v1 = vsub.f32 %v99_v57, %v1086_v29  ;;  %v188_v3 = vand.u32 4294901760, %v100_v0  ;;  %v1088_v4 = vand.u32 4294901760, %v98_v10  ;;  %v1092_v44 = vand.u32 4294901760, %v102_v52  ;;  %v104_v57 = vld [vmem:[#allocation5 + $0x140] sm:$0xff] }
  0x50   :  { %8131 = vst [vmem:[#allocation38_spill] sm:$0xff] %v5508_v59  ;;  %8132 = vst [vmem:[#allocation39_spill] sm:$0xff] %v5510_v33  ;;  %4399 = vmatprep.subr.bf16.mxu0 %v5510_v33  ;;  %v190_v20 = vand.u32 4294901760, %v105_v34  ;;  %v194_v61 = vand.u32 4294901760, %v109_v13  ;;  %v5521_v27 = vpack.c.bf16 %v1090_v38, %v1086_v29  ;;  %v5523_v56 = vsub.f32 %v103_v21, %v1090_v38  ;;  %v113_v29 = vld [vmem:[#allocation5 + $0x188] sm:$0xff] }
  0x51   :  { %8133 = vst [vmem:[#allocation40_spill] sm:$0xff] %v5512_v7  ;;  %8134 = vst [vmem:[#allocation41_spill] sm:$0xff] %v5514_v5  ;;  %v5525_v9 = vpack.c.bf16 %v188_v3, %v184_v43  ;;  %v5527_v11 = vsub.f32 %v96_v30, %v184_v43  ;;  %v5529_v39 = vsub.f32 %v100_v0, %v188_v3  ;;  %v1094_v0 = vand.u32 4294901760, %v107_v48 }
  0x52   :  { %8135 = vst [vmem:[#allocation42_spill] sm:$0xff] %v5518_v1  ;;  %8136 = vst [vmem:[#allocation43_spill] sm:$0xff] %v5521_v27  ;;  %v5531_v33 = vpack.c.bf16 %v1092_v44, %v1088_v4  ;;  %v5533_v25 = vsub.f32 %v98_v10, %v1088_v4  ;;  %v5535_v23 = vsub.f32 %v102_v52, %v1092_v44  ;;  %v117_v1 = vld [vmem:[#allocation5 + $0x1a8] sm:$0xff]  ;;  %4591 = vmatprep.subr.bf16.mxu1 %v5521_v27 }
  0x53   :  { %8137 = vst [vmem:[#allocation44_spill] sm:$0xff] %v5523_v56  ;;  %8138 = vst [vmem:[#allocation45_spill] sm:$0xff] %v5525_v9  ;;  %4401 = vmatpush1.bf16.msra.mxu0 %v5525_v9  ;;  %v5539_v21 = vpack.c.bf16 %v194_v61, %v190_v20  ;;  %v5541_v30 = vsub.f32 %v105_v34, %v190_v20  ;;  %v5543_v38 = vsub.f32 %v109_v13, %v194_v61  ;;  %v125_v56 = vld [vmem:[#allocation5 + $0x1e8] sm:$0xff] }
  0x54   :  { %8139 = vst [vmem:[#allocation46_spill] sm:$0xff] %v5527_v11  ;;  %8140 = vst [vmem:[#allocation47_spill] sm:$0xff] %v5529_v39  ;;  %4593 = vmatpush1.bf16.msra.mxu1 %v5531_v33  ;;  %v1098_v10 = vand.u32 4294901760, %v111_v55  ;;  %v192_v43 = vand.u32 4294901760, %v104_v57  ;;  %v196_v52 = vand.u32 4294901760, %v108_v31  ;;  %v1096_v3 = vand.u32 4294901760, %v106_v46 }
  0x55   :  { %8141 = vst [vmem:[#allocation48_spill] sm:$0xff] %v5531_v33  ;;  %8142 = vst [vmem:[#allocation49_spill] sm:$0xff] %v5533_v25  ;;  %4403 = vmatprep.subr.bf16.mxu0 %v5539_v21  ;;  %v5547_v4 = vsub.f32 %v107_v48, %v1094_v0  ;;  %v1100_v44 = vand.u32 4294901760, %v110_v16  ;;  %v198_v27 = vand.u32 4294901760, %v113_v29  ;;  %v202_v9 = vand.u32 4294901760, %v117_v1  ;;  %v119_v25 = vld [vmem:[#allocation5 + $0x1b8] sm:$0xff] }
  0x56   :  { %8143 = vst [vmem:[#allocation50_spill] sm:$0xff] %v5535_v23  ;;  %8144 = vst [vmem:[#allocation51_spill] sm:$0xff] %v5539_v21  ;;  %v115_v23 = vld [vmem:[#allocation5 + $0x198] sm:$0xff]  ;;  %v5549_v34 = vpack.c.bf16 %v1098_v10, %v1094_v0  ;;  %v5551_v61 = vsub.f32 %v111_v55, %v1098_v10  ;;  %v5553_v13 = vpack.c.bf16 %v196_v52, %v192_v43  ;;  %v112_v33 = vld [vmem:[#allocation5 + $0x180] sm:$0xff] }
  0x57   :  { %8145 = vst [vmem:[#allocation52_spill] sm:$0xff] %v5541_v30  ;;  %8146 = vst [vmem:[#allocation53_spill] sm:$0xff] %v5543_v38  ;;  %v5555_v20 = vsub.f32 %v104_v57, %v192_v43  ;;  %v116_v38 = vld [vmem:[#allocation5 + $0x1a0] sm:$0xff]  ;;  %v114_v30 = vld [vmem:[#allocation5 + $0x190] sm:$0xff]  ;;  %v5557_v39 = vsub.f32 %v108_v31, %v196_v52  ;;  %v5559_v48 = vpack.c.bf16 %v1100_v44, %v1096_v3  ;;  %v1102_v31 = vand.u32 4294901760, %v115_v23 }
  0x58   :  { %8147 = vst [vmem:[#allocation54_spill] sm:$0xff] %v5547_v4  ;;  %8148 = vst [vmem:[#allocation55_spill] sm:$0xff] %v5549_v34  ;;  %v5561_v21 = vsub.f32 %v106_v46, %v1096_v3  ;;  %v5563_v4 = vsub.f32 %v110_v16, %v1100_v44  ;;  %v118_v11 = vld [vmem:[#allocation5 + $0x1b0] sm:$0xff]  ;;  %v121_v0 = vld [vmem:[#allocation5 + $0x1c8] sm:$0xff]  ;;  %4595 = vmatprep.subr.bf16.mxu1 %v5549_v34  ;;  %4405 = vmatpush1.bf16.msra.mxu0 %v5553_v13  ;;  %v1106_v46 = vand.u32 4294901760, %v119_v25 }
  0x59   :  { %8149 = vst [vmem:[#allocation56_spill] sm:$0xff] %v5551_v61  ;;  %8150 = vst [vmem:[#allocation57_spill] sm:$0xff] %v5553_v13  ;;  %v5567_v55 = vpack.c.bf16 %v202_v9, %v198_v27  ;;  %v5569_v57 = vsub.f32 %v113_v29, %v198_v27  ;;  %v5571_v10 = vsub.f32 %v117_v1, %v202_v9  ;;  %4597 = vmatpush1.bf16.msra.mxu1 %v5559_v48 }
  0x5a   :  { %8151 = vst [vmem:[#allocation58_spill] sm:$0xff] %v5555_v20  ;;  %8152 = vst [vmem:[#allocation59_spill] sm:$0xff] %v5557_v39  ;;  %v200_v43 = vand.u32 4294901760, %v112_v33  ;;  %v204_v16 = vand.u32 4294901760, %v116_v38  ;;  %v1104_v52 = vand.u32 4294901760, %v114_v30  ;;  %v5575_v3 = vsub.f32 %v115_v23, %v1102_v31  ;;  %v126_v20 = vld [vmem:[#allocation5 + $0x1f0] sm:$0xff] }
  0x5b   :  { %8153 = vst [vmem:[#allocation60_spill] sm:$0xff] %v5559_v48  ;;  %8154 = vst [vmem:[#allocation61_spill] sm:$0xff] %v5561_v21  ;;  %4407 = vmatprep.subr.bf16.mxu0 %v5567_v55  ;;  %v1108_v44 = vand.u32 4294901760, %v118_v11  ;;  %v206_v34 = vand.u32 4294901760, %v121_v0  ;;  %v210_v13 = vand.u32 4294901760, %v125_v56  ;;  %v127_v21 = vld [vmem:[#allocation5 + $0x1f8] sm:$0xff]  ;;  %v5577_v27 = vpack.c.bf16 %v1106_v46, %v1102_v31 }
  0x5c   :  { %8155 = vst [vmem:[#allocation62_spill] sm:$0xff] %v5563_v4  ;;  %8156 = vst [vmem:[#allocation63_spill] sm:$0xff] %v5567_v55  ;;  %v123_v4 = vld [vmem:[#allocation5 + $0x1d8] sm:$0xff]  ;;  %v5579_v1 = vsub.f32 %v119_v25, %v1106_v46  ;;  %v5581_v9 = vpack.c.bf16 %v204_v16, %v200_v43  ;;  %v5583_v29 = vsub.f32 %v112_v33, %v200_v43  ;;  %v120_v48 = vld [vmem:[#allocation5 + $0x1c0] sm:$0xff] }
  0x5d   :  { %8157 = vst [vmem:[#allocation64_spill] sm:$0xff] %v5569_v57  ;;  %8158 = vst [vmem:[#allocation65_spill] sm:$0xff] %v5571_v10  ;;  %v124_v10 = vld [vmem:[#allocation5 + $0x1e0] sm:$0xff]  ;;  %v122_v57 = vld [vmem:[#allocation5 + $0x1d0] sm:$0xff]  ;;  %v5585_v39 = vsub.f32 %v116_v38, %v204_v16  ;;  %v5587_v23 = vpack.c.bf16 %v1108_v44, %v1104_v52  ;;  %v5589_v55 = vsub.f32 %v114_v30, %v1104_v52  ;;  %4599 = vmatprep.subr.bf16.mxu1 %v5577_v27 }
  0x5e   :  { %8159 = vst [vmem:[#allocation66_spill] sm:$0xff] %v5575_v3  ;;  %8160 = vst [vmem:[#allocation67_spill] sm:$0xff] %v5577_v27  ;;  %v5591_v3 = vsub.f32 %v118_v11, %v1108_v44  ;;  %4409 = vmatpush1.bf16.msra.mxu0 %v5581_v9  ;;  %v5595_v25 = vpack.c.bf16 %v210_v13, %v206_v34  ;;  %v5597_v33 = vsub.f32 %v121_v0, %v206_v34 }
  0x5f   :  { %8161 = vst [vmem:[#allocation68_spill] sm:$0xff] %v5581_v9  ;;  %8162 = vst [vmem:[#allocation69_spill] sm:$0xff] %v5587_v23  ;;  %v5599_v31 = vsub.f32 %v125_v56, %v210_v13  ;;  %v1110_v46 = vand.u32 4294901760, %v123_v4  ;;  %4601 = vmatpush1.bf16.msra.mxu1 %v5587_v23  ;;  %v1114_v38 = vand.u32 4294901760, %v127_v21  ;;  %v208_v43 = vand.u32 4294901760, %v120_v48  ;;  %v62_v23 = vld [vmem:[#allocation2] sm:$0xff] }
  0x60   :  { %8163 = vst [vmem:[#allocation70_spill] sm:$0xff] %v5595_v25  ;;  %8164 = vst [vmem:[#allocation71_spill] sm:$0xff] %v5597_v33  ;;  %v212_v30 = vand.u32 4294901760, %v124_v10  ;;  %v1112_v16 = vand.u32 4294901760, %v122_v57  ;;  %4411 = vmatprep.subr.bf16.mxu0 %v5595_v25  ;;  %v1116_v52 = vand.u32 4294901760, %v126_v20  ;;  %v7837_v44 = vand.u32 4294901760, %v5402_v17 }
  0x61   :  { %8165 = vst [vmem:[#allocation72_spill] sm:$0xff] %v5599_v31  ;;  %v5603_v11 = vsub.f32 %v123_v4, %v1110_v46  ;;  %v7836_v9 = vand.u32 4294901760, %v5404_v18  ;;  %v5607_v34 = vpack.c.bf16 %v1114_v38, %v1110_v46  ;;  %v5609_v56 = vsub.f32 %v127_v21, %v1114_v38 }
  0x62   :  { %v5611_v13 = vpack.c.bf16 %v212_v30, %v208_v43  ;;  %v5613_v0 = vsub.f32 %v120_v48, %v208_v43  ;;  %v5615_v27 = vsub.f32 %v124_v10, %v212_v30  ;;  %v5617_v31 = vpack.c.bf16 %v1116_v52, %v1112_v16 }
  0x63   :  { %8166 = vst [vmem:[#allocation73_spill] sm:$0xff] %v5607_v34  ;;  %v5619_v4 = vsub.f32 %v122_v57, %v1112_v16  ;;  %v5621_v25 = vsub.f32 %v126_v20, %v1116_v52  ;;  %4603 = vmatprep.subr.bf16.mxu1 %v5607_v34  ;;  %v272_v21 = vsub.f32 %v5402_v17, %v7837_v44  ;;  %v7840_v10 = vand.u32 4294901760, %v5406_v19 }
  0x64   :  { %8167 = vst [vmem:[#allocation74_spill] sm:$0xff] %v5611_v13  ;;  %8168 = vst [vmem:[#allocation75_spill] sm:$0xff] %v5615_v27  ;;  %4413 = vmatpush1.bf16.msra.mxu0 %v5611_v13  ;;  %v284_v48 = vsub.f32 %v5404_v18, %v7836_v9  ;;  %v7845_v46 = vand.u32 4294901760, %v5410_v24  ;;  %4605 = vmatpush1.bf16.msra.mxu1 %v5617_v31  ;;  %v5634_v20 = vand.u32 4294901760, %v62_v23  ;;  %v7852_v57 = vand.u32 4294901760, %v5414_v26 }
  0x65   :  { %8169 = vst [vmem:[#allocation76_spill] sm:$0xff] %v5617_v31  ;;  %8170 = vst [vmem:[#allocation77_spill] sm:$0xff] %v5619_v4  ;;  %v7853_v38 = vand.u32 4294901760, %v5417_v28  ;;  %v7857_v43 = vand.u32 4294901760, %v5423_v40  ;;  %v273_v30 = vand.u32 4294901760, %v272_v21  ;;  %v1176_v52 = vsub.f32 %v5406_v19, %v7840_v10 }
  0x66   :  { %8171 = vst [vmem:[#allocation78_spill] sm:$0xff] %v5621_v25  ;;  %8172 = vst [vmem:[#allocation79_spill] sm:$0xff] %v5634_v20  ;;  %v285_v16 = vand.u32 4294901760, %v284_v48  ;;  %v1188_v9 = vsub.f32 %v5410_v24, %v7845_v46  ;;  %v5646_v44 = vsub.f32 %v62_v23, %v5634_v20  ;;  %v278_v31 = vsub.f32 %v5414_v26, %v7852_v57 }
  0x67   :  { %v290_v21 = vsub.f32 %v5417_v28, %v7853_v38  ;;  %v1182_v48 = vsub.f32 %v5423_v40, %v7857_v43  ;;  %v1177_v13 = vand.u32 4294901760, %v1176_v52  ;;  %v7856_v46 = vand.u32 4294901760, %v5425_v41 }
  0x68   :  { %8173 = vst [vmem:[#allocation80_spill] sm:$0xff] %v5646_v44  ;;  %v4414_v10 = vpack.c.bf16 %v285_v16, %v273_v30  ;;  %v1189_v34 = vand.u32 4294901760, %v1188_v9  ;;  %v5659_v23 = vand.u32 4294901760, %v5646_v44  ;;  %v279_v20 = vand.u32 4294901760, %v278_v31 }
  0x69   :  { %v291_v24 = vand.u32 4294901760, %v290_v21  ;;  %v1183_v19 = vand.u32 4294901760, %v1182_v48  ;;  %v1194_v38 = vsub.f32 %v5425_v41, %v7856_v46  ;;  %v7859_v28 = vand.u32 4294901760, %v5427_v42 }
  0x6a   :  { %8174 = vst [vmem:[#allocation81_spill] sm:$0xff] %v5659_v23  ;;  %4415 = vmatprep.subr.bf16.mxu0 %v4414_v10  ;;  %v4606_v57 = vpack.c.bf16 %v1189_v34, %v1177_v13  ;;  %v7858_v30 = vand.u32 4294901760, %v5431_v47  ;;  %v250_v9 = vsub.f32 %v5646_v44, %v5659_v23  ;;  %v7860_v52 = vand.u32 4294901760, %v5435_v49 }
  0x6b   :  { %v4416_v16 = vpack.c.bf16 %v291_v24, %v279_v20  ;;  %v7863_v31 = vand.u32 4294901760, %v5438_v51  ;;  %v1195_v21 = vand.u32 4294901760, %v1194_v38  ;;  %v296_v34 = vsub.f32 %v5427_v42, %v7859_v28 }
  0x6c   :  { %4607 = vmatprep.subr.bf16.mxu1 %v4606_v57  ;;  %v308_v13 = vsub.f32 %v5431_v47, %v7858_v30  ;;  %v7864_v10 = vand.u32 4294901760, %v5440_v53  ;;  %v251_v48 = vand.u32 4294901760, %v250_v9  ;;  %v1200_v24 = vsub.f32 %v5435_v49, %v7860_v52 }
  0x6d   :  { %v1212_v20 = vsub.f32 %v5438_v51, %v7863_v31  ;;  %v7869_v57 = vand.u32 4294901760, %v5446_v62  ;;  %v4608_v38 = vpack.c.bf16 %v1195_v21, %v1183_v19  ;;  %v297_v46 = vand.u32 4294901760, %v296_v34 }
  0x6e   :  { %v309_v43 = vand.u32 4294901760, %v308_v13  ;;  %v302_v30 = vsub.f32 %v5440_v53, %v7864_v10  ;;  %252 = vmatmul.mubr.f32.vlgmr.msra.gmra.mrb[0].mxu0 %v251_v48  ;;  %1156 = vmatmul.mubr.f32.vlgmr.msra.gmra.mrb[0].mxu1 %v251_v48  ;;  %v1201_v9 = vand.u32 4294901760, %v1200_v24  ;;  %v7865_v23 = vand.u32 4294901760, %v5448_v63 }
  0x6f   :  { %v1213_v28 = vand.u32 4294901760, %v1212_v20  ;;  %v314_v52 = vsub.f32 %v5446_v62, %v7869_v57  ;;  %4417 = vmatpush1.bf16.msra.mxu0 %v4416_v16  ;;  %4609 = vmatpush1.bf16.msra.mxu1 %v4608_v38  ;;  %v7866_v21 = vand.u32 4294901760, %v5452_v6  ;;  %v7867_v34 = vand.u32 4294901760, %v5456_v8 }
  0x70   :  { %v4418_v31 = vpack.c.bf16 %v309_v43, %v297_v46  ;;  %v303_v19 = vand.u32 4294901760, %v302_v30  ;;  %v1206_v48 = vsub.f32 %v5448_v63, %v7865_v23  ;;  %v7868_v24 = vand.u32 4294901760, %v5459_v12 }
  0x71   :  { %v4610_v13 = vpack.c.bf16 %v1213_v28, %v1201_v9  ;;  %v315_v10 = vand.u32 4294901760, %v314_v52  ;;  %v8175_v20 = vmov 0.0   ;;  %v1218_v46 = vsub.f32 %v5452_v6, %v7866_v21 }
  0x72   :  { %257 = vmatprep.mubr.f32.mxu0 %v8175_v20  ;;  %1161 = vmatprep.mubr.f32.mxu1 %v8175_v20  ;;  %v320_v28 = vsub.f32 %v5456_v8, %v7867_v34  ;;  %v7870_v43 = vand.u32 4294901760, %v5463_v14  ;;  %v7881_v30 = vand.u32 4294901760, %v5465_v15  ;;  %v1207_v52 = vand.u32 4294901760, %v1206_v48 }
  0x73   :  { %4419 = vmatprep.subr.bf16.mxu0 %v4418_v31  ;;  %4611 = vmatprep.subr.bf16.mxu1 %v4610_v13  ;;  %v4420_v16 = vpack.c.bf16 %v315_v10, %v303_v19  ;;  %v332_v38 = vsub.f32 %v5459_v12, %v7868_v24  ;;  %v7873_v31 = vand.u32 4294901760, %v5472_v35  ;;  %v1219_v9 = vand.u32 4294901760, %v1218_v46 }
  0x74   :  { %v321_v23 = vand.u32 4294901760, %v320_v28  ;;  %v1224_v21 = vsub.f32 %v5463_v14, %v7870_v43  ;;  %v1236_v34 = vsub.f32 %v5465_v15, %v7881_v30  ;;  %v7874_v19 = vand.u32 4294901760, %v5474_v36 }
  0x75   :  { %4421 = vmatpush1.bf16.msra.mxu0 %v4420_v16  ;;  %v333_v13 = vand.u32 4294901760, %v332_v38  ;;  %v326_v10 = vsub.f32 %v5472_v35, %v7873_v31  ;;  %v7878_v48 = vand.u32 4294901760, %v5478_v45  ;;  %v4612_v46 = vpack.c.bf16 %v1219_v9, %v1207_v52 }
  0x76   :  { %v1225_v28 = vand.u32 4294901760, %v1224_v21  ;;  %v1237_v24 = vand.u32 4294901760, %v1236_v34  ;;  %v7875_v57 = vand.u32 4294901760, %v5480_v50  ;;  %v338_v16 = vsub.f32 %v5474_v36, %v7874_v19 }
  0x77   :  { %v4422_v43 = vpack.c.bf16 %v333_v13, %v321_v23  ;;  %v327_v44 = vand.u32 4294901760, %v326_v10  ;;  %v1230_v38 = vsub.f32 %v5478_v45, %v7878_v48  ;;  %4613 = vmatpush1.bf16.msra.mxu1 %v4612_v46  ;;  %v7876_v21 = vand.u32 4294901760, %v5484_v54 }
  0x78   :  { %v4614_v31 = vpack.c.bf16 %v1237_v24, %v1225_v28  ;;  %v1242_v52 = vsub.f32 %v5480_v50, %v7875_v57  ;;  %v7877_v34 = vand.u32 4294901760, %v5488_v58  ;;  %v339_v23 = vand.u32 4294901760, %v338_v16 }
  0x79   :  { %4423 = vmatprep.subr.bf16.mxu0 %v4422_v43  ;;  %v1231_v9 = vand.u32 4294901760, %v1230_v38  ;;  %v7879_v13 = vand.u32 4294901760, %v5492_v60  ;;  %v7880_v10 = vand.u32 4294901760, %v5495_v2  ;;  %v344_v24 = vsub.f32 %v5484_v54, %v7876_v21 }
  0x7a   :  { %4615 = vmatprep.subr.bf16.mxu1 %v4614_v31  ;;  %v1243_v19 = vand.u32 4294901760, %v1242_v52  ;;  %v356_v46 = vsub.f32 %v5488_v58, %v7877_v34  ;;  %v7884_v28 = vand.u32 4294901760, %v5498_v22  ;;  %v4424_v57 = vpack.c.bf16 %v339_v23, %v327_v44 }
  0x7b   :  { %v1248_v43 = vsub.f32 %v5492_v60, %v7879_v13  ;;  %v1260_v31 = vsub.f32 %v5495_v2, %v7880_v10  ;;  %v7883_v16 = vand.u32 4294901760, %v5502_v37  ;;  %v345_v52 = vand.u32 4294901760, %v344_v24 }
  0x7c   :  { %v4616_v38 = vpack.c.bf16 %v1243_v19, %v1231_v9  ;;  %v357_v21 = vand.u32 4294901760, %v356_v46  ;;  %v350_v34 = vsub.f32 %v5498_v22, %v7884_v28  ;;  %4425 = vmatpush1.bf16.msra.mxu0 %v4424_v57  ;;  %v7882_v13 = vand.u32 4294901760, %v5506_v32 }
  0x7d   :  { %v1249_v48 = vand.u32 4294901760, %v1248_v43  ;;  %v1261_v44 = vand.u32 4294901760, %v1260_v31  ;;  %v362_v23 = vsub.f32 %v5502_v37, %v7883_v16  ;;  %v7887_v19 = vand.u32 4294901760, %v5508_v59 }
  0x7e   :  { %4617 = vmatpush1.bf16.msra.mxu1 %v4616_v38  ;;  %v4426_v10 = vpack.c.bf16 %v357_v21, %v345_v52  ;;  %v351_v30 = vand.u32 4294901760, %v350_v34  ;;  %v7888_v9 = vand.u32 4294901760, %v5512_v7  ;;  %v1254_v57 = vsub.f32 %v5506_v32, %v7882_v13  ;;  %v8176_v34 = vld [vmem:[#allocation42_spill] sm:$0xff]  ;;  %v8177_v52 = vld [vmem:[#allocation44_spill] sm:$0xff] }
  0x7f   :  { %v4618_v24 = vpack.c.bf16 %v1261_v44, %v1249_v48  ;;  %v363_v46 = vand.u32 4294901760, %v362_v23  ;;  %v7889_v43 = vand.u32 4294901760, %v5514_v5  ;;  %v1266_v31 = vsub.f32 %v5508_v59, %v7887_v19  ;;  %v8181_v59 = vld [vmem:[#allocation50_spill] sm:$0xff] }
  0x80   :  { %4427 = vmatprep.subr.bf16.mxu0 %v4426_v10  ;;  %v368_v21 = vsub.f32 %v5512_v7, %v7888_v9  ;;  %v7898_v38 = vand.u32 4294901760, %v8176_v34  ;;  %v7901_v48 = vand.u32 4294901760, %v8177_v52  ;;  %v1255_v23 = vand.u32 4294901760, %v1254_v57  ;;  %v8178_v10 = vld [vmem:[#allocation46_spill] sm:$0xff] }
  0x81   :  { %4619 = vmatprep.subr.bf16.mxu1 %v4618_v24  ;;  %v4428_v44 = vpack.c.bf16 %v363_v46, %v351_v30  ;;  %v380_v13 = vsub.f32 %v5514_v5, %v7889_v43  ;;  %v7900_v16 = vand.u32 4294901760, %v8178_v10  ;;  %v1267_v28 = vand.u32 4294901760, %v1266_v31  ;;  %v8179_v46 = vld [vmem:[#allocation47_spill] sm:$0xff]  ;;  %v8180_v43 = vld [vmem:[#allocation49_spill] sm:$0xff] }
  0x82   :  { %v369_v32 = vand.u32 4294901760, %v368_v21  ;;  %v1272_v19 = vsub.f32 %v8176_v34, %v7898_v38  ;;  %v1284_v9 = vsub.f32 %v8177_v52, %v7901_v48  ;;  %v7903_v57 = vand.u32 4294901760, %v8179_v46 }
  0x83   :  { %4429 = vmatpush1.bf16.msra.mxu0 %v4428_v44  ;;  %v381_v24 = vand.u32 4294901760, %v380_v13  ;;  %v374_v30 = vsub.f32 %v8178_v10, %v7900_v16  ;;  %v7906_v5 = vand.u32 4294901760, %v8180_v43  ;;  %v4620_v31 = vpack.c.bf16 %v1267_v28, %v1255_v23  ;;  %v8183_v23 = vld [vmem:[#allocation53_spill] sm:$0xff] }
  0x84   :  { %v1273_v21 = vand.u32 4294901760, %v1272_v19  ;;  %v1285_v7 = vand.u32 4294901760, %v1284_v9  ;;  %v7905_v37 = vand.u32 4294901760, %v8181_v59  ;;  %v386_v44 = vsub.f32 %v8179_v46, %v7903_v57  ;;  %v8182_v19 = vld [vmem:[#allocation52_spill] sm:$0xff] }
  0x85   :  { %v4430_v38 = vpack.c.bf16 %v381_v24, %v369_v32  ;;  %v375_v34 = vand.u32 4294901760, %v374_v30  ;;  %v1278_v13 = vsub.f32 %v8180_v43, %v7906_v5  ;;  %4621 = vmatpush1.bf16.msra.mxu1 %v4620_v31  ;;  %v7908_v9 = vand.u32 4294901760, %v8182_v19  ;;  %v8184_v30 = vld [vmem:[#allocation54_spill] sm:$0xff] }
  0x86   :  { %v4622_v16 = vpack.c.bf16 %v1285_v7, %v1273_v21  ;;  %v1290_v28 = vsub.f32 %v8181_v59, %v7905_v37  ;;  %v7909_v48 = vand.u32 4294901760, %v8183_v23  ;;  %v387_v32 = vand.u32 4294901760, %v386_v44  ;;  %v8185_v21 = vld [vmem:[#allocation58_spill] sm:$0xff]  ;;  %v8186_v44 = vld [vmem:[#allocation59_spill] sm:$0xff] }
  0x87   :  { %4431 = vmatprep.subr.bf16.mxu0 %v4430_v38  ;;  %v1279_v24 = vand.u32 4294901760, %v1278_v13  ;;  %v7911_v10 = vand.u32 4294901760, %v8184_v30  ;;  %v7913_v57 = vand.u32 4294901760, %v5551_v61  ;;  %v392_v7 = vsub.f32 %v8182_v19, %v7908_v9  ;;  %v8188_v19 = vld [vmem:[#allocation62_spill] sm:$0xff] }
  0x88   :  { %4623 = vmatprep.subr.bf16.mxu1 %v4622_v16  ;;  %v1291_v46 = vand.u32 4294901760, %v1290_v28  ;;  %v404_v31 = vsub.f32 %v8183_v23, %v7909_v48  ;;  %v7920_v37 = vand.u32 4294901760, %v8185_v21  ;;  %v4432_v5 = vpack.c.bf16 %v387_v32, %v375_v34 }
  0x89   :  { %v1296_v38 = vsub.f32 %v8184_v30, %v7911_v10  ;;  %v1308_v16 = vsub.f32 %v5551_v61, %v7913_v57  ;;  %v7918_v13 = vand.u32 4294901760, %v8186_v44  ;;  %v393_v59 = vand.u32 4294901760, %v392_v7  ;;  %v8187_v10 = vld [vmem:[#allocation61_spill] sm:$0xff] }
  0x8a   :  { %v4624_v28 = vpack.c.bf16 %v1291_v46, %v1279_v24  ;;  %v405_v9 = vand.u32 4294901760, %v404_v31  ;;  %v398_v48 = vsub.f32 %v8185_v21, %v7920_v37  ;;  %4433 = vmatpush1.bf16.msra.mxu0 %v4432_v5  ;;  %v7919_v30 = vand.u32 4294901760, %v8187_v10  ;;  %v8189_v24 = vld [vmem:[#allocation64_spill] sm:$0xff] }
  0x8b   :  { %v1297_v23 = vand.u32 4294901760, %v1296_v38  ;;  %v1309_v34 = vand.u32 4294901760, %v1308_v16  ;;  %v410_v32 = vsub.f32 %v8186_v44, %v7918_v13  ;;  %v7921_v46 = vand.u32 4294901760, %v8188_v19  ;;  %v8190_v38 = vld [vmem:[#allocation65_spill] sm:$0xff] }
  0x8c   :  { %4625 = vmatpush1.bf16.msra.mxu1 %v4624_v28  ;;  %v4434_v57 = vpack.c.bf16 %v405_v9, %v393_v59  ;;  %v399_v61 = vand.u32 4294901760, %v398_v48  ;;  %v7922_v7 = vand.u32 4294901760, %v8189_v24  ;;  %v1302_v5 = vsub.f32 %v8187_v10, %v7919_v30  ;;  %v8191_v48 = vld [vmem:[#allocation66_spill] sm:$0xff] }
  0x8d   :  { %v4626_v31 = vpack.c.bf16 %v1309_v34, %v1297_v23  ;;  %v411_v43 = vand.u32 4294901760, %v410_v32  ;;  %v7923_v16 = vand.u32 4294901760, %v8190_v38  ;;  %v1314_v13 = vsub.f32 %v8188_v19, %v7921_v46 }
  0x8e   :  { %4435 = vmatprep.subr.bf16.mxu0 %v4434_v57  ;;  %v416_v59 = vsub.f32 %v8189_v24, %v7922_v7  ;;  %v7925_v9 = vand.u32 4294901760, %v8191_v48  ;;  %v7928_v23 = vand.u32 4294901760, %v5579_v1  ;;  %v1303_v34 = vand.u32 4294901760, %v1302_v5 }
  0x8f   :  { %4627 = vmatprep.subr.bf16.mxu1 %v4626_v31  ;;  %v4436_v28 = vpack.c.bf16 %v411_v43, %v399_v61  ;;  %v428_v32 = vsub.f32 %v8190_v38, %v7923_v16  ;;  %v7927_v57 = vand.u32 4294901760, %v5583_v29  ;;  %v1315_v30 = vand.u32 4294901760, %v1314_v13 }
  0x90   :  { %v417_v37 = vand.u32 4294901760, %v416_v59  ;;  %v1320_v46 = vsub.f32 %v8191_v48, %v7925_v9  ;;  %v1332_v7 = vsub.f32 %v5579_v1, %v7928_v23  ;;  %v7929_v43 = vand.u32 4294901760, %v5585_v39 }
  0x91   :  { %4437 = vmatpush1.bf16.msra.mxu0 %v4436_v28  ;;  %v429_v31 = vand.u32 4294901760, %v428_v32  ;;  %v422_v61 = vsub.f32 %v5583_v29, %v7927_v57  ;;  %v7930_v5 = vand.u32 4294901760, %v5589_v55  ;;  %v4628_v13 = vpack.c.bf16 %v1315_v30, %v1303_v34  ;;  %v63_v57 = vld [vmem:[#allocation2 + $0x8] sm:$0xff] }
  0x92   :  { %v1321_v59 = vand.u32 4294901760, %v1320_v46  ;;  %v1333_v16 = vand.u32 4294901760, %v1332_v7  ;;  %v7931_v38 = vand.u32 4294901760, %v5591_v3  ;;  %v434_v28 = vsub.f32 %v5585_v39, %v7929_v43  ;;  %v8192_v7 = vld [vmem:[#allocation72_spill] sm:$0xff] }
  0x93   :  { %v4438_v9 = vpack.c.bf16 %v429_v31, %v417_v37  ;;  %v423_v48 = vand.u32 4294901760, %v422_v61  ;;  %v1326_v32 = vsub.f32 %v5589_v55, %v7930_v5  ;;  %4629 = vmatpush1.bf16.msra.mxu1 %v4628_v13  ;;  %v7932_v46 = vand.u32 4294901760, %v5597_v33 }
  0x94   :  { %v4630_v23 = vpack.c.bf16 %v1333_v16, %v1321_v59  ;;  %v1338_v30 = vsub.f32 %v5591_v3, %v7931_v38  ;;  %v7935_v37 = vand.u32 4294901760, %v8192_v7  ;;  %v435_v34 = vand.u32 4294901760, %v434_v28 }
  0x95   :  { %4439 = vmatprep.subr.bf16.mxu0 %v4438_v9  ;;  %v1327_v31 = vand.u32 4294901760, %v1326_v32  ;;  %v7937_v61 = vand.u32 4294901760, %v5603_v11  ;;  %v7938_v43 = vand.u32 4294901760, %v5609_v56  ;;  %v440_v16 = vsub.f32 %v5597_v33, %v7932_v46 }
  0x96   :  { %4631 = vmatprep.subr.bf16.mxu1 %v4630_v23  ;;  %v1339_v5 = vand.u32 4294901760, %v1338_v30  ;;  %v452_v13 = vsub.f32 %v8192_v7, %v7935_v37  ;;  %v5870_v59 = vand.u32 4294901760, %v63_v57  ;;  %v4440_v38 = vpack.c.bf16 %v435_v34, %v423_v48 }
  0x97   :  { %v1344_v9 = vsub.f32 %v5603_v11, %v7937_v61  ;;  %v1356_v23 = vsub.f32 %v5609_v56, %v7938_v43  ;;  %v7940_v28 = vand.u32 4294901760, %v5613_v0  ;;  %v441_v30 = vand.u32 4294901760, %v440_v16 }
  0x98   :  { %8193 = vst [vmem:[#allocation44_spill] sm:$0xff] %v5870_v59  ;;  %v4632_v32 = vpack.c.bf16 %v1339_v5, %v1327_v31  ;;  %v453_v46 = vand.u32 4294901760, %v452_v13  ;;  %v5880_v33 = vsub.f32 %v63_v57, %v5870_v59  ;;  %4441 = vmatpush1.bf16.msra.mxu0 %v4440_v38  ;;  %v7939_v34 = vand.u32 4294901760, %v5615_v27 }
  0x99   :  { %v1345_v37 = vand.u32 4294901760, %v1344_v9  ;;  %v1357_v7 = vand.u32 4294901760, %v1356_v23  ;;  %v446_v48 = vsub.f32 %v5613_v0, %v7940_v28  ;;  %v7944_v5 = vand.u32 4294901760, %v5619_v4 }
  0x9a   :  { %8194 = vst [vmem:[#allocation58_spill] sm:$0xff] %v5880_v33  ;;  %4633 = vmatpush1.bf16.msra.mxu1 %v4632_v32  ;;  %v4442_v61 = vpack.c.bf16 %v453_v46, %v441_v30  ;;  %v5887_v43 = vand.u32 4294901760, %v5880_v33  ;;  %v7943_v31 = vand.u32 4294901760, %v5621_v25  ;;  %v458_v38 = vsub.f32 %v5615_v27, %v7939_v34  ;;  %v8197_v34 = vld [vmem:[#allocation17_spill] sm:$0xff] }
  0x9b   :  { %v4634_v57 = vpack.c.bf16 %v1357_v7, %v1345_v37  ;;  %v447_v16 = vand.u32 4294901760, %v446_v48  ;;  %v1350_v46 = vsub.f32 %v5619_v4, %v7944_v5  ;;  %v4446_v30 = vpack.c.bf16 %v5404_v18, %v5402_v17  ;;  %v8196_v48 = vld [vmem:[#allocation15_spill] sm:$0xff] }
  0x9c   :  { %8195 = vst [vmem:[#allocation59_spill] sm:$0xff] %v5887_v43  ;;  %4443 = vmatprep.subr.bf16.mxu0 %v4442_v61  ;;  %v261_v13 = vsub.f32 %v5880_v33, %v5887_v43  ;;  %v1362_v9 = vsub.f32 %v5621_v25, %v7943_v31  ;;  %v459_v23 = vand.u32 4294901760, %v458_v38  ;;  %v4638_v28 = vpack.c.bf16 %v8197_v34, %v8196_v48  ;;  %v8198_v31 = vld [vmem:[#allocation20_spill] sm:$0xff] }
  0x9d   :  { %4635 = vmatprep.subr.bf16.mxu1 %v4634_v57  ;;  %v1351_v37 = vand.u32 4294901760, %v1350_v46  ;;  %v4448_v57 = vpack.c.bf16 %v8198_v31, %v5414_v26  ;;  %v4640_v38 = vpack.c.bf16 %v5425_v41, %v5423_v40  ;;  %v8199_v46 = vld [vmem:[#allocation79_spill] sm:$0xff]  ;;  %v8204_v41 = vld [vmem:[#allocation41_spill] sm:$0xff]  ;;  %v8205_v31 = vld [vmem:[#allocation42_spill] sm:$0xff]  ;;  %v8206_v26 = vand.u32 4294901760, %v5427_v42 }
  0x9e   :  { %v262_v7 = vand.u32 4294901760, %v261_v13  ;;  %v1363_v32 = vand.u32 4294901760, %v1362_v9  ;;  %v4444_v61 = vpack.c.bf16 %v459_v23, %v447_v16  ;;  %v4450_v16 = vpack.c.bf16 %v5431_v47, %v5427_v42 }
  0x9f   :  { %v4642_v13 = vpack.c.bf16 %v5438_v51, %v5435_v49  ;;  %v4644_v9 = vpack.c.bf16 %v5452_v6, %v5448_v63  ;;  %v4454_v23 = vpack.c.bf16 %v5459_v12, %v5456_v8  ;;  %v8207_v34 = vand.u32 4294901760, %v5431_v47 }
  0xa0   :  { %263 = vmatmul.mubr.f32.gmra.mrb[2].mxu0 %v262_v7  ;;  %1167 = vmatmul.mubr.f32.gmra.mrb[2].mxu1 %v262_v7  ;;  %v4636_v43 = vpack.c.bf16 %v1363_v32, %v1351_v37  ;;  %v4456_v7 = vpack.c.bf16 %v5474_v36, %v5472_v35  ;;  %v4648_v37 = vpack.c.bf16 %v5480_v50, %v5478_v45  ;;  %v8208_v18 = vand.u32 4294901760, %v5435_v49 }
  0xa1   :  { %4445 = vmatpush1.bf16.msra.mxu0 %v4444_v61  ;;  %493 = vmatprep.mubr.f32.mxu0 %v8175_v20  ;;  %v4458_v32 = vpack.c.bf16 %v5488_v58, %v5484_v54  ;;  %v8200_v61 = vld [vmem:[#allocation35_spill] sm:$0xff]  ;;  %v5950_v48 = vpack.c.bf16 %v8207_v34, %v8206_v26  ;;  %v8209_v17 = vand.u32 4294901760, %v5438_v51  ;;  %v8210_v25 = vand.u32 4294901760, %v5440_v53 }
  0xa2   :  { %4637 = vmatpush1.bf16.msra.mxu1 %v4636_v43  ;;  %4447 = vmatprep.subr.bf16.mxu0 %v4446_v30  ;;  %v4452_v43 = vpack.c.bf16 %v5446_v62, %v5440_v53  ;;  %v4650_v30 = vpack.c.bf16 %v5495_v2, %v5492_v60  ;;  %v8211_v4 = vand.u32 4294901760, %v5446_v62  ;;  %v8212_v42 = vand.u32 4294901760, %v5448_v63 }
  0xa3   :  { %1397 = vmatprep.mubr.f32.mxu1 %v8175_v20  ;;  %4639 = vmatprep.subr.bf16.mxu1 %v4638_v28  ;;  %v4646_v28 = vpack.c.bf16 %v5465_v15, %v5463_v14  ;;  %v5956_v33 = vpack.c.bf16 %v8209_v17, %v8208_v18  ;;  %v8213_v47 = vand.u32 4294901760, %v5452_v6  ;;  %v8214_v49 = vand.u32 4294901760, %v5456_v8 }
  0xa4   :  { %495 = vmatmul.mubr.f32.vlgmr.msra.gmra.mrb[0].mxu0 %v8199_v46  ;;  %v5962_v27 = vpack.c.bf16 %v8211_v4, %v8210_v25  ;;  %v8215_v51 = vand.u32 4294901760, %v5459_v12  ;;  %v8216_v18 = vand.u32 4294901760, %v5463_v14  ;;  %v8217_v53 = vand.u32 4294901760, %v5465_v15 }
  0xa5   :  { %4449 = vmatpush1.bf16.msra.mxu0 %v4448_v57  ;;  %1399 = vmatmul.mubr.f32.vlgmr.msra.gmra.mrb[0].mxu1 %v8199_v46  ;;  %v4460_v57 = vpack.c.bf16 %v8200_v61, %v5498_v22  ;;  %v8203_v46 = vld [vmem:[#allocation40_spill] sm:$0xff]  ;;  %v5968_v26 = vpack.c.bf16 %v8213_v47, %v8212_v42  ;;  %v8218_v63 = vand.u32 4294901760, %v5472_v35  ;;  %v8219_v6 = vand.u32 4294901760, %v5474_v36  ;;  %v8234_v47 = vld [vmem:[#allocation46_spill] sm:$0xff] }
  0xa6   :  { %4641 = vmatpush1.bf16.msra.mxu1 %v4640_v38  ;;  %4451 = vmatprep.subr.bf16.mxu0 %v4450_v16  ;;  %v8201_v38 = vld [vmem:[#allocation37_spill] sm:$0xff]  ;;  %v8202_v16 = vld [vmem:[#allocation38_spill] sm:$0xff]  ;;  %v4462_v40 = vpack.c.bf16 %v8204_v41, %v8203_v46  ;;  %v5974_v17 = vpack.c.bf16 %v8215_v51, %v8214_v49  ;;  %v5980_v62 = vpack.c.bf16 %v8217_v53, %v8216_v18  ;;  %v8220_v8 = vand.u32 4294901760, %v5478_v45 }
  0xa7   :  { %4643 = vmatprep.subr.bf16.mxu1 %v4642_v13  ;;  %500 = vmatprep.mubr.f32.mxu0 %v8175_v20  ;;  %v4652_v5 = vpack.c.bf16 %v8202_v16, %v8201_v38  ;;  %v4654_v13 = vpack.c.bf16 %v8177_v52, %v8205_v31  ;;  %v5987_v25 = vpack.c.bf16 %v8219_v6, %v8218_v63  ;;  %v8221_v12 = vand.u32 4294901760, %v5480_v50  ;;  %v8238_v18 = vld [vmem:[#allocation49_spill] sm:$0xff]  ;;  %v8242_v6 = vld [vmem:[#allocation52_spill] sm:$0xff] }
  0xa8   :  { %1404 = vmatprep.mubr.f32.mxu1 %v8175_v20  ;;  %502 = vmatmul.mubr.f32.gmra.mrb[2].mxu0 %v5870_v59  ;;  %v8222_v14 = vand.u32 4294901760, %v5484_v54  ;;  %v8223_v15 = vand.u32 4294901760, %v5488_v58  ;;  %v8224_v35 = vand.u32 4294901760, %v5492_v60  ;;  %v8225_v36 = vand.u32 4294901760, %v5495_v2 }
  0xa9   :  { %4453 = vmatpush1.bf16.msra.mxu0 %v4452_v43  ;;  %1406 = vmatmul.mubr.f32.gmra.mrb[2].mxu1 %v5870_v59  ;;  %v5993_v4 = vpack.c.bf16 %v8221_v12, %v8220_v8  ;;  %v8226_v45 = vand.u32 4294901760, %v5498_v22  ;;  %v8227_v50 = vand.u32 4294901760, %v8200_v61  ;;  %v8228_v54 = vand.u32 4294901760, %v8201_v38  ;;  %v8236_v38 = vld [vmem:[#allocation47_spill] sm:$0xff]  ;;  %v8244_v8 = vld [vmem:[#allocation53_spill] sm:$0xff] }
  0xaa   :  { %4645 = vmatpush1.bf16.msra.mxu1 %v4644_v9  ;;  %4455 = vmatprep.subr.bf16.mxu0 %v4454_v23  ;;  %v5999_v34 = vpack.c.bf16 %v8223_v15, %v8222_v14  ;;  %v6006_v43 = vpack.c.bf16 %v8225_v36, %v8224_v35  ;;  %v8229_v58 = vand.u32 4294901760, %v8202_v16  ;;  %v8231_v60 = vand.u32 4294901760, %v8204_v41  ;;  %v8248_v15 = vld [vmem:[#allocation56_spill] sm:$0xff] }
  0xab   :  { %4647 = vmatprep.subr.bf16.mxu1 %v4646_v28  ;;  %636 = vmatprep.mubr.f32.mxu0 %v8175_v20  ;;  %v6012_v9 = vpack.c.bf16 %v8227_v50, %v8226_v45  ;;  %v8230_v28 = vand.u32 4294901760, %v8203_v46  ;;  %v8232_v2 = vand.u32 4294901760, %v8205_v31  ;;  %v8233_v22 = vand.u32 4294901760, %v8177_v52  ;;  %v8240_v46 = vld [vmem:[#allocation50_spill] sm:$0xff] }
  0xac   :  { %1540 = vmatprep.mubr.f32.mxu1 %v8175_v20  ;;  %v6018_v23 = vpack.c.bf16 %v8229_v58, %v8228_v54  ;;  %v8235_v49 = vand.u32 4294901760, %v8234_v47  ;;  %v8237_v51 = vand.u32 4294901760, %v8236_v38  ;;  %v8239_v53 = vand.u32 4294901760, %v8238_v18  ;;  %v8246_v52 = vld [vmem:[#allocation54_spill] sm:$0xff] }
  0xad   :  { %v6024_v42 = vpack.c.bf16 %v8231_v60, %v8230_v28  ;;  %4457 = vmatpush1.bf16.msra.mxu0 %v4456_v7  ;;  %v6030_v61 = vpack.c.bf16 %v8233_v22, %v8232_v2  ;;  %v8241_v63 = vand.u32 4294901760, %v8240_v46  ;;  %v8243_v7 = vand.u32 4294901760, %v8242_v6 }
  0xae   :  { %v6036_v16 = vpack.c.bf16 %v8237_v51, %v8235_v49  ;;  %v8245_v31 = vand.u32 4294901760, %v8244_v8  ;;  %4649 = vmatpush1.bf16.msra.mxu1 %v4648_v37  ;;  %4459 = vmatprep.subr.bf16.mxu0 %v4458_v32  ;;  %v8247_v14 = vand.u32 4294901760, %v8246_v52  ;;  %v8249_v35 = vand.u32 4294901760, %v8248_v15  ;;  %v8256_v32 = vld [vmem:[#allocation65_spill] sm:$0xff]  ;;  %v8259_v49 = vld [vmem:[#allocation66_spill] sm:$0xff] }
  0xaf   :  { %v6042_v41 = vpack.c.bf16 %v8241_v63, %v8239_v53  ;;  %v8250_v45 = vand.u32 4294901760, %v8185_v21  ;;  %v8251_v50 = vand.u32 4294901760, %v8186_v44  ;;  %v8252_v58 = vand.u32 4294901760, %v8187_v10  ;;  %4651 = vmatprep.subr.bf16.mxu1 %v4650_v30 }
  0xb0   :  { %v6048_v12 = vpack.c.bf16 %v8245_v31, %v8243_v7  ;;  %v6054_v36 = vpack.c.bf16 %v8249_v35, %v8247_v14  ;;  %v8253_v28 = vand.u32 4294901760, %v8188_v19  ;;  %v8255_v37 = vand.u32 4294901760, %v8189_v24 }
  0xb1   :  { %v6060_v54 = vpack.c.bf16 %v8251_v50, %v8250_v45  ;;  %v8257_v2 = vand.u32 4294901760, %v8256_v32  ;;  %v8260_v51 = vand.u32 4294901760, %v8259_v49  ;;  %v8261_v53 = vand.u32 4294901760, %v5579_v1  ;;  %v8269_v50 = vld [vmem:[#allocation71_spill] sm:$0xff]  ;;  %4461 = vmatpush1.bf16.msra.mxu0 %v4460_v57 }
  0xb2   :  { %v6066_v60 = vpack.c.bf16 %v8253_v28, %v8252_v58  ;;  %v8263_v7 = vand.u32 4294901760, %v5583_v29  ;;  %v8264_v31 = vand.u32 4294901760, %v5585_v39  ;;  %v8266_v30 = vand.u32 4294901760, %v5589_v55  ;;  %v8271_v28 = vld [vmem:[#allocation72_spill] sm:$0xff]  ;;  %4653 = vmatpush1.bf16.msra.mxu1 %v4652_v5  ;;  %4463 = vmatprep.subr.bf16.mxu0 %v4462_v40 }
  0xb3   :  { %v6072_v22 = vpack.c.bf16 %v8257_v2, %v8255_v37  ;;  %v6078_v63 = vpack.c.bf16 %v8261_v53, %v8260_v51  ;;  %v8267_v35 = vand.u32 4294901760, %v5591_v3  ;;  %v8270_v58 = vand.u32 4294901760, %v8269_v50  ;;  %4655 = vmatprep.subr.bf16.mxu1 %v4654_v13 }
  0xb4   :  { %8254 = vst [vmem:[#allocation61_spill] sm:$0xff] %v6066_v60  ;;  %v6084_v14 = vpack.c.bf16 %v8264_v31, %v8263_v7  ;;  %v8272_v37 = vand.u32 4294901760, %v8271_v28  ;;  %v8273_v51 = vand.u32 4294901760, %v5603_v11  ;;  %v8274_v53 = vand.u32 4294901760, %v5609_v56  ;;  %v8276_v31 = vld [vmem:[#allocation75_spill] sm:$0xff] }
  0xb5   :  { %8258 = vst [vmem:[#allocation62_spill] sm:$0xff] %v6072_v22  ;;  %8262 = vst [vmem:[#allocation64_spill] sm:$0xff] %v6078_v63  ;;  %v6090_v45 = vpack.c.bf16 %v8267_v35, %v8266_v30  ;;  %v8275_v7 = vand.u32 4294901760, %v5613_v0  ;;  %v8278_v30 = vld [vmem:[#allocation77_spill] sm:$0xff]  ;;  %v4660_v5 = vpack.c.bf16 %v8188_v19, %v8187_v10  ;;  %v4470_v40 = vpack.c.bf16 %v8256_v32, %v8189_v24  ;;  %v8285_v19 = vld [vmem:[#allocation18_spill] sm:$0xff] }
  0xb6   :  { %8265 = vst [vmem:[#allocation35_spill] sm:$0xff] %v6084_v14  ;;  %v6096_v2 = vpack.c.bf16 %v8272_v37, %v8270_v58  ;;  %v6102_v59 = vpack.c.bf16 %v8274_v53, %v8273_v51  ;;  %v8277_v14 = vand.u32 4294901760, %v8276_v31  ;;  %v8279_v35 = vand.u32 4294901760, %v8278_v30  ;;  %v8289_v24 = vld [vmem:[#allocation58_spill] sm:$0xff]  ;;  %v8303_v53 = vld [vmem:[#allocation48_spill] sm:$0xff] }
  0xb7   :  { %8268 = vst [vmem:[#allocation37_spill] sm:$0xff] %v6090_v45  ;;  %v8280_v45 = vld [vmem:[#allocation78_spill] sm:$0xff]  ;;  %v4464_v58 = vpack.c.bf16 %v8236_v38, %v8234_v47  ;;  %v4656_v37 = vpack.c.bf16 %v8240_v46, %v8238_v18  ;;  %v4466_v51 = vpack.c.bf16 %v8244_v8, %v8242_v6  ;;  %v4662_v57 = vpack.c.bf16 %v5579_v1, %v8259_v49  ;;  %v8291_v38 = vld [vmem:[#allocation27_spill] sm:$0xff]  ;;  %v8292_v18 = vld [vmem:[#allocation28_spill] sm:$0xff] }
  0xb8   :  { %v6108_v63 = vpack.c.bf16 %v8277_v14, %v8275_v7  ;;  %v8281_v22 = vand.u32 4294901760, %v8280_v45  ;;  %v4658_v14 = vpack.c.bf16 %v8248_v15, %v8246_v52  ;;  %v4472_v13 = vpack.c.bf16 %v5585_v39, %v5583_v29  ;;  %v8284_v29 = vld [vmem:[#allocation80_spill] sm:$0xff]  ;;  %v8290_v47 = vld [vmem:[#allocation26_spill] sm:$0xff]  ;;  %v8293_v46 = vld [vmem:[#allocation29_spill] sm:$0xff] }
  0xb9   :  { %4465 = vmatpush1.bf16.msra.mxu0 %v4464_v58  ;;  %4657 = vmatpush1.bf16.msra.mxu1 %v4656_v37  ;;  %v4666_v10 = vpack.c.bf16 %v5609_v56, %v5603_v11  ;;  %v4476_v1 = vpack.c.bf16 %v8276_v31, %v5613_v0  ;;  %v4668_v39 = vpack.c.bf16 %v8280_v45, %v8278_v30  ;;  %v8286_v11 = vld [vmem:[#allocation21_spill] sm:$0xff]  ;;  %v8287_v56 = vld [vmem:[#allocation24_spill] sm:$0xff]  ;;  %v8294_v6 = vld [vmem:[#allocation30_spill] sm:$0xff] }
  0xba   :  { %v6114_v60 = vpack.c.bf16 %v8281_v22, %v8279_v35  ;;  %v4468_v22 = vpack.c.bf16 %v8186_v44, %v8185_v21  ;;  %4467 = vmatprep.subr.bf16.mxu0 %v4466_v51  ;;  %4659 = vmatprep.subr.bf16.mxu1 %v4658_v14  ;;  %v4664_v21 = vpack.c.bf16 %v5591_v3, %v5589_v55  ;;  %v8282_v55 = vld [vmem:[#allocation12_spill] sm:$0xff]  ;;  %v8288_v0 = vld [vmem:[#allocation25_spill] sm:$0xff]  ;;  %v8295_v8 = vld [vmem:[#allocation31_spill] sm:$0xff] }
  0xbb   :  { %v4474_v44 = vpack.c.bf16 %v8271_v28, %v8269_v50  ;;  %v8283_v3 = vld [vmem:[#allocation16_spill] sm:$0xff]  ;;  %v8297_v15 = vld [vmem:[#allocation33_spill] sm:$0xff]  ;;  %v8298_v32 = vld [vmem:[#allocation34_spill] sm:$0xff] }
  0xbc   :  { %v8296_v52 = vld [vmem:[#allocation32_spill] sm:$0xff]  ;;  %v8300_v45 = vld [vmem:[#allocation39_spill] sm:$0xff]  ;;  %v8302_v28 = vld [vmem:[#allocation45_spill] sm:$0xff] }
  0xbd   :  { %4469 = vmatpush1.bf16.msra.mxu0 %v4468_v22  ;;  %4661 = vmatpush1.bf16.msra.mxu1 %v4660_v5  ;;  %v8299_v49 = vld [vmem:[#allocation36_spill] sm:$0xff]  ;;  %v8301_v50 = vld [vmem:[#allocation43_spill] sm:$0xff]  ;;  %v8306_v30 = vld [vmem:[#allocation57_spill] sm:$0xff] }
  0xbe   :  { %4471 = vmatprep.subr.bf16.mxu0 %v4470_v40  ;;  %4663 = vmatprep.subr.bf16.mxu1 %v4662_v57  ;;  %v8304_v7 = vld [vmem:[#allocation51_spill] sm:$0xff]  ;;  %v8307_v35 = vld [vmem:[#allocation60_spill] sm:$0xff]  ;;  %v8311_v14 = vld [vmem:[#allocation69_spill] sm:$0xff] }
  0xbf   :  { %v8305_v31 = vld [vmem:[#allocation55_spill] sm:$0xff]  ;;  %v8310_v51 = vld [vmem:[#allocation68_spill] sm:$0xff]  ;;  %v8312_v22 = vld [vmem:[#allocation70_spill] sm:$0xff] }
  0xc0   :  { %v8308_v58 = vld [vmem:[#allocation63_spill] sm:$0xff]  ;;  %v8313_v5 = vld [vmem:[#allocation13_spill] sm:$0xff]  ;;  %v8315_v57 = vld [vmem:[#allocation14_spill] sm:$0xff] }
  0xc1   :  { %4473 = vmatpush1.bf16.msra.mxu0 %v4472_v13  ;;  %4665 = vmatpush1.bf16.msra.mxu1 %v4664_v21  ;;  %v8309_v37 = vld [vmem:[#allocation67_spill] sm:$0xff]  ;;  %v8314_v40 = vand.u32 4294901760, %v8313_v5  ;;  %v8316_v13 = vand.u32 4294901760, %v8315_v57  ;;  %v8328_v5 = vld [vmem:[#allocation22_spill] sm:$0xff] }
  0xc2   :  { %4475 = vmatprep.subr.bf16.mxu0 %v4474_v44  ;;  %4667 = vmatprep.subr.bf16.mxu1 %v4666_v10  ;;  %v8317_v44 = vld [vmem:[#allocation73_spill] sm:$0xff]  ;;  %v8318_v10 = vld [vmem:[#allocation15_spill] sm:$0xff]  ;;  %v8329_v57 = vand.u32 4294901760, %v8328_v5 }
  0xc3   :  { %v4510_v21 = vpack.c.bf16 %v8316_v13, %v8314_v40  ;;  %v8330_v40 = vld [vmem:[#allocation23_spill] sm:$0xff] }
  0xc4   :  { %v8331_v13 = vand.u32 4294901760, %v8330_v40 }
  0xc5   :  { %4477 = vmatpush1.bf16.msra.mxu0 %v4476_v1  ;;  %4669 = vmatpush1.bf16.msra.mxu1 %v4668_v39  ;;  %v8319_v1 = vand.u32 4294901760, %v8318_v10  ;;  %v8320_v39 = vld [vmem:[#allocation17_spill] sm:$0xff] }
  0xc6   :  { %4479 = vmatprep.subr.bf16.mxu0 %v8282_v55  ;;  %4671 = vmatprep.subr.bf16.mxu1 %v8283_v3  ;;  %v8332_v10 = vld [vmem:[#allocation81_spill] sm:$0xff] }
  0xc8   :  { %639 = vmatmul.mubr.f32.vlgmr.msra.gmra.mrb[0].mxu0 %v8284_v29  ;;  %1543 = vmatmul.mubr.f32.vlgmr.msra.gmra.mrb[0].mxu1 %v8284_v29  ;;  %v8321_v29 = vand.u32 4294901760, %v8320_v39 }
  0xc9   :  { %4481 = vmatpush1.bf16.msra.mxu0 %v8285_v19  ;;  %4673 = vmatpush1.bf16.msra.mxu1 %v8286_v11 }
  0xca   :  { %4483 = vmatprep.subr.bf16.mxu0 %v8287_v56  ;;  %4675 = vmatprep.subr.bf16.mxu1 %v8288_v0 }
  0xcb   :  { %644 = vmatprep.mubr.f32.mxu0 %v8175_v20  ;;  %1548 = vmatprep.mubr.f32.mxu1 %v8175_v20 }
  0xcc   :  { %647 = vmatmul.mubr.f32.gmra.mrb[2].mxu0 %v8289_v24  ;;  %1551 = vmatmul.mubr.f32.gmra.mrb[2].mxu1 %v8289_v24  ;;  %v4702_v24 = vpack.c.bf16 %v8321_v29, %v8319_v1 }
  0xcd   :  { %4485 = vmatpush1.bf16.msra.mxu0 %v8290_v47  ;;  %4677 = vmatpush1.bf16.msra.mxu1 %v8291_v38 }
  0xce   :  { %4487 = vmatprep.subr.bf16.mxu0 %v8292_v18  ;;  %4679 = vmatprep.subr.bf16.mxu1 %v8293_v46 }
  0xcf   :  { %749 = vmatprep.mubr.f32.mxu0 %v8175_v20  ;;  %1653 = vmatprep.mubr.f32.mxu1 %v8175_v20 }
  0xd1   :  { %4489 = vmatpush1.bf16.msra.mxu0 %v8294_v6  ;;  %4681 = vmatpush1.bf16.msra.mxu1 %v8295_v8 }
  0xd2   :  { %4491 = vmatprep.subr.bf16.mxu0 %v8296_v52  ;;  %4683 = vmatprep.subr.bf16.mxu1 %v8297_v15 }
  0xd5   :  { %4493 = vmatpush1.bf16.msra.mxu0 %v8298_v32  ;;  %4685 = vmatpush1.bf16.msra.mxu1 %v8299_v49 }
  0xd6   :  { %4495 = vmatprep.subr.bf16.mxu0 %v8300_v45  ;;  %4687 = vmatprep.subr.bf16.mxu1 %v8301_v50 }
  0xd9   :  { %4497 = vmatpush1.bf16.msra.mxu0 %v8302_v28  ;;  %4689 = vmatpush1.bf16.msra.mxu1 %v8303_v53 }
  0xda   :  { %4499 = vmatprep.subr.bf16.mxu0 %v8304_v7  ;;  %4691 = vmatprep.subr.bf16.mxu1 %v8305_v31 }
  0xdd   :  { %4501 = vmatpush1.bf16.msra.mxu0 %v8306_v30  ;;  %4693 = vmatpush1.bf16.msra.mxu1 %v8307_v35  ;;  %v8325_v35 = vld [vmem:[#allocation20_spill] sm:$0xff] }
  0xde   :  { %4503 = vmatprep.subr.bf16.mxu0 %v8308_v58  ;;  %4695 = vmatprep.subr.bf16.mxu1 %v8309_v37  ;;  %v8322_v58 = vld [vmem:[#allocation74_spill] sm:$0xff]  ;;  %v8323_v37 = vld [vmem:[#allocation19_spill] sm:$0xff] }
  0xe1   :  { %4505 = vmatpush1.bf16.msra.mxu0 %v8310_v51  ;;  %4697 = vmatpush1.bf16.msra.mxu1 %v8311_v14  ;;  %v8324_v51 = vand.u32 4294901760, %v8323_v37  ;;  %v8326_v14 = vand.u32 4294901760, %v8325_v35  ;;  %v8333_v35 = vld [vmem:[#allocation59_spill] sm:$0xff]  ;;  %v8343_v37 = vld [vmem:[#allocation57_spill] sm:$0xff] }
  0xe2   :  { %4507 = vmatprep.subr.bf16.mxu0 %v8312_v22  ;;  %4699 = vmatprep.subr.bf16.mxu1 %v8317_v44  ;;  %v8327_v22 = vld [vmem:[#allocation76_spill] sm:$0xff]  ;;  %v4704_v44 = vpack.c.bf16 %v8331_v13, %v8329_v57 }
  0xe3   :  { %v4512_v30 = vpack.c.bf16 %v8326_v14, %v8324_v51  ;;  %v8344_v14 = vld [vmem:[#allocation60_spill] sm:$0xff] }
  0xe5   :  { %4509 = vmatpush1.bf16.msra.mxu0 %v8322_v58  ;;  %4701 = vmatpush1.bf16.msra.mxu1 %v8327_v22 }
  0xe6   :  { %4511 = vmatprep.subr.bf16.mxu0 %v4510_v21  ;;  %4703 = vmatprep.subr.bf16.mxu1 %v4702_v24  ;;  %v8345_v21 = vld [vmem:[#allocation63_spill] sm:$0xff] }
  0xe7   :  { %v8346_v24 = vld [vmem:[#allocation67_spill] sm:$0xff] }
  0xe8   :  { %753 = vmatmul.mubr.f32.vlgmr.msra.gmra.mrb[0].mxu0 %v8332_v10  ;;  %1657 = vmatmul.mubr.f32.vlgmr.msra.gmra.mrb[0].mxu1 %v8332_v10  ;;  %v8347_v10 = vld [vmem:[#allocation68_spill] sm:$0xff] }
  0xe9   :  { %4513 = vmatpush1.bf16.msra.mxu0 %v4512_v30  ;;  %4705 = vmatpush1.bf16.msra.mxu1 %v4704_v44 }
  0xea   :  { %4515 = vmatprep.subr.bf16.mxu0 %v5950_v48  ;;  %4707 = vmatprep.subr.bf16.mxu1 %v5956_v33  ;;  %v8335_v33 = vld [vmem:[#allocation62_spill] sm:$0xff]  ;;  %v8336_v48 = vld [vmem:[#allocation64_spill] sm:$0xff] }
  0xeb   :  { %758 = vmatprep.mubr.f32.mxu0 %v8175_v20  ;;  %1662 = vmatprep.mubr.f32.mxu1 %v8175_v20 }
  0xec   :  { %762 = vmatmul.mubr.f32.gmra.mrb[2].mxu0 %v8333_v35  ;;  %1666 = vmatmul.mubr.f32.gmra.mrb[2].mxu1 %v8333_v35 }
  0xed   :  { %4517 = vmatpush1.bf16.msra.mxu0 %v5962_v27  ;;  %4709 = vmatpush1.bf16.msra.mxu1 %v5968_v26  ;;  %v8334_v27 = vld [vmem:[#allocation61_spill] sm:$0xff]  ;;  %v8337_v26 = vld [vmem:[#allocation35_spill] sm:$0xff] }
  0xee   :  { %4519 = vmatprep.subr.bf16.mxu0 %v5974_v17  ;;  %4711 = vmatprep.subr.bf16.mxu1 %v5980_v62  ;;  %v8338_v17 = vld [vmem:[#allocation37_spill] sm:$0xff]  ;;  %v8339_v62 = vld [vmem:[#allocation79_spill] sm:$0xff] }
  0xef   :  { %928 = vmatprep.mubr.f32.mxu0 %v8175_v20  ;;  %1832 = vmatprep.mubr.f32.mxu1 %v8175_v20 }
  0xf1   :  { %4521 = vmatpush1.bf16.msra.mxu0 %v5987_v25  ;;  %4713 = vmatpush1.bf16.msra.mxu1 %v5993_v4  ;;  %v6247_v25 = vld [vmem:[#allocation7 + $0x88] sm:$0xff]  ;;  %v8340_v4 = vld [vmem:[#allocation44_spill] sm:$0xff] }
  0xf2   :  { %4523 = vmatprep.subr.bf16.mxu0 %v5999_v34  ;;  %4715 = vmatprep.subr.bf16.mxu1 %v6006_v43  ;;  %v2121_v43 = vand.u32 4294901760, %v6247_v25 }
  0xf5   :  { %4525 = vmatpush1.bf16.msra.mxu0 %v6012_v9  ;;  %4717 = vmatpush1.bf16.msra.mxu1 %v6018_v23  ;;  %v6257_v9 = vld [vmem:[#allocation7] sm:$0xff]  ;;  %v6261_v23 = vld [vmem:[#allocation7 + $0x8] sm:$0xff] }
  0xf6   :  { %4527 = vmatprep.subr.bf16.mxu0 %v6024_v42  ;;  %4719 = vmatprep.subr.bf16.mxu1 %v6030_v61  ;;  %v6264_v42 = vld [vmem:[#allocation7 + $0x90] sm:$0xff]  ;;  %v6266_v61 = vld [vmem:[#allocation7 + $0x98] sm:$0xff] }
  0xf9   :  { %4529 = vmatpush1.bf16.msra.mxu0 %v6036_v16  ;;  %4721 = vmatpush1.bf16.msra.mxu1 %v6042_v41  ;;  %v2070_v16 = vand.u32 4294901760, %v6257_v9 }
  0xfa   :  { %4531 = vmatprep.subr.bf16.mxu0 %v6048_v12  ;;  %4723 = vmatprep.subr.bf16.mxu1 %v6054_v36  ;;  %v6280_v12 = vsub.f32 %v6247_v25, %v2121_v43  ;;  %v2073_v36 = vand.u32 4294901760, %v6261_v23 }
  0xfd   :  { %4533 = vmatpush1.bf16.msra.mxu0 %v6060_v54  ;;  %4725 = vmatpush1.bf16.msra.mxu1 %v8334_v27  ;;  %v6283_v54 = vld [vmem:[#allocation7 + $0x10] sm:$0xff] }
  0xfe   :  { %4535 = vmatprep.subr.bf16.mxu0 %v8335_v33  ;;  %4727 = vmatprep.subr.bf16.mxu1 %v8336_v48  ;;  %v8348_v33 = vld [vmem:[#allocation69_spill] sm:$0xff]  ;;  %v8349_v48 = vld [vmem:[#allocation70_spill] sm:$0xff] }
 0x101   :  { %4537 = vmatpush1.bf16.msra.mxu0 %v8337_v26  ;;  %4729 = vmatpush1.bf16.msra.mxu1 %v8338_v17 }
 0x102   :  { %4539 = vmatprep.subr.bf16.mxu0 %v6096_v2  ;;  %4731 = vmatprep.subr.bf16.mxu1 %v6102_v59  ;;  %v6245_v59 = vld [vmem:[#allocation7 + $0x80] sm:$0xff]  ;;  %v6288_v2 = vld [vmem:[#allocation7 + $0x18] sm:$0xff] }
 0x103   :  { %v2118_v34 = vand.u32 4294901760, %v6245_v59 }
 0x105   :  { %4541 = vmatpush1.bf16.msra.mxu0 %v6108_v63  ;;  %4733 = vmatpush1.bf16.msra.mxu1 %v6114_v60  ;;  %v6275_v41 = vsub.f32 %v6245_v59, %v2118_v34  ;;  %v2124_v60 = vand.u32 4294901760, %v6264_v42  ;;  %v2127_v63 = vand.u32 4294901760, %v6266_v61 }
 0x106   :  { %4543 = vmatprep.subr.bf16.mxu0 %v8282_v55  ;;  %4735 = vmatprep.subr.bf16.mxu1 %v8283_v3  ;;  %v6290_v55 = vld [vmem:[#allocation7 + $0xa0] sm:$0xff]  ;;  %v6292_v3 = vld [vmem:[#allocation7 + $0xa8] sm:$0xff] }
 0x108   :  { %930 = vmatmul.mubr.f32.vlgmr.msra.gmra.mrb[0].mxu0 %v8339_v62  ;;  %1834 = vmatmul.mubr.f32.vlgmr.msra.gmra.mrb[0].mxu1 %v8339_v62 }
 0x109   :  { %4545 = vmatpush1.bf16.msra.mxu0 %v8285_v19  ;;  %4737 = vmatpush1.bf16.msra.mxu1 %v8286_v11  ;;  %v6298_v19 = vsub.f32 %v6257_v9, %v2070_v16  ;;  %v2076_v11 = vand.u32 4294901760, %v6283_v54 }
 0x10a   :  { %4547 = vmatprep.subr.bf16.mxu0 %v8287_v56  ;;  %4739 = vmatprep.subr.bf16.mxu1 %v8288_v0  ;;  %v7977_v56 = vand.u32 4294901760, %v6275_v41  ;;  %v7976_v0 = vand.u32 4294901760, %v6280_v12 }
 0x10b   :  { %935 = vmatprep.mubr.f32.mxu0 %v8175_v20  ;;  %1839 = vmatprep.mubr.f32.mxu1 %v8175_v20 }
 0x10c   :  { %937 = vmatmul.mubr.f32.gmra.mrb[2].mxu0 %v8340_v4  ;;  %1841 = vmatmul.mubr.f32.gmra.mrb[2].mxu1 %v8340_v4 }
 0x10d   :  { %4549 = vmatpush1.bf16.msra.mxu0 %v8290_v47  ;;  %4741 = vmatpush1.bf16.msra.mxu1 %v8291_v38  ;;  %v6308_v47 = vsub.f32 %v6261_v23, %v2073_v36  ;;  %v2079_v38 = vand.u32 4294901760, %v6288_v2 }
 0x10e   :  { %4551 = vmatprep.subr.bf16.mxu0 %v8292_v18  ;;  %4743 = vmatprep.subr.bf16.mxu1 %v8293_v46  ;;  %v6315_v18 = vsub.f32 %v6264_v42, %v2124_v60  ;;  %v6320_v46 = vsub.f32 %v6266_v61, %v2127_v63 }
 0x10f   :  { %1039 = vmatprep.mubr.f32.mxu0 %v8175_v20  ;;  %1943 = vmatprep.mubr.f32.mxu1 %v8175_v20  ;;  %v6525_v42 = vpack.c.bf16 %v2079_v38, %v2076_v11 }
 0x111   :  { %4553 = vmatpush1.bf16.msra.mxu0 %v8294_v6  ;;  %4745 = vmatpush1.bf16.msra.mxu1 %v8295_v8  ;;  %v2130_v6 = vand.u32 4294901760, %v6290_v55  ;;  %v2133_v8 = vand.u32 4294901760, %v6292_v3 }
 0x112   :  { %4555 = vmatprep.subr.bf16.mxu0 %v8296_v52  ;;  %4747 = vmatprep.subr.bf16.mxu1 %v8297_v15  ;;  %v7974_v52 = vand.u32 4294901760, %v6298_v19  ;;  %v6329_v15 = vsub.f32 %v6283_v54, %v2076_v11 }
 0x113   :  { %v6356_v30 = vsub.f32 %v6292_v3, %v2133_v8 }
 0x114   :  { %v7966_v51 = vand.u32 4294901760, %v6329_v15 }
 0x115   :  { %4557 = vmatpush1.bf16.msra.mxu0 %v8298_v32  ;;  %4749 = vmatpush1.bf16.msra.mxu1 %v8299_v49  ;;  %v2312_v32 = vsub.f32 %v6275_v41, %v7977_v56  ;;  %v2319_v49 = vsub.f32 %v6280_v12, %v7976_v0  ;;  %8342 = vst [vmem:[#allocation40_spill] sm:$0xff] %v6356_v30  ;;  %v7963_v13 = vand.u32 4294901760, %v6356_v30 }
 0x116   :  { %4559 = vmatprep.subr.bf16.mxu0 %v8300_v45  ;;  %4751 = vmatprep.subr.bf16.mxu1 %v8301_v50  ;;  %v7973_v45 = vand.u32 4294901760, %v6308_v47  ;;  %v6343_v50 = vsub.f32 %v6288_v2, %v2079_v38  ;;  %v2214_v27 = vsub.f32 %v6329_v15, %v7966_v51  ;;  %v6564_v0 = vpack.c.bf16 %v2133_v8, %v2130_v6 }
 0x117   :  { %v2313_v44 = vand.u32 4294901760, %v2312_v32  ;;  %v2320_v1 = vand.u32 4294901760, %v2319_v49  ;;  %v6391_v49 = vpack.c.bf16 %v2121_v43, %v2118_v34 }
 0x118   :  { %v2207_v39 = vsub.f32 %v6308_v47, %v7973_v45  ;;  %v7965_v29 = vand.u32 4294901760, %v6343_v50  ;;  %v2215_v25 = vand.u32 4294901760, %v2214_v27 }
 0x119   :  { %4561 = vmatpush1.bf16.msra.mxu0 %v8302_v28  ;;  %4753 = vmatpush1.bf16.msra.mxu1 %v8303_v53  ;;  %v7968_v28 = vand.u32 4294901760, %v6315_v18  ;;  %v7967_v53 = vand.u32 4294901760, %v6320_v46  ;;  %v4798_v26 = vpack.c.bf16 %v2320_v1, %v2313_v44  ;;  %v2347_v44 = vsub.f32 %v6356_v30, %v7963_v13  ;;  %v6471_v13 = vld [vmem:[#allocation7 + $0xc8] sm:$0xff] }
 0x11a   :  { %4563 = vmatprep.subr.bf16.mxu0 %v8304_v7  ;;  %4755 = vmatprep.subr.bf16.mxu1 %v8305_v31  ;;  %v6351_v7 = vsub.f32 %v6290_v55, %v2130_v6  ;;  %v2200_v31 = vsub.f32 %v6298_v19, %v7974_v52  ;;  %v2208_v17 = vand.u32 4294901760, %v2207_v39  ;;  %v2221_v32 = vsub.f32 %v6343_v50, %v7965_v29 }
 0x11b   :  { %v2326_v5 = vsub.f32 %v6315_v18, %v7968_v28  ;;  %v2333_v57 = vsub.f32 %v6320_v46, %v7967_v53  ;;  %v2348_v39 = vand.u32 4294901760, %v2347_v44  ;;  %v6489_v28 = vld [vmem:[#allocation7 + $0x40] sm:$0xff]  ;;  %v2145_v23 = vand.u32 4294901760, %v6471_v13 }
 0x11c   :  { %8341 = vst [vmem:[#allocation38_spill] sm:$0xff] %v6351_v7  ;;  %v7964_v40 = vand.u32 4294901760, %v6351_v7  ;;  %v2201_v35 = vand.u32 4294901760, %v2200_v31  ;;  %v2222_v34 = vand.u32 4294901760, %v2221_v32  ;;  %v6435_v32 = vld [vmem:[#allocation7 + $0x38] sm:$0xff] }
 0x11d   :  { %4565 = vmatpush1.bf16.msra.mxu0 %v8343_v37  ;;  %4757 = vmatpush1.bf16.msra.mxu1 %v8344_v14  ;;  %v8350_v37 = vld [vmem:[#allocation73_spill] sm:$0xff]  ;;  %v2327_v31 = vand.u32 4294901760, %v2326_v5  ;;  %v2334_v14 = vand.u32 4294901760, %v2333_v57  ;;  %v6411_v5 = vld [vmem:[#allocation7 + $0x28] sm:$0xff] }
 0x11e   :  { %4567 = vmatprep.subr.bf16.mxu0 %v8345_v21  ;;  %4759 = vmatprep.subr.bf16.mxu1 %v8346_v24  ;;  %v2340_v21 = vsub.f32 %v6351_v7, %v7964_v40  ;;  %v4800_v59 = vpack.c.bf16 %v2208_v17, %v2201_v35  ;;  %v6409_v24 = vld [vmem:[#allocation7 + $0x20] sm:$0xff]  ;;  %v2085_v57 = vand.u32 4294901760, %v6411_v5  ;;  %v6427_v35 = vld [vmem:[#allocation7 + $0xb8] sm:$0xff]  ;;  %v6433_v17 = vld [vmem:[#allocation7 + $0x30] sm:$0xff] }
 0x11f   :  { %v4802_v43 = vpack.c.bf16 %v2334_v14, %v2327_v31  ;;  %v2091_v31 = vand.u32 4294901760, %v6435_v32 }
 0x120   :  { %v2341_v1 = vand.u32 4294901760, %v2340_v21 }
 0x121   :  { %4569 = vmatpush1.bf16.msra.mxu0 %v8347_v10  ;;  %4761 = vmatpush1.bf16.msra.mxu1 %v8348_v33  ;;  %v6423_v10 = vsub.f32 %v6411_v5, %v2085_v57 }
 0x122   :  { %4571 = vmatprep.subr.bf16.mxu0 %v8349_v48  ;;  %4763 = vmatprep.subr.bf16.mxu1 %v8350_v37  ;;  %v2088_v37 = vand.u32 4294901760, %v6433_v17 }
 0x123   :  { %v7961_v33 = vand.u32 4294901760, %v6423_v10 }
 0x125   :  { %4573 = vmatpush1.bf16.msra.mxu0 %v8322_v58  ;;  %4765 = vmatpush1.bf16.msra.mxu1 %v8327_v22  ;;  %v4804_v58 = vpack.c.bf16 %v2222_v34, %v2215_v25  ;;  %v4806_v22 = vpack.c.bf16 %v2348_v39, %v2341_v1  ;;  %v2235_v21 = vsub.f32 %v6423_v10, %v7961_v33 }
 0x126   :  { %4767 = vmatprep.subr.bf16.mxu0 %v6391_v49  ;;  %4799 = vmatprep.subr.bf16.mxu1 %v4798_v26  ;;  %v2139_v26 = vand.u32 4294901760, %v6427_v35  ;;  %v6458_v25 = vsub.f32 %v6433_v17, %v2088_v37  ;;  %v6463_v34 = vsub.f32 %v6435_v32, %v2091_v31 }
 0x127   :  { %v2236_v1 = vand.u32 4294901760, %v2235_v21 }
 0x128   :  { %1041 = vmatmul.mubr.f32.vlgmr.msra.gmra.mrb[0].mxu0 %v8339_v62  ;;  %1945 = vmatmul.mubr.f32.vlgmr.msra.gmra.mrb[0].mxu1 %v8339_v62  ;;  %v2082_v62 = vand.u32 4294901760, %v6409_v24  ;;  %v7969_v33 = vand.u32 4294901760, %v6458_v25 }
 0x129   :  { %1046 = vmatprep.mubr.f32.mxu0 %v8175_v20  ;;  %1950 = vmatprep.mubr.f32.mxu1 %v8175_v20 }
 0x12a   :  { %4801 = vmatpush3.bf16.msra.mxu1 %v4800_v59  ;;  %v6418_v20 = vsub.f32 %v6409_v24, %v2082_v62  ;;  %v6453_v59 = vsub.f32 %v6427_v35, %v2139_v26  ;;  %v2242_v53 = vsub.f32 %v6458_v25, %v7969_v33  ;;  %v6578_v55 = vpack.c.bf16 %v2085_v57, %v2082_v62  ;;  %v6599_v62 = vld [vmem:[#allocation7 + $0xe8] sm:$0xff] }
 0x12b   :  { %4803 = vmatprep.subr.bf16.mxu1 %v4802_v43 }
 0x12c   :  { %1048 = vmatmul.mubr.f32.gmra.mrb[2].mxu0 %v8340_v4  ;;  %1952 = vmatmul.mubr.f32.gmra.mrb[2].mxu1 %v8340_v4  ;;  %v6425_v4 = vld [vmem:[#allocation7 + $0xb0] sm:$0xff]  ;;  %v7962_v27 = vand.u32 4294901760, %v6418_v20 }
 0x12d   :  { %v2136_v48 = vand.u32 4294901760, %v6425_v4 }
 0x12e   :  { %4805 = vmatpush3.bf16.msra.mxu1 %v4804_v58  ;;  %v2228_v14 = vsub.f32 %v6418_v20, %v7962_v27  ;;  %v7970_v58 = vand.u32 4294901760, %v6453_v59  ;;  %v7971_v27 = vand.u32 4294901760, %v6463_v34 }
 0x12f   :  { %4807 = vmatprep.subr.bf16.mxu1 %v4806_v22  ;;  %v6448_v44 = vsub.f32 %v6425_v4, %v2136_v48  ;;  %v6467_v22 = vld [vmem:[#allocation7 + $0xc0] sm:$0xff]  ;;  %v6624_v4 = vpack.c.bf16 %v2091_v31, %v2088_v37 }
 0x130   :  { %v2229_v43 = vand.u32 4294901760, %v2228_v14  ;;  %v2142_v40 = vand.u32 4294901760, %v6467_v22  ;;  %v6478_v14 = vpack.c.bf16 %v2073_v36, %v2070_v16  ;;  %v2361_v51 = vsub.f32 %v6453_v59, %v7970_v58  ;;  %v6496_v16 = vld [vmem:[#allocation7 + $0x48] sm:$0xff]  ;;  %v6503_v58 = vld [vmem:[#allocation7 + $0xd0] sm:$0xff] }
 0x131   :  { %v7972_v39 = vand.u32 4294901760, %v6448_v44  ;;  %v2249_v9 = vsub.f32 %v6463_v34, %v7971_v27  ;;  %v7980_v54 = vand.u32 4294901760, %v6503_v58  ;;  %8352 = vst [vmem:[#allocation42_spill] sm:$0xff] %v6624_v4  ;;  %v8356_v30 = vand.u32 4294901760, %v6496_v16 }
 0x132   :  { %v4808_v21 = vpack.c.bf16 %v2236_v1, %v2229_v43  ;;  %4769 = vmatpush3.bf16.msra.mxu0 %v6478_v14  ;;  %v2362_v43 = vand.u32 4294901760, %v2361_v51  ;;  %v2243_v1 = vand.u32 4294901760, %v2242_v53  ;;  %v6501_v33 = vsub.f32 %v6467_v22, %v2142_v40  ;;  %v6517_v51 = vld [vmem:[#allocation7 + $0xd8] sm:$0xff] }
 0x133   :  { %v2354_v29 = vsub.f32 %v6448_v44, %v7972_v39  ;;  %v2250_v27 = vand.u32 4294901760, %v2249_v9  ;;  %v7991_v53 = vand.u32 4294901760, %v6489_v28  ;;  %v6519_v39 = vld [vmem:[#allocation7 + $0x50] sm:$0xff]  ;;  %v7983_v38 = vand.u32 4294901760, %v6517_v51 }
 0x134   :  { %4809 = vmatpush3.bf16.msra.mxu1 %v4808_v21  ;;  %v6509_v21 = vpack.c.bf16 %v2127_v63, %v2124_v60  ;;  %v7975_v61 = vand.u32 4294901760, %v6501_v33  ;;  %v7979_v60 = vand.u32 4294901760, %v6496_v16  ;;  %v6529_v63 = vld [vmem:[#allocation7 + $0x58] sm:$0xff] }
 0x135   :  { %v2355_v36 = vand.u32 4294901760, %v2354_v29  ;;  %v6514_v29 = vsub.f32 %v6471_v13, %v2145_v23  ;;  %v4812_v9 = vpack.c.bf16 %v2250_v27, %v2243_v1  ;;  %v7984_v27 = vand.u32 4294901760, %v6519_v39 }
 0x136   :  { %4771 = vmatprep.subr.bf16.mxu0 %v6509_v21  ;;  %v2368_v2 = vsub.f32 %v6501_v33, %v7975_v61  ;;  %v6546_v11 = vsub.f32 %v6496_v16, %v7979_v60  ;;  %v6557_v1 = vsub.f32 %v6503_v58, %v7980_v54  ;;  %v7985_v61 = vand.u32 4294901760, %v6529_v63  ;;  %v6572_v60 = vld [vmem:[#allocation7 + $0xe0] sm:$0xff] }
 0x137   :  { %8351 = vst [vmem:[#allocation41_spill] sm:$0xff] %v6514_v29  ;;  %v4810_v45 = vpack.c.bf16 %v2362_v43, %v2355_v36  ;;  %v7978_v52 = vand.u32 4294901760, %v6514_v29  ;;  %v6536_v36 = vsub.f32 %v6489_v28, %v7991_v53  ;;  %4773 = vmatpush3.bf16.msra.mxu0 %v6525_v42  ;;  %v6592_v24 = vsub.f32 %v6519_v39, %v7984_v27 }
 0x138   :  { %v7981_v56 = vand.u32 4294901760, %v6546_v11  ;;  %v7986_v6 = vand.u32 4294901760, %v6557_v1  ;;  %4775 = vmatprep.subr.bf16.mxu0 %v6564_v0  ;;  %v6597_v5 = vsub.f32 %v6529_v63, %v7985_v61  ;;  %v6610_v27 = vpack.c.bf16 %v2139_v26, %v2136_v48  ;;  %v6618_v61 = vld [vmem:[#allocation7 + $0x68] sm:$0xff] }
 0x139   :  { %4811 = vmatprep.subr.bf16.mxu1 %v4810_v45  ;;  %v2375_v45 = vsub.f32 %v6514_v29, %v7978_v52  ;;  %v7982_v43 = vand.u32 4294901760, %v6536_v36  ;;  %v6570_v52 = vsub.f32 %v6517_v51, %v7983_v38  ;;  %v2157_v48 = vand.u32 4294901760, %v6599_v62 }
 0x13a   :  { %4813 = vmatpush3.bf16.msra.mxu1 %v4812_v9  ;;  %v2369_v9 = vand.u32 4294901760, %v2368_v2  ;;  %v2263_v8 = vsub.f32 %v6546_v11, %v7981_v56  ;;  %v2382_v56 = vsub.f32 %v6557_v1, %v7986_v6  ;;  %v7989_v35 = vand.u32 4294901760, %v6597_v5 }
 0x13b   :  { %v2376_v54 = vand.u32 4294901760, %v2375_v45  ;;  %v2256_v3 = vsub.f32 %v6536_v36, %v7982_v43  ;;  %v7987_v2 = vand.u32 4294901760, %v6570_v52  ;;  %4777 = vmatpush3.bf16.msra.mxu0 %v6578_v55  ;;  %v7990_v43 = vand.u32 4294901760, %v6572_v60 }
 0x13c   :  { %v2264_v38 = vand.u32 4294901760, %v2263_v8  ;;  %v2383_v6 = vand.u32 4294901760, %v2382_v56  ;;  %4779 = vmatprep.subr.bf16.mxu0 %v6610_v27  ;;  %v2277_v17 = vsub.f32 %v6597_v5, %v7989_v35  ;;  %v6642_v32 = vsub.f32 %v6599_v62, %v2157_v48 }
 0x13d   :  { %v4814_v57 = vpack.c.bf16 %v2376_v54, %v2369_v9  ;;  %v2257_v45 = vand.u32 4294901760, %v2256_v3  ;;  %v2389_v54 = vsub.f32 %v6570_v52, %v7987_v2  ;;  %v7988_v9 = vand.u32 4294901760, %v6592_v24  ;;  %v6616_v3 = vld [vmem:[#allocation7 + $0x60] sm:$0xff] }
 0x13e   :  { %v6635_v56 = vsub.f32 %v6572_v60, %v7990_v43  ;;  %8353 = vst [vmem:[#allocation46_spill] sm:$0xff] %v6642_v32  ;;  %v2106_v37 = vand.u32 4294901760, %v6616_v3  ;;  %v2109_v31 = vand.u32 4294901760, %v6618_v61  ;;  %v2012_v43 = vld [vmem:[#allocation7 + $0x70] sm:$0xff]  ;;  %v2278_v62 = vand.u32 4294901760, %v2277_v17 }
 0x13f   :  { %4815 = vmatprep.subr.bf16.mxu1 %v4814_v57  ;;  %v4816_v26 = vpack.c.bf16 %v2264_v38, %v2257_v45  ;;  %v2390_v8 = vand.u32 4294901760, %v2389_v54  ;;  %v2270_v2 = vsub.f32 %v6592_v24, %v7988_v9  ;;  %4781 = vmatpush3.bf16.msra.mxu0 %v6624_v4  ;;  %v2028_v38 = vld [vmem:[#allocation7 + $0xf0] sm:$0xff]  ;;  %v2029_v57 = vld [vmem:[#allocation7 + $0xf8] sm:$0xff]  ;;  %v6650_v9 = vpack.c.bf16 %v2145_v23, %v2142_v40 }
 0x140   :  { %v7999_v35 = vand.u32 4294901760, %v6635_v56  ;;  %v7998_v53 = vand.u32 4294901760, %v6642_v32  ;;  %v8355_v4 = vand.u32 4294901760, %v6489_v28  ;;  %v6668_v13 = vsub.f32 %v6618_v61, %v2109_v31 }
 0x141   :  { %4817 = vmatpush3.bf16.msra.mxu1 %v4816_v26  ;;  %v4818_v45 = vpack.c.bf16 %v2390_v8, %v2383_v6  ;;  %v2271_v54 = vand.u32 4294901760, %v2270_v2  ;;  %8354 = vst [vmem:[#allocation47_spill] sm:$0xff] %v6650_v9  ;;  %v6661_v6 = vsub.f32 %v6616_v3, %v2106_v37  ;;  %4783 = vmatprep.subr.bf16.mxu0 %v6650_v9  ;;  %v2160_v22 = vand.u32 4294901760, %v2028_v38  ;;  %v2013_v2 = vld [vmem:[#allocation7 + $0x78] sm:$0xff] }
 0x142   :  { %v6658_v7 = vpack.c.bf16 %v8356_v30, %v8355_v4  ;;  %v2396_v40 = vsub.f32 %v6635_v56, %v7999_v35  ;;  %8359 = vst [vmem:[#allocation52_spill] sm:$0xff] %v6668_v13  ;;  %v2163_v23 = vand.u32 4294901760, %v2029_v57  ;;  %v2403_v30 = vsub.f32 %v6642_v32, %v7998_v53 }
 0x143   :  { %8358 = vst [vmem:[#allocation50_spill] sm:$0xff] %v6661_v6  ;;  %4819 = vmatprep.subr.bf16.mxu1 %v4818_v45  ;;  %v4820_v28 = vpack.c.bf16 %v2278_v62, %v2271_v54  ;;  %v8001_v16 = vand.u32 4294901760, %v6661_v6  ;;  %v2112_v3 = vand.u32 4294901760, %v2012_v43  ;;  %v8360_v8 = vand.u32 4294901760, %v6503_v58 }
 0x144   :  { %8357 = vst [vmem:[#allocation49_spill] sm:$0xff] %v6658_v7  ;;  %4785 = vmatpush3.bf16.msra.mxu0 %v6658_v7  ;;  %v2397_v4 = vand.u32 4294901760, %v2396_v40  ;;  %v8361_v61 = vand.u32 4294901760, %v6517_v51  ;;  %v6682_v45 = vsub.f32 %v2028_v38, %v2160_v22  ;;  %v2404_v54 = vand.u32 4294901760, %v2403_v30 }
 0x145   :  { %4821 = vmatpush3.bf16.msra.mxu1 %v4820_v28  ;;  %v2284_v62 = vsub.f32 %v6661_v6, %v8001_v16  ;;  %v6687_v53 = vsub.f32 %v2029_v57, %v2163_v23  ;;  %v8365_v40 = vand.u32 4294901760, %v6519_v39  ;;  %v8366_v35 = vand.u32 4294901760, %v6529_v63 }
 0x146   :  { %v6680_v17 = vpack.c.bf16 %v8361_v61, %v8360_v8  ;;  %8363 = vst [vmem:[#allocation54_spill] sm:$0xff] %v6682_v45  ;;  %v8368_v58 = vand.u32 4294901760, %v6668_v13  ;;  %v8000_v38 = vand.u32 4294901760, %v6682_v45  ;;  %v2115_v28 = vand.u32 4294901760, %v2013_v2 }
 0x147   :  { %8364 = vst [vmem:[#allocation56_spill] sm:$0xff] %v6687_v53  ;;  %v6693_v26 = vpack.c.bf16 %v8366_v35, %v8365_v40  ;;  %v6700_v30 = vsub.f32 %v2012_v43, %v2112_v3  ;;  %v4822_v8 = vpack.c.bf16 %v2404_v54, %v2397_v4  ;;  %v2285_v57 = vand.u32 4294901760, %v2284_v62 }
 0x148   :  { %8362 = vst [vmem:[#allocation53_spill] sm:$0xff] %v6680_v17  ;;  %v2291_v51 = vsub.f32 %v6668_v13, %v8368_v58  ;;  %4787 = vmatprep.subr.bf16.mxu0 %v6680_v17  ;;  %v8004_v61 = vand.u32 4294901760, %v6687_v53  ;;  %v2410_v63 = vsub.f32 %v6682_v45, %v8000_v38  ;;  %v6708_v40 = vsub.f32 %v2013_v2, %v2115_v28 }
 0x149   :  { %8367 = vst [vmem:[#allocation65_spill] sm:$0xff] %v6693_v26  ;;  %8369 = vst [vmem:[#allocation66_spill] sm:$0xff] %v6700_v30  ;;  %4789 = vmatpush3.bf16.msra.mxu0 %v6693_v26  ;;  %v8003_v35 = vand.u32 4294901760, %v6700_v30  ;;  %4823 = vmatprep.subr.bf16.mxu1 %v4822_v8  ;;  %v8371_v4 = vand.u32 4294901760, %v6572_v60  ;;  %v6717_v62 = vpack.c.bf16 %v2109_v31, %v2106_v37 }
 0x14a   :  { %v2292_v39 = vand.u32 4294901760, %v2291_v51  ;;  %8370 = vst [vmem:[#allocation71_spill] sm:$0xff] %v6708_v40  ;;  %v2417_v43 = vsub.f32 %v6687_v53, %v8004_v61  ;;  %v2411_v51 = vand.u32 4294901760, %v2410_v63  ;;  %v8002_v2 = vand.u32 4294901760, %v6708_v40 }
 0x14b   :  { %v6715_v54 = vpack.c.bf16 %v2157_v48, %v8371_v4  ;;  %8373 = vst [vmem:[#allocation75_spill] sm:$0xff] %v6717_v62  ;;  %v2298_v38 = vsub.f32 %v6700_v30, %v8003_v35  ;;  %v6728_v48 = vpack.c.bf16 %v2163_v23, %v2160_v22  ;;  %v6730_v31 = vpack.c.bf16 %v2115_v28, %v2112_v3 }
 0x14c   :  { %v4824_v58 = vpack.c.bf16 %v2292_v39, %v2285_v57  ;;  %v2418_v16 = vand.u32 4294901760, %v2417_v43  ;;  %v2305_v60 = vsub.f32 %v6708_v40, %v8002_v2 }
 0x14d   :  { %8372 = vst [vmem:[#allocation72_spill] sm:$0xff] %v6715_v54  ;;  %4791 = vmatprep.subr.bf16.mxu0 %v6715_v54  ;;  %v2299_v8 = vand.u32 4294901760, %v2298_v38  ;;  %8374 = vst [vmem:[#allocation77_spill] sm:$0xff] %v6728_v48  ;;  %v4830_v38 = vpack.c.bf16 %v6280_v12, %v6275_v41 }
 0x14e   :  { %4825 = vmatpush3.bf16.msra.mxu1 %v4824_v58  ;;  %4793 = vmatpush3.bf16.msra.mxu0 %v6717_v62  ;;  %v4826_v37 = vpack.c.bf16 %v2418_v16, %v2411_v51  ;;  %8375 = vst [vmem:[#allocation78_spill] sm:$0xff] %v6730_v31  ;;  %v2306_v57 = vand.u32 4294901760, %v2305_v60  ;;  %v130_v60 = vlaneseq }
 0x14f   :  { %4795 = vmatprep.subr.bf16.mxu0 %v6728_v48 }
 0x150   :  { %4827 = vmatprep.subr.bf16.mxu1 %v4826_v37  ;;  %v4828_v39 = vpack.c.bf16 %v2306_v57, %v2299_v8  ;;  %v6759_v37 = vshrl.u32 %v130_v60, 7 }
 0x152   :  { %4797 = vmatpush3.bf16.msra.mxu0 %v6730_v31  ;;  %4829 = vmatpush3.bf16.msra.mxu1 %v4828_v39  ;;  %v132_v57 = vsub.s32 0, %v6759_v37  ;;  %v6765_v39 = vld [vmem:[%s7755_s2] sm:$0xf] }
 0x153   :  { %4831 = vmatprep.subr.bf16.mxu0 %v4830_v38  ;;  %4863 = vmatprep.subr.bf16.mxu1 %v6391_v49  ;;  %v136_v38 = vsub.s32 1, %v6759_v37 }
 0x154   :  { %v133_v2 = vrot.slane %v6765_v39, %v132_v57 }
 0x155   :  { %v137_v35 = vrot.slane %v6765_v39, %v136_v38 }
 0x1fb   :  { %v1042_v61 = vpop.f32.mrb[0].mxu0  ;;  %v6770_v58 = vpop.f32.mrb[0].mxu1 }
 0x1fc   :  { %v5150_v51 = vadd.f32 %v1042_v61, %v133_v2  ;;  %8376 = vst [vmem:[#allocation12_spill] sm:$0xff] %v6770_v58  ;;  %v1044_v8 = vpop.f32.mrb[1].mxu0  ;;  %v6772_v4 = vpop.f32.mrb[1].mxu1 }
 0x1fd   :  { %v5151_v60 = vadd.f32 %v1044_v8, %v137_v35 }
 0x1fe   :  { %v1966_v43 = vmul.f32 0.70710677, %v5150_v51  ;;  %v1958_v8 = vmul.f32 0.5, %v5150_v51 }
 0x1ff   :  { %v1967_v63 = vmul.f32 0.70710677, %v5151_v60  ;;  %v1049_v28 = vpop.f32.mrb[2].mxu0  ;;  %v6774_v3 = vpop.f32.mrb[2].mxu1  ;;  %v1959_v53 = vmul.f32 0.5, %v5151_v60 }
 0x200   :  { %5207 = verf.f32 %v1966_v43  ;;  %8377 = vst [vmem:[#allocation16_spill] sm:$0xff] %v6774_v3  ;;  %v5152_v16 = vadd.f32 %v1049_v28, %v133_v2  ;;  %v1051_v23 = vpop.f32.mrb[3].mxu0  ;;  %v6776_v22 = vpop.f32.mrb[3].mxu1 }
 0x201   :  { %8378 = vst [vmem:[#allocation80_spill] sm:$0xff] %v6776_v22  ;;  %5209 = verf.f32 %v1967_v63  ;;  %v5153_v57 = vadd.f32 %v1051_v23, %v137_v35 }
 0x202   :  { %v1970_v38 = vmul.f32 0.70710677, %v5152_v16  ;;  %v1962_v28 = vmul.f32 0.5, %v5152_v16 }
 0x203   :  { %v1971_v61 = vmul.f32 0.70710677, %v5153_v57 }
 0x204   :  { %5211 = verf.f32 %v1970_v38  ;;  %v1963_v38 = vmul.f32 0.5, %v5153_v57 }
 0x205   :  { %5213 = verf.f32 %v1971_v61 }
 0x20a   :  { %v5208_v58 = vpop.eup %5207 }
 0x20b   :  { %v1982_v30 = vadd.f32 1.0, %v5208_v58  ;;  %v5210_v40 = vpop.eup %5209 }
 0x20c   :  { %v1983_v43 = vadd.f32 1.0, %v5210_v40 }
 0x20d   :  { %v1990_v45 = vmul.f32 %v1982_v30, %v1958_v8  ;;  %v4832_v8 = vpack.c.bf16 %v6308_v47, %v6298_v19 }
 0x20e   :  { %v5212_v6 = vpop.eup %5211  ;;  %v1991_v2 = vmul.f32 %v1983_v43, %v1959_v53 }
 0x20f   :  { %v6778_v13 = vand.u32 4294901760, %v1990_v45  ;;  %v1986_v3 = vadd.f32 1.0, %v5212_v6  ;;  %v5214_v22 = vpop.eup %5213 }
 0x210   :  { %v6783_v23 = vand.u32 4294901760, %v1991_v2  ;;  %v1987_v51 = vadd.f32 1.0, %v5214_v22 }
 0x211   :  { %8379 = vst [vmem:[#allocation18_spill] sm:$0xff] %v6778_v13  ;;  %v6781_v35 = vsub.f32 %v1990_v45, %v6778_v13  ;;  %v1994_v63 = vmul.f32 %v1986_v3, %v1962_v28  ;;  %v4834_v28 = vpack.c.bf16 %v6320_v46, %v6315_v18 }
 0x212   :  { %v2166_v30 = vsub.f32 %v1991_v2, %v6783_v23  ;;  %2421 = vmatprep.mubr.f32.mxu1 %v6783_v23  ;;  %v1995_v53 = vmul.f32 %v1987_v51, %v1963_v38 }
 0x213   :  { %v8019_v58 = vand.u32 4294901760, %v6781_v35  ;;  %v6788_v40 = vand.u32 4294901760, %v1994_v63  ;;  %2423 = vmatmul.mubr.f32.vlgmr.msra.gmra.mrb[4].mxu1 %v6778_v13  ;;  %v8398_v13 = vpack.c.bf16 %v6514_v29, %v6501_v33 }
 0x214   :  { %4865 = vmatpush3.bf16.msra.mxu1 %v6478_v14  ;;  %v2167_v6 = vand.u32 4294901760, %v2166_v30  ;;  %v6798_v16 = vand.u32 4294901760, %v1995_v53 }
 0x215   :  { %8380 = vst [vmem:[#allocation21_spill] sm:$0xff] %v6788_v40  ;;  %v2174_v45 = vsub.f32 %v6781_v35, %v8019_v58  ;;  %v6796_v22 = vsub.f32 %v1994_v63, %v6788_v40  ;;  %4867 = vmatprep.subr.bf16.mxu1 %v6509_v21  ;;  %v8393_v58 = vpack.c.bf16 %v6463_v34, %v6458_v25 }
 0x216   :  { %8381 = vst [vmem:[#allocation24_spill] sm:$0xff] %v6798_v16  ;;  %v2168_v3 = vsub.f32 %v2166_v30, %v2167_v6  ;;  %v6802_v60 = vsub.f32 %v1995_v53, %v6798_v16  ;;  %2428 = vmatprep.mubr.f32.mxu1 %v6798_v16  ;;  %v4836_v53 = vpack.c.bf16 %v6343_v50, %v6329_v15  ;;  %v6867_v16 = vld [vmem:[#allocation7 + $0x1f0] sm:$0xff] }
 0x217   :  { %v8017_v57 = vand.u32 4294901760, %v6796_v22  ;;  %2430 = vmatmul.mubr.f32.gmra.mrb[6].mxu1 %v6788_v40  ;;  %v2175_v43 = vand.u32 4294901760, %v2174_v45  ;;  %v8382_v45 = vld [vmem:[#allocation38_spill] sm:$0xff]  ;;  %8396 = vst [vmem:[#allocation32_spill] sm:$0xff] %v6867_v16 }
 0x218   :  { %v2169_v61 = vand.u32 4294901760, %v2168_v3  ;;  %4869 = vmatpush3.bf16.msra.mxu1 %v6525_v42  ;;  %2681 = vmatprep.mubr.f32.mxu1 %v2167_v6  ;;  %v8018_v2 = vand.u32 4294901760, %v6802_v60  ;;  %v8383_v3 = vld [vmem:[#allocation40_spill] sm:$0xff] }
 0x219   :  { %4871 = vmatprep.subr.bf16.mxu1 %v6564_v0  ;;  %v2189_v63 = vsub.f32 %v6796_v22, %v8017_v57  ;;  %v6848_v57 = vld [vmem:[#allocation7 + $0x168] sm:$0xff] }
 0x21a   :  { %2170 = vmatprep.mubr.f32.mxu0 %v2169_v61  ;;  %v2183_v38 = vsub.f32 %v6802_v60, %v8018_v2  ;;  %v4838_v61 = vpack.c.bf16 %v8383_v3, %v8382_v45  ;;  %8392 = vst [vmem:[#allocation29_spill] sm:$0xff] %v6848_v57  ;;  %v6869_v2 = vld [vmem:[#allocation7 + $0x1f8] sm:$0xff] }
 0x21b   :  { %2176 = vmatmul.mubr.f32.vlgmr.msra.gmra.mrb[4].mxu0 %v2175_v43  ;;  %v2190_v6 = vand.u32 4294901760, %v2189_v63  ;;  %v8384_v43 = vld [vmem:[#allocation42_spill] sm:$0xff]  ;;  %8397 = vst [vmem:[#allocation33_spill] sm:$0xff] %v6869_v2 }
 0x21c   :  { %4833 = vmatpush3.bf16.msra.mxu0 %v4832_v8  ;;  %4873 = vmatpush3.bf16.msra.mxu1 %v6578_v55  ;;  %v2184_v51 = vand.u32 4294901760, %v2183_v38  ;;  %v6827_v8 = vld [vmem:[#allocation7 + $0x150] sm:$0xff]  ;;  %v6829_v38 = vld [vmem:[#allocation7 + $0x158] sm:$0xff] }
 0x21d   :  { %4835 = vmatprep.subr.bf16.mxu0 %v4834_v28  ;;  %4875 = vmatprep.subr.bf16.mxu1 %v6610_v27  ;;  %8385 = vst [vmem:[#allocation25_spill] sm:$0xff] %v6827_v8  ;;  %8386 = vst [vmem:[#allocation58_spill] sm:$0xff] %v6829_v38  ;;  %v8387_v28 = vpack.c.bf16 %v6423_v10, %v6418_v20  ;;  %v8026_v63 = vand.u32 4294901760, %v6827_v8 }
 0x21e   :  { %2185 = vmatprep.mubr.f32.mxu0 %v2184_v51  ;;  %v8028_v51 = vand.u32 4294901760, %v6829_v38 }
 0x21f   :  { %2191 = vmatmul.mubr.f32.gmra.mrb[6].mxu0 %v2190_v6  ;;  %v8390_v6 = vpack.c.bf16 %v6453_v59, %v6448_v44 }
 0x220   :  { %4837 = vmatpush3.bf16.msra.mxu0 %v4836_v53  ;;  %4877 = vmatpush3.bf16.msra.mxu1 %v8384_v43  ;;  %v6838_v53 = vld [vmem:[#allocation7 + $0x1e0] sm:$0xff]  ;;  %v6864_v40 = vsub.f32 %v6829_v38, %v8028_v51  ;;  %v6879_v51 = vld [vmem:[#allocation7 + $0x178] sm:$0xff]  ;;  %v8415_v43 = vand.u32 4294901760, %v6867_v16 }
 0x221   :  { %2565 = vmatprep.mubr.f32.mxu0 %v2166_v30  ;;  %4839 = vmatprep.subr.bf16.mxu0 %v4838_v61  ;;  %8388 = vst [vmem:[#allocation26_spill] sm:$0xff] %v6838_v53  ;;  %v6840_v30 = vld [vmem:[#allocation7 + $0x1e8] sm:$0xff]  ;;  %v6846_v61 = vld [vmem:[#allocation7 + $0x160] sm:$0xff]  ;;  %8400 = vst [vmem:[#allocation36_spill] sm:$0xff] %v6879_v51 }
 0x222   :  { %4879 = vmatprep.subr.bf16.mxu1 %v6650_v9  ;;  %8389 = vst [vmem:[#allocation27_spill] sm:$0xff] %v6840_v30  ;;  %8391 = vst [vmem:[#allocation28_spill] sm:$0xff] %v6846_v61  ;;  %v6881_v38 = vld [vmem:[#allocation7 + $0x180] sm:$0xff]  ;;  %v8405_v9 = vpack.c.bf16 %v6546_v11, %v6536_v36 }
 0x223   :  { %8395 = vst [vmem:[#allocation31_spill] sm:$0xff] %v6864_v40 }
 0x224   :  { %4841 = vmatpush3.bf16.msra.mxu0 %v8387_v28  ;;  %4881 = vmatpush3.bf16.msra.mxu1 %v6658_v7  ;;  %v6883_v28 = vld [vmem:[#allocation7 + $0x188] sm:$0xff]  ;;  %v8403_v7 = vand.u32 4294901760, %v6840_v30 }
 0x225   :  { %4843 = vmatprep.subr.bf16.mxu0 %v8390_v6  ;;  %4883 = vmatprep.subr.bf16.mxu1 %v6680_v17  ;;  %v6859_v6 = vsub.f32 %v6827_v8, %v8026_v63  ;;  %v6877_v8 = vld [vmem:[#allocation7 + $0x170] sm:$0xff] }
 0x226   :  { %8399 = vst [vmem:[#allocation34_spill] sm:$0xff] %v6877_v8 }
 0x227   :  { %8394 = vst [vmem:[#allocation30_spill] sm:$0xff] %v6859_v6 }
 0x228   :  { %4845 = vmatpush3.bf16.msra.mxu0 %v8393_v58  ;;  %4885 = vmatpush3.bf16.msra.mxu1 %v6693_v26  ;;  %v144_v58 = vsub.s32 3, %v6759_v37  ;;  %v8401_v26 = vand.u32 4294901760, %v6838_v53 }
 0x229   :  { %4847 = vmatprep.subr.bf16.mxu0 %v8398_v13  ;;  %4887 = vmatprep.subr.bf16.mxu1 %v6715_v54  ;;  %v6893_v13 = vsub.f32 %v6840_v30, %v8403_v7  ;;  %v8409_v54 = vpack.c.bf16 %v6570_v52, %v6557_v1  ;;  %v8417_v7 = vand.u32 4294901760, %v6869_v2 }
 0x22a   :  { %v6888_v17 = vsub.f32 %v6838_v53, %v8401_v26  ;;  %v8406_v53 = vand.u32 4294901760, %v6846_v61  ;;  %v6910_v63 = vrot.slane %v6765_v39, %v144_v58  ;;  %v8412_v58 = vand.u32 4294901760, %v6859_v6 }
 0x22b   :  { %8404 = vst [vmem:[#allocation43_spill] sm:$0xff] %v6893_v13  ;;  %v8428_v6 = vand.u32 4294901760, %v6280_v12 }
 0x22c   :  { %8402 = vst [vmem:[#allocation39_spill] sm:$0xff] %v6888_v17  ;;  %4849 = vmatpush3.bf16.msra.mxu0 %v8405_v9  ;;  %4889 = vmatpush3.bf16.msra.mxu1 %v6717_v62  ;;  %v6906_v29 = vsub.f32 %v6846_v61, %v8406_v53  ;;  %8408 = vst [vmem:[#allocation48_spill] sm:$0xff] %v6910_v63  ;;  %v8410_v9 = vand.u32 4294901760, %v6848_v57  ;;  %v8413_v61 = vand.u32 4294901760, %v6864_v40  ;;  %v8420_v62 = vand.u32 4294901760, %v6877_v8 }
 0x22d   :  { %4851 = vmatprep.subr.bf16.mxu0 %v8409_v54  ;;  %4891 = vmatprep.subr.bf16.mxu1 %v6728_v48  ;;  %v6930_v54 = vld [vmem:[#allocation7 + $0x100] sm:$0xff]  ;;  %v6932_v48 = vld [vmem:[#allocation7 + $0x108] sm:$0xff]  ;;  %v6939_v53 = vsub.f32 %v6867_v16, %v8415_v43  ;;  %v8425_v40 = vand.u32 4294901760, %v6893_v13 }
 0x22e   :  { %8407 = vst [vmem:[#allocation45_spill] sm:$0xff] %v6906_v29  ;;  %v6919_v26 = vsub.f32 %v6848_v57, %v8410_v9  ;;  %v6928_v30 = vpack.c.bf16 %v8413_v61, %v8412_v58  ;;  %v6944_v57 = vsub.f32 %v6869_v2, %v8417_v7  ;;  %v8419_v61 = vpack.c.bf16 %v6597_v5, %v6592_v24  ;;  %v6950_v58 = vld [vmem:[#allocation7 + $0x190] sm:$0xff]  ;;  %v6970_v9 = vld [vmem:[#allocation7 + $0x118] sm:$0xff] }
 0x22f   :  { %8416 = vst [vmem:[#allocation13_spill] sm:$0xff] %v6939_v53  ;;  %v6956_v43 = vsub.f32 %v6877_v8, %v8420_v62  ;;  %v8422_v7 = vpack.c.bf16 %v6642_v32, %v6635_v56  ;;  %v6968_v2 = vld [vmem:[#allocation7 + $0x110] sm:$0xff]  ;;  %v8423_v62 = vand.u32 4294901760, %v6879_v51  ;;  %v8445_v12 = vand.u32 4294901760, %v6930_v54 }
 0x230   :  { %8411 = vst [vmem:[#allocation51_spill] sm:$0xff] %v6919_v26  ;;  %8414 = vst [vmem:[#allocation55_spill] sm:$0xff] %v6928_v30  ;;  %4853 = vmatpush3.bf16.msra.mxu0 %v8419_v61  ;;  %4893 = vmatpush3.bf16.msra.mxu1 %v6730_v31  ;;  %v6960_v30 = vadd.f32 %v6772_v4, %v6910_v63  ;;  %v6966_v61 = vld [vmem:[#allocation7 + $0x198] sm:$0xff]  ;;  %v8424_v4 = vand.u32 4294901760, %v6888_v17  ;;  %v8429_v63 = vand.u32 4294901760, %v6881_v38  ;;  %v8435_v32 = vld [vmem:[#allocation52_spill] sm:$0xff] }
 0x231   :  { %8418 = vst [vmem:[#allocation14_spill] sm:$0xff] %v6944_v57  ;;  %8421 = vst [vmem:[#allocation15_spill] sm:$0xff] %v6956_v43  ;;  %4855 = vmatprep.subr.bf16.mxu0 %v8422_v7  ;;  %4927 = vmatprep.subr.bf16.mxu1 %v6391_v49  ;;  %v6976_v8 = vsub.f32 %v6879_v51, %v8423_v62  ;;  %v8427_v49 = vand.u32 4294901760, %v6275_v41  ;;  %v8430_v51 = vand.u32 4294901760, %v6781_v35  ;;  %v8436_v62 = vld [vmem:[#allocation50_spill] sm:$0xff]  ;;  %v8443_v13 = vand.u32 4294901760, %v6944_v57 }
 0x232   :  { %v6982_v7 = vpack.c.bf16 %v8425_v40, %v8424_v4  ;;  %v6991_v16 = vsub.f32 %v6881_v38, %v8429_v63  ;;  %v8431_v40 = vand.u32 4294901760, %v6883_v28  ;;  %v8433_v63 = vand.u32 4294901760, %v6919_v26  ;;  %v8453_v57 = vld [vmem:[#allocation66_spill] sm:$0xff] }
 0x233   :  { %v4894_v31 = vpack.c.bf16 %v8428_v6, %v8427_v49  ;;  %2685 = vmatmul.mubr.f32.vlgmr.msra.gmra.mrb[8].mxu1 %v8430_v51  ;;  %v8432_v6 = vand.u32 4294901760, %v6906_v29  ;;  %v8438_v51 = vand.u32 4294901760, %v6802_v60  ;;  %v1969_v29 = vmul.f32 0.70710677, %v6960_v30 }
 0x234   :  { %8426 = vst [vmem:[#allocation17_spill] sm:$0xff] %v6982_v7  ;;  %v7000_v4 = vsub.f32 %v6883_v28, %v8431_v40  ;;  %v8437_v7 = vpack.c.bf16 %v8435_v32, %v8436_v62  ;;  %4929 = vmatpush3.bf16.msra.mxu1 %v6478_v14  ;;  %v8442_v40 = vand.u32 4294901760, %v6939_v53  ;;  %v7036_v14 = vsub.f32 %v6930_v54, %v8445_v12  ;;  %v8452_v12 = vld [vmem:[#allocation71_spill] sm:$0xff] }
 0x235   :  { %v7008_v49 = vpack.c.bf16 %v8433_v63, %v8432_v6  ;;  %2692 = vmatprep.mubr.f32.mxu1 %v8438_v51  ;;  %v8439_v6 = vld [vmem:[#allocation56_spill] sm:$0xff]  ;;  %v8440_v63 = vld [vmem:[#allocation54_spill] sm:$0xff]  ;;  %4931 = vmatprep.subr.bf16.mxu1 %v6509_v21  ;;  %v8446_v41 = vand.u32 4294901760, %v6932_v48  ;;  %v140_v51 = vsub.s32 2, %v6759_v37  ;;  %v8450_v21 = vand.u32 4294901760, %v6976_v8 }
 0x236   :  { %4857 = vmatpush3.bf16.msra.mxu0 %v8437_v7  ;;  %v7030_v26 = vpack.c.bf16 %v8443_v13, %v8442_v40  ;;  %v8448_v7 = vand.u32 4294901760, %v6796_v22  ;;  %v8449_v40 = vand.u32 4294901760, %v6956_v43  ;;  %v8454_v53 = vpack.c.bf16 %v8452_v12, %v8453_v57 }
 0x237   :  { %8434 = vst [vmem:[#allocation74_spill] sm:$0xff] %v7008_v49  ;;  %v8441_v49 = vpack.c.bf16 %v8439_v6, %v8440_v63  ;;  %v8456_v37 = vand.u32 4294901760, %v6308_v47  ;;  %v8457_v13 = vand.u32 4294901760, %v6950_v58  ;;  %5215 = verf.f32 %v1969_v29 }
 0x238   :  { %8444 = vst [vmem:[#allocation19_spill] sm:$0xff] %v7030_v26  ;;  %2696 = vmatmul.mubr.f32.gmra.mrb[10].mxu1 %v8448_v7  ;;  %v7051_v26 = vpack.c.bf16 %v8450_v21, %v8449_v40  ;;  %v8459_v40 = vand.u32 4294901760, %v6966_v61  ;;  %v8462_v47 = vand.u32 4294901760, %v6320_v46  ;;  %v8465_v7 = vand.u32 4294901760, %v6970_v9 }
 0x239   :  { %4859 = vmatprep.subr.bf16.mxu0 %v8441_v49  ;;  %v7041_v49 = vsub.f32 %v6932_v48, %v8446_v41  ;;  %2973 = vmatprep.mubr.f32.mxu1 %v6783_v23  ;;  %v8455_v41 = vand.u32 4294901760, %v6298_v19  ;;  %v7065_v43 = vsub.f32 %v6950_v58, %v8457_v13  ;;  %v8461_v19 = vand.u32 4294901760, %v6315_v18 }
 0x23a   :  { %8451 = vst [vmem:[#allocation76_spill] sm:$0xff] %v7051_v26  ;;  %4861 = vmatpush3.bf16.msra.mxu0 %v8454_v53  ;;  %v7070_v21 = vsub.f32 %v6966_v61, %v8459_v40  ;;  %v7072_v53 = vld [vmem:[#allocation7 + $0x1a0] sm:$0xff]  ;;  %4933 = vmatpush3.bf16.msra.mxu1 %v6525_v42  ;;  %v7087_v40 = vsub.f32 %v6970_v9, %v8465_v7  ;;  %v7089_v26 = vld [vmem:[#allocation7 + $0x1a8] sm:$0xff]  ;;  %v8069_v29 = vand.u32 4294901760, %v7036_v14  ;;  %v8467_v42 = vand.u32 4294901760, %v6329_v15 }
 0x23b   :  { %8447 = vst [vmem:[#allocation20_spill] sm:$0xff] %v7041_v49  ;;  %v4896_v17 = vpack.c.bf16 %v8456_v37, %v8455_v41  ;;  %8458 = vst [vmem:[#allocation22_spill] sm:$0xff] %v7065_v43  ;;  %4895 = vmatprep.subr.bf16.mxu0 %v4894_v31  ;;  %v4898_v41 = vpack.c.bf16 %v8462_v47, %v8461_v19  ;;  %v8463_v37 = vand.u32 4294901760, %v6968_v2  ;;  %4935 = vmatprep.subr.bf16.mxu1 %v6564_v0 }
 0x23c   :  { %8460 = vst [vmem:[#allocation23_spill] sm:$0xff] %v7070_v21  ;;  %8466 = vst [vmem:[#allocation59_spill] sm:$0xff] %v7087_v40  ;;  %v8068_v18 = vand.u32 4294901760, %v7041_v49  ;;  %v7095_v46 = vrot.slane %v6765_v39, %v140_v51  ;;  %v8468_v31 = vand.u32 4294901760, %v6343_v50  ;;  %v8469_v7 = vand.u32 4294901760, %v6991_v16  ;;  %v7113_v51 = vld [vmem:[#allocation7 + $0x120] sm:$0xff] }
 0x23d   :  { %v7082_v13 = vsub.f32 %v6968_v2, %v8463_v37  ;;  %2568 = vmatmul.mubr.f32.vlgmr.msra.gmra.mrb[8].mxu0 %v6781_v35  ;;  %v8071_v0 = vand.u32 4294901760, %v7072_v53  ;;  %v8470_v37 = vand.u32 4294901760, %v7000_v4  ;;  %v8070_v15 = vand.u32 4294901760, %v7087_v40 }
 0x23e   :  { %v4900_v19 = vpack.c.bf16 %v8468_v31, %v8467_v42  ;;  %v3230_v47 = vsub.f32 %v6991_v16, %v8469_v7  ;;  %2574 = vmatprep.mubr.f32.mxu0 %v6802_v60  ;;  %4897 = vmatpush3.bf16.msra.mxu0 %v4896_v17  ;;  %v8471_v42 = vand.u32 4294901760, %v8382_v45  ;;  %v8472_v60 = vand.u32 4294901760, %v8383_v3 }
 0x23f   :  { %8464 = vst [vmem:[#allocation81_spill] sm:$0xff] %v7082_v13  ;;  %v3237_v39 = vsub.f32 %v7000_v4, %v8470_v37  ;;  %4937 = vmatpush3.bf16.msra.mxu1 %v6578_v55  ;;  %4899 = vmatprep.subr.bf16.mxu0 %v4898_v41  ;;  %v8473_v31 = vand.u32 4294901760, %v6418_v20  ;;  %v8474_v7 = vand.u32 4294901760, %v6423_v10  ;;  %v8067_v35 = vand.u32 4294901760, %v7082_v13 }
 0x240   :  { %v4902_v17 = vpack.c.bf16 %v8472_v60, %v8471_v42  ;;  %4939 = vmatprep.subr.bf16.mxu1 %v6610_v27  ;;  %v8475_v50 = vand.u32 4294901760, %v6448_v44  ;;  %v8476_v55 = vand.u32 4294901760, %v6453_v59  ;;  %v8477_v45 = vand.u32 4294901760, %v6458_v25  ;;  %v7141_v60 = vld [vmem:[#allocation7 + $0x128] sm:$0xff]  ;;  %v8480_v59 = vld [vmem:[#allocation41_spill] sm:$0xff] }
 0x241   :  { %v4904_v37 = vpack.c.bf16 %v8474_v7, %v8473_v31  ;;  %v8478_v3 = vand.u32 4294901760, %v6463_v34  ;;  %v3118_v20 = vsub.f32 %v7036_v14, %v8069_v29  ;;  %v3125_v10 = vsub.f32 %v7041_v49, %v8068_v18  ;;  %2577 = vmatmul.mubr.f32.gmra.mrb[10].mxu0 %v6796_v22  ;;  %v5216_v29 = vpop.eup %5215  ;;  %v8533_v49 = vld [vmem:[#allocation18_spill] sm:$0xff] }
 0x242   :  { %v4906_v41 = vpack.c.bf16 %v8476_v55, %v8475_v50  ;;  %v8479_v44 = vand.u32 4294901760, %v6501_v33  ;;  %v8481_v27 = vand.u32 4294901760, %v8480_v59  ;;  %v3231_v50 = vand.u32 4294901760, %v3230_v47  ;;  %4901 = vmatpush3.bf16.msra.mxu0 %v4900_v19  ;;  %2862 = vmatprep.mubr.f32.mxu0 %v6783_v23  ;;  %v8487_v59 = vld [vmem:[#allocation42_spill] sm:$0xff] }
 0x243   :  { %v4908_v42 = vpack.c.bf16 %v8478_v3, %v8477_v45  ;;  %v7151_v34 = vsub.f32 %v7072_v53, %v8071_v0  ;;  %v8072_v31 = vand.u32 4294901760, %v7113_v51  ;;  %v3238_v7 = vand.u32 4294901760, %v3237_v39  ;;  %4941 = vmatpush3.bf16.msra.mxu1 %v8487_v59  ;;  %4903 = vmatprep.subr.bf16.mxu0 %v4902_v17  ;;  %v8496_v0 = vld [vmem:[#allocation46_spill] sm:$0xff] }
 0x244   :  { %v4910_v25 = vpack.c.bf16 %v8481_v27, %v8479_v44  ;;  %v8483_v55 = vand.u32 4294901760, %v7065_v43  ;;  %v8484_v33 = vand.u32 4294901760, %v7070_v21  ;;  %v8485_v47 = vand.u32 4294901760, %v7089_v26  ;;  %v7166_v44 = vld [vmem:[#allocation7 + $0x1b0] sm:$0xff] }
 0x245   :  { %8482 = vst [vmem:[#allocation61_spill] sm:$0xff] %v7151_v34  ;;  %v8488_v23 = vand.u32 4294901760, %v6536_v36  ;;  %v8489_v19 = vand.u32 4294901760, %v6546_v11  ;;  %v3132_v27 = vsub.f32 %v7082_v13, %v8067_v35  ;;  %v8491_v17 = vand.u32 4294901760, %v6557_v1 }
 0x246   :  { %v3244_v22 = vsub.f32 %v7065_v43, %v8483_v55  ;;  %v3251_v45 = vsub.f32 %v7070_v21, %v8484_v33  ;;  %v7164_v3 = vsub.f32 %v7089_v26, %v8485_v47  ;;  %v3139_v55 = vsub.f32 %v7087_v40, %v8070_v15  ;;  %v8490_v47 = vld [vmem:[#allocation47_spill] sm:$0xff]  ;;  %4905 = vmatpush3.bf16.msra.mxu0 %v4904_v37 }
 0x247   :  { %v7173_v39 = vpack.c.bf16 %v8489_v19, %v8488_v23  ;;  %4943 = vmatprep.subr.bf16.mxu1 %v8490_v47  ;;  %v8492_v36 = vand.u32 4294901760, %v6570_v52  ;;  %v8493_v11 = vand.u32 4294901760, %v6592_v24  ;;  %v8494_v23 = vand.u32 4294901760, %v6597_v5  ;;  %v7207_v24 = vld [vmem:[#allocation7 + $0x1b8] sm:$0xff]  ;;  %4907 = vmatprep.subr.bf16.mxu0 %v4906_v41 }
 0x248   :  { %8486 = vst [vmem:[#allocation62_spill] sm:$0xff] %v7164_v3  ;;  %v3119_v35 = vand.u32 4294901760, %v3118_v20  ;;  %v3126_v18 = vand.u32 4294901760, %v3125_v10  ;;  %v8495_v15 = vand.u32 4294901760, %v6635_v56  ;;  %v8497_v33 = vand.u32 4294901760, %v8496_v0 }
 0x249   :  { %v7187_v59 = vpack.c.bf16 %v8492_v36, %v8491_v17  ;;  %v7193_v19 = vpack.c.bf16 %v8494_v23, %v8493_v11  ;;  %v8073_v1 = vand.u32 4294901760, %v7151_v34  ;;  %v7205_v52 = vsub.f32 %v7113_v51, %v8072_v31 }
 0x24a   :  { %v7199_v47 = vpack.c.bf16 %v8497_v33, %v8495_v15  ;;  %v8074_v5 = vand.u32 4294901760, %v7166_v44  ;;  %v7210_v20 = vpack.c.bf16 %v3238_v7, %v3231_v50  ;;  %v3245_v10 = vand.u32 4294901760, %v3244_v22  ;;  %v7213_v15 = vld [vmem:[#allocation7 + $0x130] sm:$0xff]  ;;  %v8499_v33 = vld [vmem:[#allocation49_spill] sm:$0xff]  ;;  %4909 = vmatpush3.bf16.msra.mxu0 %v4908_v42 }
 0x24b   :  { %8498 = vst [vmem:[#allocation64_spill] sm:$0xff] %v7205_v52  ;;  %v3252_v56 = vand.u32 4294901760, %v3251_v45  ;;  %v8075_v0 = vand.u32 4294901760, %v7164_v3  ;;  %4945 = vmatpush3.bf16.msra.mxu1 %v8499_v33  ;;  %v8500_v17 = vand.u32 4294901760, %v8436_v62  ;;  %v8501_v36 = vand.u32 4294901760, %v8435_v32  ;;  %v7227_v7 = vld [vmem:[#allocation7 + $0x138] sm:$0xff]  ;;  %4911 = vmatprep.subr.bf16.mxu0 %v4910_v25 }
 0x24c   :  { %v3133_v23 = vand.u32 4294901760, %v3132_v27  ;;  %v3140_v31 = vand.u32 4294901760, %v3139_v55  ;;  %v8502_v37 = vand.u32 4294901760, %v7141_v60  ;;  %v1985_v22 = vadd.f32 1.0, %v5216_v29  ;;  %v8504_v45 = vld [vmem:[#allocation53_spill] sm:$0xff]  ;;  %v8513_v25 = vld [vmem:[#allocation72_spill] sm:$0xff] }
 0x24d   :  { %v7220_v11 = vpack.c.bf16 %v8501_v36, %v8500_v17  ;;  %4947 = vmatprep.subr.bf16.mxu1 %v8504_v45  ;;  %v7230_v33 = vpack.c.bf16 %v3126_v18, %v3119_v35  ;;  %v8505_v62 = vand.u32 4294901760, %v8440_v63  ;;  %v8506_v32 = vand.u32 4294901760, %v8439_v6  ;;  %v7251_v18 = vld [vmem:[#allocation7 + $0x1c0] sm:$0xff]  ;;  %v7253_v6 = vld [vmem:[#allocation7 + $0x1c8] sm:$0xff] }
 0x24e   :  { %v7225_v50 = vsub.f32 %v7141_v60, %v8502_v37  ;;  %v8076_v27 = vand.u32 4294901760, %v7207_v24  ;;  %v7242_v55 = vsub.f32 %v7151_v34, %v8073_v1  ;;  %v8077_v17 = vand.u32 4294901760, %v7205_v52  ;;  %4913 = vmatpush3.bf16.msra.mxu0 %v7173_v39 }
 0x24f   :  { %v7236_v41 = vpack.c.bf16 %v8506_v32, %v8505_v62  ;;  %v7248_v29 = vsub.f32 %v7166_v44, %v8074_v5  ;;  %v1961_v35 = vmul.f32 0.5, %v6960_v30  ;;  %v7256_v36 = vpack.c.bf16 %v3252_v56, %v3245_v10  ;;  %v8508_v62 = vld [vmem:[#allocation65_spill] sm:$0xff]  ;;  %v8517_v56 = vld [vmem:[#allocation80_spill] sm:$0xff]  ;;  %4915 = vmatprep.subr.bf16.mxu0 %v7187_v59 }
 0x250   :  { %8503 = vst [vmem:[#allocation35_spill] sm:$0xff] %v7225_v50  ;;  %v3265_v37 = vsub.f32 %v7164_v3, %v8075_v0  ;;  %v8078_v45 = vand.u32 4294901760, %v7227_v7  ;;  %4949 = vmatpush3.bf16.msra.mxu1 %v8508_v62  ;;  %v8509_v32 = vand.u32 4294901760, %v8453_v57  ;;  %v8510_v1 = vand.u32 4294901760, %v8452_v12  ;;  %v7278_v0 = vld [vmem:[#allocation7 + $0x140] sm:$0xff]  ;;  %v8525_v3 = vld [vmem:[#allocation16_spill] sm:$0xff] }
 0x251   :  { %8507 = vst [vmem:[#allocation37_spill] sm:$0xff] %v7248_v29  ;;  %v7269_v63 = vpack.c.bf16 %v3140_v31, %v3133_v23  ;;  %v8511_v30 = vand.u32 4294901760, %v6881_v38  ;;  %v8512_v42 = vand.u32 4294901760, %v6883_v28  ;;  %v1993_v62 = vmul.f32 %v1985_v22, %v1961_v35  ;;  %4951 = vmatprep.subr.bf16.mxu1 %v8513_v25  ;;  %v7288_v31 = vld [vmem:[#allocation7 + $0x148] sm:$0xff]  ;;  %v7290_v28 = vld [vmem:[#allocation7 + $0x1d0] sm:$0xff] }
 0x252   :  { %v7267_v5 = vpack.c.bf16 %v8510_v1, %v8509_v32  ;;  %v7284_v57 = vsub.f32 %v7207_v24, %v8076_v27  ;;  %v7292_v1 = vld [vmem:[#allocation7 + $0x1d8] sm:$0xff]  ;;  %v3259_v23 = vand.u32 4294901760, %v7242_v55  ;;  %v7298_v22 = vsub.f32 %v7205_v52, %v8077_v17  ;;  %v8516_v35 = vld [vmem:[#allocation48_spill] sm:$0xff]  ;;  %4917 = vmatpush3.bf16.msra.mxu0 %v7193_v19 }
 0x253   :  { %v7275_v10 = vpack.c.bf16 %v8512_v42, %v8511_v30  ;;  %v8514_v32 = vand.u32 4294901760, %v7213_v15  ;;  %v8515_v42 = vld [vmem:[#allocation12_spill] sm:$0xff]  ;;  %v3266_v27 = vand.u32 4294901760, %v3265_v37  ;;  %v7314_v55 = vsub.f32 %v7227_v7, %v8078_v45  ;;  %v8520_v45 = vld [vmem:[#allocation77_spill] sm:$0xff]  ;;  %4919 = vmatprep.subr.bf16.mxu0 %v7199_v47 }
 0x254   :  { %v7308_v25 = vadd.f32 %v8515_v42, %v7095_v46  ;;  %v7319_v38 = vadd.f32 %v8517_v56, %v8516_v35  ;;  %v7326_v12 = vand.u32 4294901760, %v1993_v62  ;;  %v8521_v52 = vand.u32 4294901760, %v7251_v18 }
 0x255   :  { %v7304_v30 = vsub.f32 %v7213_v15, %v8514_v32  ;;  %v8518_v32 = vld [vmem:[#allocation75_spill] sm:$0xff]  ;;  %v8522_v35 = vand.u32 4294901760, %v7253_v6  ;;  %v8523_v37 = vand.u32 4294901760, %v7225_v50  ;;  %v7351_v34 = vadd.f32 %v8525_v3, %v7095_v46 }
 0x256   :  { %4953 = vmatpush3.bf16.msra.mxu1 %v8518_v32  ;;  %8519 = vst [vmem:[#allocation79_spill] sm:$0xff] %v7326_v12  ;;  %v7333_v56 = vsub.f32 %v7251_v18, %v8521_v52  ;;  %v3147_v32 = vand.u32 4294901760, %v7298_v22  ;;  %v1968_v52 = vmul.f32 0.70710677, %v7308_v25  ;;  %v8528_v42 = vand.u32 4294901760, %v7288_v31  ;;  %4921 = vmatpush3.bf16.msra.mxu0 %v7220_v11 }
 0x257   :  { %4955 = vmatprep.subr.bf16.mxu1 %v8520_v45  ;;  %v7338_v59 = vsub.f32 %v7253_v6, %v8522_v35  ;;  %v3153_v39 = vsub.f32 %v7225_v50, %v8523_v37  ;;  %v8524_v45 = vand.u32 4294901760, %v7248_v29  ;;  %v8526_v35 = vand.u32 4294901760, %v7278_v0  ;;  %4923 = vmatprep.subr.bf16.mxu0 %v7236_v41 }
 0x258   :  { %v1973_v50 = vmul.f32 0.70710677, %v7319_v38  ;;  %v7366_v46 = vsub.f32 %v7288_v31, %v8528_v42  ;;  %v8529_v3 = vand.u32 4294901760, %v7290_v28  ;;  %v8530_v22 = vand.u32 4294901760, %v7292_v1 }
 0x259   :  { %v3272_v17 = vsub.f32 %v7248_v29, %v8524_v45  ;;  %v7358_v37 = vsub.f32 %v7278_v0, %v8526_v35  ;;  %v8527_v45 = vld [vmem:[#allocation78_spill] sm:$0xff]  ;;  %v7379_v29 = vsub.f32 %v1993_v62, %v7326_v12  ;;  %v8531_v47 = vand.u32 4294901760, %v7284_v57 }
 0x25a   :  { %4957 = vmatpush3.bf16.msra.mxu1 %v8527_v45  ;;  %v7371_v19 = vsub.f32 %v7290_v28, %v8529_v3  ;;  %v7376_v35 = vsub.f32 %v7292_v1, %v8530_v22  ;;  %v8099_v45 = vand.u32 4294901760, %v7333_v56  ;;  %v4998_v3 = vpack.c.bf16 %v3266_v27, %v3259_v23  ;;  %v8535_v27 = vld [vmem:[#allocation24_spill] sm:$0xff]  ;;  %4925 = vmatpush3.bf16.msra.mxu0 %v7267_v5 }
 0x25b   :  { %4991 = vmatprep.subr.bf16.mxu1 %v7210_v20  ;;  %v3279_v42 = vsub.f32 %v7284_v57, %v8531_v47  ;;  %v3154_v13 = vand.u32 4294901760, %v3153_v39  ;;  %v3273_v21 = vand.u32 4294901760, %v3272_v17  ;;  %v8532_v43 = vand.u32 4294901760, %v7304_v30  ;;  %4959 = vmatprep.subr.bf16.mxu0 %v7275_v10 }
 0x25c   :  { %5217 = verf.f32 %v1968_v52  ;;  %v1972_v62 = vmul.f32 0.70710677, %v7351_v34  ;;  %v8534_v20 = vand.u32 4294901760, %v7314_v55  ;;  %v8100_v40 = vand.u32 4294901760, %v7358_v37 }
 0x25d   :  { %v3160_v22 = vsub.f32 %v7304_v30, %v8532_v43  ;;  %2975 = vmatmul.mubr.f32.vlgmr.msra.gmra.mrb[12].mxu1 %v8533_v49  ;;  %5219 = verf.f32 %v1973_v50  ;;  %v3280_v11 = vand.u32 4294901760, %v3279_v42  ;;  %v3286_v50 = vsub.f32 %v7333_v56, %v8099_v45  ;;  %v8541_v43 = vld [vmem:[#allocation21_spill] sm:$0xff]  ;;  %2864 = vmatmul.mubr.f32.vlgmr.msra.gmra.mrb[12].mxu0 %v8533_v49 }
 0x25e   :  { %v3167_v47 = vsub.f32 %v7314_v55, %v8534_v20  ;;  %2980 = vmatprep.mubr.f32.mxu1 %v8535_v27  ;;  %4993 = vmatpush3.bf16.msra.mxu1 %v7230_v33  ;;  %v8536_v52 = vand.u32 4294901760, %v7338_v59  ;;  %v8537_v20 = vand.u32 4294901760, %v6930_v54  ;;  %v8538_v17 = vand.u32 4294901760, %v6932_v48 }
 0x25f   :  { %4995 = vmatprep.subr.bf16.mxu1 %v7256_v36  ;;  %v5000_v41 = vpack.c.bf16 %v3154_v13, %v3147_v32  ;;  %v8539_v36 = vand.u32 4294901760, %v6950_v58  ;;  %v8540_v42 = vand.u32 4294901760, %v6966_v61  ;;  %5221 = verf.f32 %v1972_v62  ;;  %2869 = vmatprep.mubr.f32.mxu0 %v8535_v27 }
 0x260   :  { %v3293_v33 = vsub.f32 %v7338_v59, %v8536_v52  ;;  %v7415_v23 = vpack.c.bf16 %v8538_v17, %v8537_v20  ;;  %v3161_v45 = vand.u32 4294901760, %v3160_v22  ;;  %v3168_v52 = vand.u32 4294901760, %v3167_v47 }
 0x261   :  { %v7421_v39 = vpack.c.bf16 %v8540_v42, %v8539_v36  ;;  %2982 = vmatmul.mubr.f32.gmra.mrb[14].mxu1 %v8541_v43  ;;  %v3174_v48 = vsub.f32 %v7358_v37, %v8100_v40  ;;  %v8542_v54 = vand.u32 4294901760, %v7366_v46  ;;  %v8543_v61 = vand.u32 4294901760, %v7371_v19  ;;  %2871 = vmatmul.mubr.f32.gmra.mrb[14].mxu0 %v8541_v43 }
 0x262   :  { %4997 = vmatpush3.bf16.msra.mxu1 %v7269_v63  ;;  %3339 = vmatprep.mubr.f32.mxu1 %v7326_v12  ;;  %v8544_v5 = vand.u32 4294901760, %v7376_v35  ;;  %v5002_v22 = vpack.c.bf16 %v3280_v11, %v3273_v21  ;;  %v8545_v63 = vand.u32 4294901760, %v7379_v29  ;;  %v3287_v47 = vand.u32 4294901760, %v3286_v50  ;;  %v8550_v50 = vld [vmem:[#allocation30_spill] sm:$0xff] }
 0x263   :  { %v3181_v58 = vsub.f32 %v7366_v46, %v8542_v54  ;;  %v3300_v13 = vsub.f32 %v7371_v19, %v8543_v61  ;;  %4999 = vmatprep.subr.bf16.mxu1 %v4998_v3  ;;  %v3294_v17 = vand.u32 4294901760, %v3293_v33  ;;  %v8546_v20 = vand.u32 4294901760, %v6968_v2  ;;  %4961 = vmatpush3.bf16.msra.mxu0 %v7415_v23  ;;  %v8552_v33 = vld [vmem:[#allocation31_spill] sm:$0xff] }
 0x264   :  { %v3307_v32 = vsub.f32 %v7376_v35, %v8544_v5  ;;  %v3086_v62 = vsub.f32 %v7379_v29, %v8545_v63  ;;  %v8547_v36 = vand.u32 4294901760, %v6970_v9  ;;  %v8548_v54 = vand.u32 4294901760, %v7072_v53  ;;  %4963 = vmatprep.subr.bf16.mxu0 %v7421_v39 }
 0x265   :  { %v8549_v61 = vand.u32 4294901760, %v7089_v26  ;;  %v5004_v21 = vpack.c.bf16 %v3168_v52, %v3161_v45  ;;  %v3175_v11 = vand.u32 4294901760, %v3174_v48  ;;  %v8551_v49 = vand.u32 4294901760, %v8550_v50 }
 0x266   :  { %v7448_v42 = vpack.c.bf16 %v8547_v36, %v8546_v20  ;;  %v8553_v9 = vand.u32 4294901760, %v8552_v33  ;;  %5001 = vmatpush3.bf16.msra.mxu1 %v5000_v41  ;;  %v3182_v26 = vand.u32 4294901760, %v3181_v58  ;;  %v3301_v53 = vand.u32 4294901760, %v3300_v13  ;;  %v8554_v20 = vld [vmem:[#allocation39_spill] sm:$0xff]  ;;  %v5218_v45 = vpop.eup %5217 }
 0x267   :  { %v7454_v3 = vpack.c.bf16 %v8549_v61, %v8548_v54  ;;  %v3188_v2 = vsub.f32 %v8550_v50, %v8551_v49  ;;  %v3308_v63 = vand.u32 4294901760, %v3307_v32  ;;  %v8555_v27 = vand.u32 4294901760, %v8554_v20  ;;  %5003 = vmatprep.subr.bf16.mxu1 %v5002_v22  ;;  %v8556_v54 = vld [vmem:[#allocation43_spill] sm:$0xff]  ;;  %v5220_v40 = vpop.eup %5219 }
 0x268   :  { %v3195_v5 = vsub.f32 %v8552_v33, %v8553_v9  ;;  %v3087_v52 = vand.u32 4294901760, %v3086_v62  ;;  %v5006_v48 = vpack.c.bf16 %v3294_v17, %v3287_v47  ;;  %v8557_v61 = vand.u32 4294901760, %v8556_v54  ;;  %4965 = vmatpush3.bf16.msra.mxu0 %v7448_v42  ;;  %v8562_v17 = vld [vmem:[#allocation45_spill] sm:$0xff] }
 0x269   :  { %v3314_v36 = vsub.f32 %v8554_v20, %v8555_v27  ;;  %v8558_v41 = vand.u32 4294901760, %v7113_v51  ;;  %v8559_v58 = vand.u32 4294901760, %v7141_v60  ;;  %v8560_v32 = vand.u32 4294901760, %v7166_v44  ;;  %v8564_v51 = vld [vmem:[#allocation51_spill] sm:$0xff]  ;;  %4967 = vmatprep.subr.bf16.mxu0 %v7454_v3 }
 0x26a   :  { %v3321_v49 = vsub.f32 %v8556_v54, %v8557_v61  ;;  %v8561_v9 = vand.u32 4294901760, %v7207_v24  ;;  %3088 = vmatprep.mubr.f32.mxu0 %v3087_v52  ;;  %v3189_v62 = vand.u32 4294901760, %v3188_v2  ;;  %v3196_v47 = vand.u32 4294901760, %v3195_v5  ;;  %5005 = vmatpush3.bf16.msra.mxu1 %v5004_v21  ;;  %v8566_v5 = vld [vmem:[#allocation13_spill] sm:$0xff] }
 0x26b   :  { %v7476_v13 = vpack.c.bf16 %v8559_v58, %v8558_v41  ;;  %v8563_v27 = vand.u32 4294901760, %v8562_v17  ;;  %v8565_v61 = vand.u32 4294901760, %v8564_v51  ;;  %v1984_v41 = vadd.f32 1.0, %v5218_v45  ;;  %5007 = vmatprep.subr.bf16.mxu1 %v5006_v48 }
 0x26c   :  { %v7482_v22 = vpack.c.bf16 %v8561_v9, %v8560_v32  ;;  %v5008_v44 = vpack.c.bf16 %v3182_v26, %v3175_v11  ;;  %v5010_v24 = vpack.c.bf16 %v3308_v63, %v3301_v53  ;;  %v3315_v58 = vand.u32 4294901760, %v3314_v36  ;;  %v5222_v32 = vpop.eup %5221 }
 0x26d   :  { %v3202_v43 = vsub.f32 %v8562_v17, %v8563_v27  ;;  %v3209_v60 = vsub.f32 %v8564_v51, %v8565_v61  ;;  %v1989_v9 = vadd.f32 1.0, %v5220_v40  ;;  %v3322_v2 = vand.u32 4294901760, %v3321_v49  ;;  %v8568_v27 = vld [vmem:[#allocation14_spill] sm:$0xff]  ;;  %4969 = vmatpush3.bf16.msra.mxu0 %v7476_v13 }
 0x26e   :  { %v8567_v52 = vand.u32 4294901760, %v8566_v5  ;;  %v8569_v17 = vand.u32 4294901760, %v8568_v27  ;;  %v1960_v45 = vmul.f32 0.5, %v7308_v25  ;;  %v8570_v21 = vand.u32 4294901760, %v7213_v15  ;;  %5009 = vmatpush3.bf16.msra.mxu1 %v5008_v44  ;;  %4971 = vmatprep.subr.bf16.mxu0 %v7482_v22  ;;  %v8574_v15 = vld [vmem:[#allocation15_spill] sm:$0xff] }
 0x26f   :  { %v8571_v11 = vand.u32 4294901760, %v7227_v7  ;;  %v8572_v40 = vand.u32 4294901760, %v7251_v18  ;;  %v8573_v53 = vand.u32 4294901760, %v7253_v6  ;;  %v1965_v36 = vmul.f32 0.5, %v7319_v38  ;;  %5011 = vmatprep.subr.bf16.mxu1 %v5010_v24 }
 0x270   :  { %v3328_v12 = vsub.f32 %v8566_v5, %v8567_v52  ;;  %v3335_v54 = vsub.f32 %v8568_v27, %v8569_v17  ;;  %v5012_v48 = vpack.c.bf16 %v3196_v47, %v3189_v62  ;;  %v3203_v49 = vand.u32 4294901760, %v3202_v43 }
 0x271   :  { %v7503_v26 = vpack.c.bf16 %v8571_v11, %v8570_v21  ;;  %v7509_v63 = vpack.c.bf16 %v8573_v53, %v8572_v40  ;;  %v3210_v17 = vand.u32 4294901760, %v3209_v60  ;;  %v1992_v25 = vmul.f32 %v1984_v41, %v1960_v45 }
 0x272   :  { %v1988_v61 = vadd.f32 1.0, %v5222_v32  ;;  %v8575_v7 = vand.u32 4294901760, %v8574_v15  ;;  %v8576_v6 = vand.u32 4294901760, %v6976_v8  ;;  %v1997_v21 = vmul.f32 %v1989_v9, %v1965_v36  ;;  %5013 = vmatpush3.bf16.msra.mxu1 %v5012_v48 }
 0x273   :  { %v5014_v38 = vpack.c.bf16 %v3322_v2, %v3315_v58  ;;  %v3329_v11 = vand.u32 4294901760, %v3328_v12  ;;  %v3336_v62 = vand.u32 4294901760, %v3335_v54  ;;  %v1964_v47 = vmul.f32 0.5, %v7351_v34  ;;  %4973 = vmatpush3.bf16.msra.mxu0 %v7503_v26  ;;  %v8581_v58 = vld [vmem:[#allocation25_spill] sm:$0xff]  ;;  %v8583_v2 = vld [vmem:[#allocation58_spill] sm:$0xff] }
 0x274   :  { %v3216_v18 = vsub.f32 %v8574_v15, %v8575_v7  ;;  %v3223_v52 = vsub.f32 %v6976_v8, %v8576_v6  ;;  %v8577_v43 = vand.u32 4294901760, %v7278_v0  ;;  %v8578_v60 = vand.u32 4294901760, %v7288_v31  ;;  %4975 = vmatprep.subr.bf16.mxu0 %v7509_v63 }
 0x275   :  { %v5016_v44 = vpack.c.bf16 %v3210_v17, %v3203_v49  ;;  %v8579_v32 = vand.u32 4294901760, %v7290_v28  ;;  %v8580_v45 = vand.u32 4294901760, %v7292_v1  ;;  %v7534_v24 = vand.u32 4294901760, %v1992_v25  ;;  %5015 = vmatprep.subr.bf16.mxu1 %v5014_v38  ;;  %v8585_v49 = vld [vmem:[#allocation26_spill] sm:$0xff]  ;;  %v8591_v38 = vld [vmem:[#allocation29_spill] sm:$0xff] }
 0x276   :  { %v7526_v41 = vpack.c.bf16 %v8578_v60, %v8577_v43  ;;  %v1996_v12 = vmul.f32 %v1988_v61, %v1964_v47  ;;  %v3217_v34 = vand.u32 4294901760, %v3216_v18  ;;  %v3224_v54 = vand.u32 4294901760, %v3223_v52  ;;  %v8587_v61 = vld [vmem:[#allocation27_spill] sm:$0xff] }
 0x277   :  { %v7532_v9 = vpack.c.bf16 %v8580_v45, %v8579_v32  ;;  %v7537_v0 = vand.u32 4294901760, %v1997_v21  ;;  %v5018_v31 = vpack.c.bf16 %v3336_v62, %v3329_v11  ;;  %v8582_v28 = vand.u32 4294901760, %v8581_v58  ;;  %5017 = vmatpush3.bf16.msra.mxu1 %v5016_v44  ;;  %v8595_v44 = vld [vmem:[#allocation33_spill] sm:$0xff] }
 0x278   :  { %4977 = vmatpush3.bf16.msra.mxu0 %v7526_v41  ;;  %v8584_v1 = vand.u32 4294901760, %v8583_v2  ;;  %v7547_v53 = vsub.f32 %v1992_v25, %v7534_v24  ;;  %v7549_v36 = vand.u32 4294901760, %v1996_v12  ;;  %v5020_v48 = vpack.c.bf16 %v3224_v54, %v3217_v34  ;;  %v8589_v25 = vld [vmem:[#allocation28_spill] sm:$0xff]  ;;  %v8597_v54 = vld [vmem:[#allocation34_spill] sm:$0xff] }
 0x279   :  { %4979 = vmatprep.subr.bf16.mxu0 %v7532_v9  ;;  %v8586_v17 = vand.u32 4294901760, %v8585_v49  ;;  %v8588_v7 = vand.u32 4294901760, %v8587_v61  ;;  %v7559_v6 = vsub.f32 %v1997_v21, %v7537_v0  ;;  %5019 = vmatprep.subr.bf16.mxu1 %v5018_v31  ;;  %v8590_v52 = vand.u32 4294901760, %v8589_v25  ;;  %v8593_v21 = vld [vmem:[#allocation32_spill] sm:$0xff] }
 0x27a   :  { %v7544_v40 = vpack.c.bf16 %v8584_v1, %v8582_v28  ;;  %v8592_v11 = vand.u32 4294901760, %v8591_v38  ;;  %v3091_v47 = vand.u32 4294901760, %v7547_v53  ;;  %v7570_v43 = vsub.f32 %v1996_v12, %v7549_v36  ;;  %v8599_v31 = vld [vmem:[#allocation36_spill] sm:$0xff]  ;;  %v8603_v38 = vld [vmem:[#allocation22_spill] sm:$0xff] }
 0x27b   :  { %v7556_v18 = vpack.c.bf16 %v8588_v7, %v8586_v17  ;;  %5021 = vmatpush3.bf16.msra.mxu1 %v5020_v48  ;;  %v8594_v60 = vand.u32 4294901760, %v8593_v21  ;;  %v8596_v32 = vand.u32 4294901760, %v8595_v44  ;;  %v3100_v34 = vand.u32 4294901760, %v7559_v6  ;;  %v8601_v17 = vld [vmem:[#allocation20_spill] sm:$0xff]  ;;  %v8605_v44 = vld [vmem:[#allocation81_spill] sm:$0xff] }
 0x27c   :  { %4981 = vmatpush3.bf16.msra.mxu0 %v7544_v40  ;;  %v7566_v62 = vpack.c.bf16 %v8592_v11, %v8590_v52  ;;  %5055 = vmatprep.subr.bf16.mxu1 %v7275_v10  ;;  %v8598_v12 = vand.u32 4294901760, %v8597_v54  ;;  %v8600_v58 = vand.u32 4294901760, %v8599_v31  ;;  %v3092_v2 = vsub.f32 %v7547_v53, %v3091_v47  ;;  %v8604_v11 = vld [vmem:[#allocation23_spill] sm:$0xff]  ;;  %v8607_v31 = vld [vmem:[#allocation61_spill] sm:$0xff] }
 0x27d   :  { %4983 = vmatprep.subr.bf16.mxu0 %v7556_v18  ;;  %v7578_v45 = vpack.c.bf16 %v8596_v32, %v8594_v60  ;;  %v3106_v1 = vand.u32 4294901760, %v7570_v43  ;;  %v5022_v48 = vpack.c.bf16 %v7000_v4, %v6991_v16  ;;  %v3101_v49 = vsub.f32 %v7559_v6, %v3100_v34  ;;  %v8606_v32 = vld [vmem:[#allocation59_spill] sm:$0xff] }
 0x27e   :  { %3341 = vmatmul.mubr.f32.vlgmr.msra.gmra.mrb[16].mxu1 %v7534_v24  ;;  %v7587_v28 = vpack.c.bf16 %v8600_v58, %v8598_v12  ;;  %v5024_v61 = vpack.c.bf16 %v8601_v17, %v7036_v14  ;;  %v3093_v7 = vand.u32 4294901760, %v3092_v2  ;;  %v8602_v25 = vand.u32 4294901760, %v7379_v29  ;;  %v8608_v58 = vld [vmem:[#allocation62_spill] sm:$0xff] }
 0x27f   :  { %3346 = vmatprep.mubr.f32.mxu1 %v7537_v0  ;;  %5057 = vmatpush3.bf16.msra.mxu1 %v7415_v23  ;;  %v3107_v52 = vsub.f32 %v7570_v43, %v3106_v1  ;;  %v5026_v21 = vpack.c.bf16 %v8604_v11, %v8603_v38  ;;  %v3102_v60 = vand.u32 4294901760, %v3101_v49  ;;  %v5028_v54 = vpack.c.bf16 %v8606_v32, %v8605_v44  ;;  %v8610_v49 = vld [vmem:[#allocation35_spill] sm:$0xff] }
 0x280   :  { %4985 = vmatpush3.bf16.msra.mxu0 %v7566_v62  ;;  %5059 = vmatprep.subr.bf16.mxu1 %v7421_v39  ;;  %v5030_v2 = vpack.c.bf16 %v8608_v58, %v8607_v31 }
 0x281   :  { %4987 = vmatprep.subr.bf16.mxu0 %v7578_v45  ;;  %v3108_v12 = vand.u32 4294901760, %v3107_v52  ;;  %v5036_v52 = vpack.c.bf16 %v7314_v55, %v7304_v30 }
 0x282   :  { %3348 = vmatmul.mubr.f32.gmra.mrb[18].mxu1 %v7549_v36 }
 0x283   :  { %5061 = vmatpush3.bf16.msra.mxu1 %v7448_v42  ;;  %3599 = vmatprep.mubr.f32.mxu1 %v8602_v25 }
 0x284   :  { %4989 = vmatpush3.bf16.msra.mxu0 %v7587_v28  ;;  %5063 = vmatprep.subr.bf16.mxu1 %v7454_v3 }
 0x285   :  { %5023 = vmatprep.subr.bf16.mxu0 %v5022_v48  ;;  %v8609_v48 = vld [vmem:[#allocation64_spill] sm:$0xff] }
 0x287   :  { %3094 = vmatmul.mubr.f32.vlgmr.msra.gmra.mrb[16].mxu0 %v3093_v7  ;;  %5065 = vmatpush3.bf16.msra.mxu1 %v7476_v13  ;;  %v5032_v7 = vpack.c.bf16 %v8610_v49, %v8609_v48 }
 0x288   :  { %3103 = vmatprep.mubr.f32.mxu0 %v3102_v60  ;;  %5025 = vmatpush3.bf16.msra.mxu0 %v5024_v61  ;;  %v8611_v61 = vld [vmem:[#allocation37_spill] sm:$0xff]  ;;  %v5042_v60 = vpack.c.bf16 %v7376_v35, %v7371_v19 }
 0x289   :  { %5027 = vmatprep.subr.bf16.mxu0 %v5026_v21  ;;  %5067 = vmatprep.subr.bf16.mxu1 %v7482_v22  ;;  %v5034_v25 = vpack.c.bf16 %v7284_v57, %v8611_v61  ;;  %v5040_v21 = vpack.c.bf16 %v7366_v46, %v7358_v37 }
 0x28b   :  { %3109 = vmatmul.mubr.f32.gmra.mrb[18].mxu0 %v3108_v12  ;;  %5069 = vmatpush3.bf16.msra.mxu1 %v7503_v26  ;;  %v8612_v12 = vld [vmem:[#allocation43_spill] sm:$0xff] }
 0x28c   :  { %5029 = vmatpush3.bf16.msra.mxu0 %v5028_v54  ;;  %3483 = vmatprep.mubr.f32.mxu0 %v7379_v29  ;;  %v5038_v29 = vpack.c.bf16 %v7338_v59, %v7333_v56  ;;  %v5044_v54 = vpack.c.bf16 %v8552_v33, %v8550_v50  ;;  %v5050_v50 = vpack.c.bf16 %v8568_v27, %v8566_v5  ;;  %v8616_v5 = vand.u32 4294901760, %v7036_v14 }
 0x28d   :  { %5031 = vmatprep.subr.bf16.mxu0 %v5030_v2  ;;  %5071 = vmatprep.subr.bf16.mxu1 %v7509_v63  ;;  %v5046_v2 = vpack.c.bf16 %v8612_v12, %v8554_v20  ;;  %v5052_v33 = vpack.c.bf16 %v6976_v8, %v8574_v15  ;;  %v8615_v20 = vand.u32 4294901760, %v7000_v4  ;;  %v8617_v8 = vand.u32 4294901760, %v8601_v17 }
 0x28e   :  { %v8621_v4 = vand.u32 4294901760, %v8605_v44  ;;  %v8622_v14 = vand.u32 4294901760, %v8606_v32  ;;  %v8628_v17 = vand.u32 4294901760, %v7284_v57  ;;  %v8631_v44 = vand.u32 4294901760, %v7333_v56  ;;  %v8637_v56 = vld [vmem:[#allocation55_spill] sm:$0xff] }
 0x28f   :  { %5073 = vmatpush3.bf16.msra.mxu1 %v7526_v41  ;;  %v5088_v27 = vpack.c.bf16 %v8617_v8, %v8616_v5  ;;  %v8633_v57 = vand.u32 4294901760, %v7358_v37  ;;  %v8639_v37 = vld [vmem:[#allocation74_spill] sm:$0xff] }
 0x290   :  { %5033 = vmatpush3.bf16.msra.mxu0 %v5032_v7  ;;  %5075 = vmatprep.subr.bf16.mxu1 %v7532_v9  ;;  %v8613_v7 = vld [vmem:[#allocation45_spill] sm:$0xff] }
 0x291   :  { %5035 = vmatprep.subr.bf16.mxu0 %v5034_v25  ;;  %v5048_v25 = vpack.c.bf16 %v8564_v51, %v8613_v7 }
 0x293   :  { %5077 = vmatpush3.bf16.msra.mxu1 %v7544_v40 }
 0x294   :  { %5037 = vmatpush3.bf16.msra.mxu0 %v5036_v52  ;;  %5079 = vmatprep.subr.bf16.mxu1 %v7556_v18 }
 0x295   :  { %5039 = vmatprep.subr.bf16.mxu0 %v5038_v29 }
 0x297   :  { %5081 = vmatpush3.bf16.msra.mxu1 %v7566_v62 }
 0x298   :  { %5041 = vmatpush3.bf16.msra.mxu0 %v5040_v21  ;;  %5083 = vmatprep.subr.bf16.mxu1 %v7578_v45 }
 0x299   :  { %5043 = vmatprep.subr.bf16.mxu0 %v5042_v60 }
 0x29b   :  { %5085 = vmatpush3.bf16.msra.mxu1 %v7587_v28 }
 0x29c   :  { %5045 = vmatpush3.bf16.msra.mxu0 %v5044_v54  ;;  %5119 = vmatprep.subr.bf16.mxu1 %v7275_v10  ;;  %v8614_v10 = vand.u32 4294901760, %v6991_v16  ;;  %v8620_v16 = vand.u32 4294901760, %v8604_v11 }
 0x29d   :  { %5047 = vmatprep.subr.bf16.mxu0 %v5046_v2 }
 0x29e   :  { %3603 = vmatmul.mubr.f32.vlgmr.msra.gmra.mrb[20].mxu1 %v3091_v47  ;;  %v5086_v51 = vpack.c.bf16 %v8615_v20, %v8614_v10  ;;  %v8623_v47 = vand.u32 4294901760, %v8607_v31 }
 0x29f   :  { %3610 = vmatprep.mubr.f32.mxu1 %v3100_v34  ;;  %5121 = vmatpush3.bf16.msra.mxu1 %v7415_v23  ;;  %v8618_v23 = vld [vmem:[#allocation79_spill] sm:$0xff]  ;;  %v8624_v34 = vand.u32 4294901760, %v8608_v58  ;;  %v3925_v58 = vld [vmem:[%s7757_s4] ss:$0 sm:$0xff]  ;;  %s5325_s4 = smov [#allocation8]  }
 0x2a0   :  { %5049 = vmatpush3.bf16.msra.mxu0 %v5048_v25  ;;  %5123 = vmatprep.subr.bf16.mxu1 %v7421_v39  ;;  %v8619_v39 = vand.u32 4294901760, %v8603_v38  ;;  %s3912_s8 = sshll.u32 %s5325_s4, 4  ;;  %s3913_s8 = int_to_ptr.vmem [resolvable:$true] %s3912_s8 }
 0x2a1   :  { %5051 = vmatprep.subr.bf16.mxu0 %v5050_v50  ;;  %s5289_s9 = scalar_lea.vmem %s3913_s8, 256  ;;  %p5294_p11 = scmp.lt.s32.totalorder %s3913_s8, %s3913_s8 }
 0x2a2   :  { %3614 = vmatmul.mubr.f32.gmra.mrb[22].mxu1 %v3106_v1  ;;  %v5090_v15 = vpack.c.bf16 %v8620_v16, %v8619_v39  ;;  %v5094_v1 = vpack.c.bf16 %v8624_v34, %v8623_v47  ;;  %p5290_p10 = scmp.ne.s32.totalorder %s3913_s8, %s5289_s9  ;;  %p5295_p12 = scmp.lt.s32.totalorder %s5289_s9, %s5289_s9 }
 0x2a3   :  { %5125 = vmatpush3.bf16.msra.mxu1 %v7448_v42  ;;  %3891 = vmatprep.mubr.f32.mxu1 %v8618_v23  ;;  %v5092_v42 = vpack.c.bf16 %v8622_v14, %v8621_v4 }
 0x2a4   :  { %5053 = vmatpush3.bf16.msra.mxu0 %v5052_v33  ;;  %5127 = vmatprep.subr.bf16.mxu1 %v7454_v3  ;;  %v8625_v3 = vand.u32 4294901760, %v8609_v48  ;;  %p5296_p13 = por %p5295_p12, %p5294_p11 }
 0x2a5   :  { %5087 = vmatprep.subr.bf16.mxu0 %v5086_v51 }
 0x2a6   :  { %p5297_p0 = pnand %p5296_p13, %p5290_p10 }
 0x2a7   :  { %3486 = vmatmul.mubr.f32.vlgmr.msra.gmra.mrb[20].mxu0 %v7547_v53  ;;  %5129 = vmatpush3.bf16.msra.mxu1 %v7476_v13  ;;  %v8626_v53 = vand.u32 4294901760, %v8610_v49  ;;  %v8627_v13 = vand.u32 4294901760, %v8611_v61 }
 0x2a8   :  { %3492 = vmatprep.mubr.f32.mxu0 %v7559_v6  ;;  %5089 = vmatpush3.bf16.msra.mxu0 %v5088_v27 }
 0x2a9   :  { %5091 = vmatprep.subr.bf16.mxu0 %v5090_v15  ;;  %5131 = vmatprep.subr.bf16.mxu1 %v7482_v22  ;;  %v5096_v6 = vpack.c.bf16 %v8626_v53, %v8625_v3  ;;  %v5098_v38 = vpack.c.bf16 %v8628_v17, %v8627_v13  ;;  %v8629_v22 = vand.u32 4294901760, %v7304_v30  ;;  %v8635_v30 = vand.u32 4294901760, %v7371_v19  ;;  %v8641_v19 = vld [vmem:[#allocation76_spill] sm:$0xff] }
 0x2ab   :  { %3495 = vmatmul.mubr.f32.gmra.mrb[22].mxu0 %v7570_v43  ;;  %5133 = vmatpush3.bf16.msra.mxu1 %v7503_v26  ;;  %v8630_v43 = vand.u32 4294901760, %v7314_v55  ;;  %v8632_v26 = vand.u32 4294901760, %v7338_v59  ;;  %v8636_v55 = vand.u32 4294901760, %v7376_v35  ;;  %v8638_v59 = vld [vmem:[#allocation17_spill] sm:$0xff] }
 0x2ac   :  { %5093 = vmatpush3.bf16.msra.mxu0 %v5092_v42  ;;  %3780 = vmatprep.mubr.f32.mxu0 %v8618_v23 }
 0x2ad   :  { %5095 = vmatprep.subr.bf16.mxu0 %v5094_v1  ;;  %5135 = vmatprep.subr.bf16.mxu1 %v7509_v63  ;;  %v5100_v11 = vpack.c.bf16 %v8630_v43, %v8629_v22  ;;  %v5102_v32 = vpack.c.bf16 %v8632_v26, %v8631_v44  ;;  %v8634_v63 = vand.u32 4294901760, %v7366_v46  ;;  %v8640_v46 = vld [vmem:[#allocation19_spill] sm:$0xff] }
 0x2af   :  { %5137 = vmatpush3.bf16.msra.mxu1 %v7526_v41  ;;  %v5104_v31 = vpack.c.bf16 %v8634_v63, %v8633_v57  ;;  %v5106_v41 = vpack.c.bf16 %v8636_v55, %v8635_v30 }
 0x2b0   :  { %5097 = vmatpush3.bf16.msra.mxu0 %v5096_v6  ;;  %5139 = vmatprep.subr.bf16.mxu1 %v7532_v9 }
 0x2b1   :  { %5099 = vmatprep.subr.bf16.mxu0 %v5098_v38 }
 0x2b3   :  { %5141 = vmatpush3.bf16.msra.mxu1 %v7544_v40 }
 0x2b4   :  { %5101 = vmatpush3.bf16.msra.mxu0 %v5100_v11  ;;  %5143 = vmatprep.subr.bf16.mxu1 %v7556_v18 }
 0x2b5   :  { %5103 = vmatprep.subr.bf16.mxu0 %v5102_v32 }
 0x2b7   :  { %5145 = vmatpush3.bf16.msra.mxu1 %v7566_v62 }
 0x2b8   :  { %5105 = vmatpush3.bf16.msra.mxu0 %v5104_v31  ;;  %5147 = vmatprep.subr.bf16.mxu1 %v7578_v45 }
 0x2b9   :  { %5107 = vmatprep.subr.bf16.mxu0 %v5106_v41 }
 0x2bb   :  { %5149 = vmatpush3.bf16.msra.mxu1 %v7587_v28 }
 0x2bc   :  { %5109 = vmatpush3.bf16.msra.mxu0 %v8637_v56 }
 0x2bd   :  { %5111 = vmatprep.subr.bf16.mxu0 %v8638_v59 }
 0x2be   :  { %3893 = vmatmul.mubr.f32.vlgmr.msra.gmra.mrb[24].mxu1 %v7534_v24 }
 0x2bf   :  { %3898 = vmatprep.mubr.f32.mxu1 %v7537_v0 }
 0x2c0   :  { %5113 = vmatpush3.bf16.msra.mxu0 %v8639_v37 }
 0x2c1   :  { %5115 = vmatprep.subr.bf16.mxu0 %v8640_v46 }
 0x2c2   :  { %3900 = vmatmul.mubr.f32.gmra.mrb[26].mxu1 %v7549_v36 }
 0x2c4   :  { %5117 = vmatpush3.bf16.msra.mxu0 %v8641_v19 }
 0x2c7   :  { %3782 = vmatmul.mubr.f32.vlgmr.msra.gmra.mrb[24].mxu0 %v7534_v24 }
 0x2c8   :  { %3787 = vmatprep.mubr.f32.mxu0 %v7537_v0 }
 0x2cb   :  { %3789 = vmatmul.mubr.f32.gmra.mrb[26].mxu0 %v7549_v36 }
 0x2e6   :  { %v3996_v35 = vpop.f32.mrb[4].mxu1 }
 0x2e7   :  { %v3997_v9 = vpop.f32.mrb[5].mxu1 }
 0x2e8   :  { %v3998_v40 = vadd.f32 %v3997_v9, %v3996_v35 }
 0x2ea   :  { %v3999_v18 = vpop.f32.mrb[6].mxu1 }
 0x2eb   :  { %v4000_v62 = vpop.f32.mrb[7].mxu1 }
 0x2ec   :  { %v4001_v45 = vadd.f32 %v4000_v62, %v3999_v18 }
 0x2ee   :  { %v3958_v28 = vpop.f32.mrb[4].mxu0 }
 0x2ef   :  { %v3959_v48 = vpop.f32.mrb[5].mxu0 }
 0x2f0   :  { %v3960_v49 = vadd.f32 %v3959_v48, %v3958_v28 }
 0x2f2   :  { %v2178_v61 = vadd.f32 %v3960_v49, %v3925_v58  ;;  %v3961_v52 = vpop.f32.mrb[6].mxu0 }
 0x2f3   :  { %v3962_v24 = vpop.f32.mrb[7].mxu0 }
 0x2f4   :  { %v2425_v29 = vadd.f32 %v3998_v40, %v2178_v61  ;;  %v3963_v0 = vadd.f32 %v3962_v24, %v3961_v52 }
 0x2f6   :  { %v2193_v21 = vadd.f32 %v3963_v0, %v3925_v58 }
 0x2f8   :  { %v2432_v36 = vadd.f32 %v4001_v45, %v2193_v21 }
 0x306   :  { %v4072_v60 = vpop.f32.mrb[8].mxu1 }
 0x307   :  { %v4073_v54 = vpop.f32.mrb[9].mxu1 }
 0x308   :  { %v4074_v12 = vadd.f32 %v4073_v54, %v4072_v60 }
 0x30b   :  { %v4075_v2 = vpop.f32.mrb[10].mxu1 }
 0x30c   :  { %v4076_v7 = vpop.f32.mrb[11].mxu1 }
 0x30d   :  { %v4077_v25 = vadd.f32 %v4076_v7, %v4075_v2 }
 0x310   :  { %v4034_v50 = vpop.f32.mrb[8].mxu0 }
 0x311   :  { %v4035_v33 = vpop.f32.mrb[9].mxu0 }
 0x312   :  { %v4036_v10 = vadd.f32 %v4035_v33, %v4034_v50 }
 0x314   :  { %v2570_v20 = vadd.f32 %v4036_v10, %v2425_v29  ;;  %v4037_v51 = vpop.f32.mrb[10].mxu0 }
 0x315   :  { %v4038_v5 = vpop.f32.mrb[11].mxu0 }
 0x316   :  { %v4039_v8 = vadd.f32 %v4038_v5, %v4037_v51  ;;  %v2687_v27 = vadd.f32 %v4074_v12, %v2570_v20 }
 0x318   :  { %v2579_v23 = vadd.f32 %v4039_v8, %v2432_v36 }
 0x31a   :  { %v2698_v39 = vadd.f32 %v4077_v25, %v2579_v23 }
 0x330   :  { %v4148_v16 = vpop.f32.mrb[12].mxu1  ;;  %v4110_v34 = vpop.f32.mrb[12].mxu0 }
 0x331   :  { %v4149_v15 = vpop.f32.mrb[13].mxu1  ;;  %v4111_v1 = vpop.f32.mrb[13].mxu0 }
 0x332   :  { %v4150_v4 = vadd.f32 %v4149_v15, %v4148_v16  ;;  %v4112_v3 = vadd.f32 %v4111_v1, %v4110_v34 }
 0x334   :  { %v4151_v14 = vpop.f32.mrb[14].mxu1  ;;  %v2866_v53 = vadd.f32 %v4112_v3, %v2687_v27  ;;  %v4113_v6 = vpop.f32.mrb[14].mxu0 }
 0x335   :  { %v4152_v42 = vpop.f32.mrb[15].mxu1  ;;  %v4114_v13 = vpop.f32.mrb[15].mxu0 }
 0x336   :  { %v4153_v47 = vadd.f32 %v4152_v42, %v4151_v14  ;;  %v4115_v17 = vadd.f32 %v4114_v13, %v4113_v6  ;;  %v2977_v38 = vadd.f32 %v4150_v4, %v2866_v53 }
 0x338   :  { %v2873_v22 = vadd.f32 %v4115_v17, %v2698_v39 }
 0x33a   :  { %v2984_v43 = vadd.f32 %v4153_v47, %v2873_v22 }
 0x351   :  { %v4224_v11 = vpop.f32.mrb[16].mxu1 }
 0x352   :  { %v4225_v44 = vpop.f32.mrb[17].mxu1 }
 0x353   :  { %v4226_v26 = vadd.f32 %v4225_v44, %v4224_v11 }
 0x355   :  { %v4227_v32 = vpop.f32.mrb[18].mxu1 }
 0x356   :  { %v4228_v57 = vpop.f32.mrb[19].mxu1 }
 0x357   :  { %v4229_v63 = vadd.f32 %v4228_v57, %v4227_v32 }
 0x35a   :  { %v4186_v31 = vpop.f32.mrb[16].mxu0 }
 0x35b   :  { %v4187_v30 = vpop.f32.mrb[17].mxu0 }
 0x35c   :  { %v4188_v55 = vadd.f32 %v4187_v30, %v4186_v31 }
 0x35e   :  { %v3096_v41 = vadd.f32 %v4188_v55, %v2977_v38  ;;  %v4189_v56 = vpop.f32.mrb[18].mxu0 }
 0x35f   :  { %v4190_v59 = vpop.f32.mrb[19].mxu0 }
 0x360   :  { %v4191_v37 = vadd.f32 %v4190_v59, %v4189_v56  ;;  %v3343_v46 = vadd.f32 %v4226_v26, %v3096_v41 }
 0x362   :  { %v3111_v19 = vadd.f32 %v4191_v37, %v2984_v43 }
 0x364   :  { %v3350_v35 = vadd.f32 %v4229_v63, %v3111_v19 }
 0x371   :  { %v4300_v9 = vpop.f32.mrb[20].mxu1 }
 0x372   :  { %v4301_v40 = vpop.f32.mrb[21].mxu1 }
 0x373   :  { %v4302_v18 = vadd.f32 %v4301_v40, %v4300_v9 }
 0x375   :  { %v4303_v62 = vpop.f32.mrb[22].mxu1 }
 0x376   :  { %v4304_v45 = vpop.f32.mrb[23].mxu1 }
 0x377   :  { %v4305_v28 = vadd.f32 %v4304_v45, %v4303_v62 }
 0x37a   :  { %v4262_v58 = vpop.f32.mrb[20].mxu0 }
 0x37b   :  { %v4263_v48 = vpop.f32.mrb[21].mxu0 }
 0x37c   :  { %v4264_v49 = vadd.f32 %v4263_v48, %v4262_v58 }
 0x37e   :  { %v3488_v61 = vadd.f32 %v4264_v49, %v3343_v46  ;;  %v4265_v52 = vpop.f32.mrb[22].mxu0 }
 0x37f   :  { %v4266_v24 = vpop.f32.mrb[23].mxu0 }
 0x380   :  { %v4267_v29 = vadd.f32 %v4266_v24, %v4265_v52  ;;  %v3605_v0 = vadd.f32 %v4302_v18, %v3488_v61 }
 0x382   :  { %v3497_v21 = vadd.f32 %v4267_v29, %v3350_v35 }
 0x384   :  { %v3616_v36 = vadd.f32 %v4305_v28, %v3497_v21 }
 0x391   :  { %v4376_v60 = vpop.f32.mrb[24].mxu1 }
 0x392   :  { %v4377_v54 = vpop.f32.mrb[25].mxu1 }
 0x393   :  { %v4378_v12 = vadd.f32 %v4377_v54, %v4376_v60 }
 0x395   :  { %v4379_v2 = vpop.f32.mrb[26].mxu1 }
 0x396   :  { %v4380_v7 = vpop.f32.mrb[27].mxu1 }
 0x397   :  { %v4381_v25 = vadd.f32 %v4380_v7, %v4379_v2 }
 0x39a   :  { %v4338_v50 = vpop.f32.mrb[24].mxu0 }
 0x39b   :  { %v4339_v33 = vpop.f32.mrb[25].mxu0 }
 0x39c   :  { %v4340_v10 = vadd.f32 %v4339_v33, %v4338_v50 }
 0x39e   :  { %v3784_v20 = vadd.f32 %v4340_v10, %v3605_v0  ;;  %v4341_v51 = vpop.f32.mrb[26].mxu0 }
 0x39f   :  { %v4342_v5 = vpop.f32.mrb[27].mxu0 }
 0x3a0   :  { %v3895_v8 = vadd.f32 %v4378_v12, %v3784_v20  ;;  %v4343_v27 = vadd.f32 %v4342_v5, %v4341_v51 }
 0x3a2   :  { %3905 = vst [vmem:[#allocation8] sm:$0xff] %v3895_v8  ;;  %v3791_v23 = vadd.f32 %v4343_v27, %v3616_v36 }
 0x3a4   :  { %v3902_v39 = vadd.f32 %v4381_v25, %v3791_v23 }
 0x3a6   :  { %3906 = vst [vmem:[#allocation8 + $0x8] sm:$0xff] %v3902_v39 }
 0x3a7   :  { %5300 = shalt.err (!%p5297_p0)
}
 0x3a8   :  { %s5301_s12 = scalar_lea.hbm %s7758_s5, 256 }
 0x3a9   :  { %p5302_p1 = scmp.ne.s32.totalorder %s7758_s5, %s5301_s12  ;;  %p5305_p2 = scmp.lt.u32.totalorder %s5301_s12, %s7758_s5 }
 0x3ab   :  { %p5307_p3 = pnand %p5305_p2, %p5302_p1 }
 0x3ad   :  { %5310 = shalt.err (!%p5307_p3)
}
 0x3ae   :  { %3918 = dma.vmem_to_hbm [thread:$0]  %s3913_s8, 256, %s7758_s5, [#allocation4], %s5321_s1, %s5321_s1, %s5322_s17  }
 0x3af   :  { %5315 = dma.done.wait [#allocation4], 256  }
 0x3b0   :  { %5316 = vsyncadd [#allocation4], 4294967040 }
 0x3b1   :  { %3922 = vsyncpa [#allocation3], 1 }
 0x3b2   :  { %3923 = vsyncpa [#allocation6], 1 }
 0x3b3   :  { %3924 = vsyncpa [#allocation4], 1 }

</bundles_post_ra>
